<compile_context>
chip_gen: v6e
topology: v6e:2x2x1
jax: 0.10.0
libtpu: 0.0.40
codegen_flags: <defaults>
</compile_context>

<pallas_src>
import jax
import jax.numpy as jnp
from jax.experimental import pallas as pl
from jax.experimental.pallas import tpu as pltpu

_VMEM_LIMIT = 32 * 1024 * 1024  # safe on v5e/v6e/v7x; working sets are < 1 MiB


# --------------------------------------------------------------------------
# Pallas kernel 1: fused conv (4 window-slot matmuls) + bias + ReLU + 2x2 max
# --------------------------------------------------------------------------
def _conv_pool_kernel(a_ref, w_ref, b_ref, o_ref):
    # a_ref: (4, M, K)  grouped im2col (one slab per 2x2 pooling-window slot)
    # w_ref: (K, C)     flattened conv weight
    # b_ref: (1, C)     bias
    # o_ref: (M, C)     pooled output rows in (n, ip, jp) order
    m = None
    for t in range(4):  # static unroll; max over the 4 window positions
        y = jnp.dot(a_ref[t], w_ref[...], preferred_element_type=jnp.float32)
        m = y if m is None else jnp.maximum(m, y)
    # max commutes with +bias and ReLU (both monotone, bias uniform per slot)
    o_ref[...] = jnp.maximum(m + b_ref[...], 0.0)


def conv_bias_relu_maxpool(a, w, b):
    """a: (4, M, K) grouped im2col; w: (K, C); b: (C,).  Returns (M, C)."""
    _, M, K = a.shape
    C = w.shape[1]
    return pl.pallas_call(
        _conv_pool_kernel,
        out_shape=jax.ShapeDtypeStruct((M, C), jnp.float32),
        grid=(1,),
        in_specs=[
            pl.BlockSpec((4, M, K), lambda i: (0, 0, 0)),
            pl.BlockSpec((K, C), lambda i: (0, 0)),
            pl.BlockSpec((1, C), lambda i: (0, 0)),
        ],
        out_specs=pl.BlockSpec((M, C), lambda i: (0, 0)),
        compiler_params=pltpu.CompilerParams(
            dimension_semantics=("arbitrary",),
            vmem_limit_bytes=_VMEM_LIMIT,
        ),
    )(a, w, b.reshape(1, C))


# --------------------------------------------------------------------------
# Pallas kernel 2: fused ReLU(input) -> matmul -> bias   (fc1)
# --------------------------------------------------------------------------
def _fc_kernel(a_ref, w_ref, b_ref, o_ref):
    # F.relu(flattened) is mathematically an identity here (inputs are already
    # >= 0 after ReLU+maxpool) but is applied for fidelity with the module.
    a = jnp.maximum(a_ref[...], 0.0)
    o_ref[...] = (
        jnp.dot(a, w_ref[...], preferred_element_type=jnp.float32) + b_ref[...]
    )


def fc_relu_linear(x, w, b):
    """x: (N, K); w: (K, C); b: (C,).  Returns (N, C)."""
    N, K = x.shape
    C = w.shape[1]
    return pl.pallas_call(
        _fc_kernel,
        out_shape=jax.ShapeDtypeStruct((N, C), jnp.float32),
        grid=(1,),
        in_specs=[
            pl.BlockSpec((N, K), lambda i: (0, 0)),
            pl.BlockSpec((K, C), lambda i: (0, 0)),
            pl.BlockSpec((1, C), lambda i: (0, 0)),
        ],
        out_specs=pl.BlockSpec((N, C), lambda i: (0, 0)),
        compiler_params=pltpu.CompilerParams(
            dimension_semantics=("arbitrary",),
            vmem_limit_bytes=_VMEM_LIMIT,
        ),
    )(x, w, b.reshape(1, C))


# --------------------------------------------------------------------------
# XLA-side layout glue: im2col grouped by 2x2 ceil-mode pooling-window slot
# --------------------------------------------------------------------------
def _im2col_pool_groups(x, k, s, p):
    """x: (N, H, W, Cin) NHWC.

    Returns (A, Hp, Wp) with A: (4, N*Hp*Wp, k*k*Cin).
    Slab t = 2*di + dj holds the im2col rows of the conv-output position
    (2*ip + di, 2*jp + dj) clamped into range (ceil_mode partial windows).
    Row order inside a slab: (n, ip, jp); column order: (kh, kw, cin).
    """
    N, H, W, Cin = x.shape
    Ho = (H + 2 * p - k) // s + 1
    Wo = (W + 2 * p - k) // s + 1
    Hp, Wp = -(-Ho // 2), -(-Wo // 2)          # ceil_mode pooled sizes

    xp = jnp.pad(x, ((0, 0), (p, p), (p, p), (0, 0)))
    cols = []
    for kh in range(k):
        for kw in range(k):
            cols.append(
                xp[:, kh:kh + s * (Ho - 1) + 1:s, kw:kw + s * (Wo - 1) + 1:s, :]
            )
    patches = jnp.concatenate(cols, axis=-1)   # (N, Ho, Wo, k*k*Cin)

    slabs = []
    base_i = jnp.arange(Hp) * 2
    base_j = jnp.arange(Wp) * 2
    for di in range(2):
        for dj in range(2):
            gi = jnp.minimum(base_i + di, Ho - 1)
            gj = jnp.minimum(base_j + dj, Wo - 1)
            slab = jnp.take(patches, gi, axis=1)
            slab = jnp.take(slab, gj, axis=2)              # (N, Hp, Wp, K)
            slabs.append(slab.reshape(N * Hp * Wp, k * k * Cin))
    return jnp.stack(slabs, axis=0), Hp, Wp


# --------------------------------------------------------------------------
# parameters (synthetic, deterministic)
# --------------------------------------------------------------------------
class _ParamGen:
    def __init__(self, seed=0):
        self._key = jax.random.PRNGKey(seed)

    def normal(self, shape, scale):
        self._key, sub = jax.random.split(self._key)
        return jax.random.normal(sub, shape, jnp.float32) * scale


def init_params(seed=0):
    g = _ParamGen(seed)

    def conv(cin, cout, k):
        fan_in = k * k * cin
        return dict(
            w=g.normal((fan_in, cout), (2.0 / fan_in) ** 0.5),
            b=g.normal((cout,), 0.01),
        )

    def linear(cin, cout):
        return dict(
            w=g.normal((cin, cout), (1.0 / cin) ** 0.5),
            b=g.normal((cout,), 0.01),
        )

    return {
        "conv1": conv(1, 32, 8),
        "conv2": conv(32, 64, 4),
        "conv3": conv(64, 64, 3),
        "fc1": linear(256, 3),
    }


# --------------------------------------------------------------------------
# forward pass (mirrors Deep_QNet.forward)
# --------------------------------------------------------------------------
def deep_qnet_forward(params, x):
    x = x.reshape(-1, 1, 80, 80).astype(jnp.float32)   # x.view(-1, 1, 80, 80)
    x = jnp.transpose(x, (0, 2, 3, 1))                 # NCHW -> NHWC
    N = x.shape[0]

    # conv1(1->32, k=8, s=4, p=2) + ReLU + maxpool1(2,2,ceil)  -> (N,10,10,32)
    a, Hp, Wp = _im2col_pool_groups(x, k=8, s=4, p=2)
    p1 = params["conv1"]
    x = conv_bias_relu_maxpool(a, p1["w"], p1["b"]).reshape(N, Hp, Wp, -1)

    # conv2(32->64, k=4, s=2, p=1) + ReLU + maxpool2(2,2,ceil) -> (N,3,3,64)
    a, Hp, Wp = _im2col_pool_groups(x, k=4, s=2, p=1)
    p2 = params["conv2"]
    x = conv_bias_relu_maxpool(a, p2["w"], p2["b"]).reshape(N, Hp, Wp, -1)

    # conv3(64->64, k=3, s=1, p=1) + ReLU + maxpool3(2,2,ceil) -> (N,2,2,64)
    a, Hp, Wp = _im2col_pool_groups(x, k=3, s=1, p=1)
    p3 = params["conv3"]
    x = conv_bias_relu_maxpool(a, p3["w"], p3["b"]).reshape(N, Hp, Wp, -1)

    # torch.reshape(maxpool3_res, (-1, 256)) flattens NCHW order (c, h, w)
    flat = jnp.transpose(x, (0, 3, 1, 2)).reshape(N, 256)

    # fc1(F.relu(flattened))
    fc = params["fc1"]
    return fc_relu_linear(flat, fc["w"], fc["b"])       # (N, 3)


# --------------------------------------------------------------------------
if __name__ == "__main__":
    key = jax.random.PRNGKey(0)
    k_in, _ = jax.random.split(key)
    # forward() reshapes to (-1, 1, 80, 80); use batch = 2.
    x = jax.random.normal(k_in, (2, 1, 80, 80), jnp.float32)
    params = init_params(seed=0)

    fwd = jax.jit(deep_qnet_forward)
    out = fwd(params, x)
    out = jax.block_until_ready(out)

    assert out.shape == (2, 3), out.shape
    assert bool(jnp.all(jnp.isfinite(out)))
    print("KERNEL_OK")
</pallas_src>

<mosaic_0001>
module attributes {stable_mosaic.version = 11 : i64} {
  func.func @_conv_pool_kernel(%arg0: i32, %arg1: memref<4x200x64xf32, #tpu.memory_space<vmem>>, %arg2: memref<64x32xf32, #tpu.memory_space<vmem>>, %arg3: memref<1x32xf32, #tpu.memory_space<vmem>>, %arg4: memref<200x32xf32, #tpu.memory_space<vmem>>) attributes {dimension_semantics = [#tpu.dimension_semantics<arbitrary>], iteration_bounds = array<i64: 1>, scalar_prefetch = 0 : i64, scratch_operands = 0 : i64, tpu.core_type = #tpu.core_type<tc>, window_params = [{pipeline_mode = #tpu.pipeline_mode<synchronous>, transform_indices = @transform_0, window_bounds = array<i64: 4, 200, 64>}, {pipeline_mode = #tpu.pipeline_mode<synchronous>, transform_indices = @transform_1, window_bounds = array<i64: 64, 32>}, {pipeline_mode = #tpu.pipeline_mode<synchronous>, transform_indices = @transform_2, window_bounds = array<i64: 1, 32>}, {pipeline_mode = #tpu.pipeline_mode<synchronous>, transform_indices = @transform_3, window_bounds = array<i64: 200, 32>}]} {
    %c0 = arith.constant 0 : index
    %c0_0 = arith.constant 0 : index
    %c0_1 = arith.constant 0 : index
    %0 = vector.load %arg1[%c0, %c0_0, %c0_1] : memref<4x200x64xf32, #tpu.memory_space<vmem>>, vector<1x200x64xf32>
    %1 = vector.shape_cast %0 : vector<1x200x64xf32> to vector<200x64xf32>
    %c0_2 = arith.constant 0 : index
    %c0_3 = arith.constant 0 : index
    %2 = vector.load %arg2[%c0_2, %c0_3] : memref<64x32xf32, #tpu.memory_space<vmem>>, vector<64x32xf32>
    %cst = arith.constant dense<0.000000e+00> : vector<200x32xf32>
    %3 = tpu.matmul %1, %2, %cst {dimension_numbers = #tpu.dot_dimension_numbers<[1], [0], [0], [1], [0, 0, 1, 1], [], []>} : vector<200x64xf32>, vector<64x32xf32>, vector<200x32xf32> -> vector<200x32xf32>
    %c1 = arith.constant 1 : index
    %c0_4 = arith.constant 0 : index
    %c0_5 = arith.constant 0 : index
    %4 = vector.load %arg1[%c1, %c0_4, %c0_5] : memref<4x200x64xf32, #tpu.memory_space<vmem>>, vector<1x200x64xf32>
    %5 = vector.shape_cast %4 : vector<1x200x64xf32> to vector<200x64xf32>
    %c0_6 = arith.constant 0 : index
    %c0_7 = arith.constant 0 : index
    %6 = vector.load %arg2[%c0_6, %c0_7] : memref<64x32xf32, #tpu.memory_space<vmem>>, vector<64x32xf32>
    %cst_8 = arith.constant dense<0.000000e+00> : vector<200x32xf32>
    %7 = tpu.matmul %5, %6, %cst_8 {dimension_numbers = #tpu.dot_dimension_numbers<[1], [0], [0], [1], [0, 0, 1, 1], [], []>} : vector<200x64xf32>, vector<64x32xf32>, vector<200x32xf32> -> vector<200x32xf32>
    %8 = arith.maximumf %3, %7 : vector<200x32xf32>
    %c2 = arith.constant 2 : index
    %c0_9 = arith.constant 0 : index
    %c0_10 = arith.constant 0 : index
    %9 = vector.load %arg1[%c2, %c0_9, %c0_10] : memref<4x200x64xf32, #tpu.memory_space<vmem>>, vector<1x200x64xf32>
    %10 = vector.shape_cast %9 : vector<1x200x64xf32> to vector<200x64xf32>
    %c0_11 = arith.constant 0 : index
    %c0_12 = arith.constant 0 : index
    %11 = vector.load %arg2[%c0_11, %c0_12] : memref<64x32xf32, #tpu.memory_space<vmem>>, vector<64x32xf32>
    %cst_13 = arith.constant dense<0.000000e+00> : vector<200x32xf32>
    %12 = tpu.matmul %10, %11, %cst_13 {dimension_numbers = #tpu.dot_dimension_numbers<[1], [0], [0], [1], [0, 0, 1, 1], [], []>} : vector<200x64xf32>, vector<64x32xf32>, vector<200x32xf32> -> vector<200x32xf32>
    %13 = arith.maximumf %8, %12 : vector<200x32xf32>
    %c3 = arith.constant 3 : index
    %c0_14 = arith.constant 0 : index
    %c0_15 = arith.constant 0 : index
    %14 = vector.load %arg1[%c3, %c0_14, %c0_15] : memref<4x200x64xf32, #tpu.memory_space<vmem>>, vector<1x200x64xf32>
    %15 = vector.shape_cast %14 : vector<1x200x64xf32> to vector<200x64xf32>
    %c0_16 = arith.constant 0 : index
    %c0_17 = arith.constant 0 : index
    %16 = vector.load %arg2[%c0_16, %c0_17] : memref<64x32xf32, #tpu.memory_space<vmem>>, vector<64x32xf32>
    %cst_18 = arith.constant dense<0.000000e+00> : vector<200x32xf32>
    %17 = tpu.matmul %15, %16, %cst_18 {dimension_numbers = #tpu.dot_dimension_numbers<[1], [0], [0], [1], [0, 0, 1, 1], [], []>} : vector<200x64xf32>, vector<64x32xf32>, vector<200x32xf32> -> vector<200x32xf32>
    %18 = arith.maximumf %13, %17 : vector<200x32xf32>
    %c0_19 = arith.constant 0 : index
    %c0_20 = arith.constant 0 : index
    %19 = vector.load %arg3[%c0_19, %c0_20] : memref<1x32xf32, #tpu.memory_space<vmem>>, vector<1x32xf32>
    %20 = vector.broadcast %19 : vector<1x32xf32> to vector<200x32xf32>
    %21 = arith.addf %18, %20 : vector<200x32xf32>
    %cst_21 = arith.constant 0.000000e+00 : f32
    %22 = vector.broadcast %cst_21 : f32 to vector<200x32xf32>
    %23 = arith.maximumf %21, %22 : vector<200x32xf32>
    %c0_22 = arith.constant 0 : index
    %c0_23 = arith.constant 0 : index
    %24 = vector.load %arg4[%c0_22, %c0_23] : memref<200x32xf32, #tpu.memory_space<vmem>>, vector<200x32xf32>
    tpu.vector_store %arg4[%c0_22, %c0_23], %23 {strides = array<i32>} : memref<200x32xf32, #tpu.memory_space<vmem>>, vector<200x32xf32>,
    return
  }
  func.func @transform_0(%arg0: i32) -> (i32, i32, i32) {
    %c0_i32 = arith.constant 0 : i32
    %c0_i32_0 = arith.constant 0 : i32
    %c0_i32_1 = arith.constant 0 : i32
    %c0_i32_2 = arith.constant 0 : i32
    return %c0_i32, %c0_i32_0, %c0_i32_1 : i32, i32, i32
  }
  func.func @transform_1(%arg0: i32) -> (i32, i32) {
    %c0_i32 = arith.constant 0 : i32
    %c0_i32_0 = arith.constant 0 : i32
    %c0_i32_1 = arith.constant 0 : i32
    return %c0_i32, %c0_i32_0 : i32, i32
  }
  func.func @transform_2(%arg0: i32) -> (i32, i32) {
    %c0_i32 = arith.constant 0 : i32
    %c0_i32_0 = arith.constant 0 : i32
    %c0_i32_1 = arith.constant 0 : i32
    return %c0_i32, %c0_i32_0 : i32, i32
  }
  func.func @transform_3(%arg0: i32) -> (i32, i32) {
    %c0_i32 = arith.constant 0 : i32
    %c0_i32_0 = arith.constant 0 : i32
    %c0_i32_1 = arith.constant 0 : i32
    return %c0_i32, %c0_i32_0 : i32, i32
  }
}

module attributes {stable_mosaic.version = 11 : i64} {
  func.func @_conv_pool_kernel(%arg0: i32, %arg1: memref<4x18x512xf32, #tpu.memory_space<vmem>>, %arg2: memref<512x64xf32, #tpu.memory_space<vmem>>, %arg3: memref<1x64xf32, #tpu.memory_space<vmem>>, %arg4: memref<18x64xf32, #tpu.memory_space<vmem>>) attributes {dimension_semantics = [#tpu.dimension_semantics<arbitrary>], iteration_bounds = array<i64: 1>, scalar_prefetch = 0 : i64, scratch_operands = 0 : i64, tpu.core_type = #tpu.core_type<tc>, window_params = [{pipeline_mode = #tpu.pipeline_mode<synchronous>, transform_indices = @transform_0, window_bounds = array<i64: 4, 18, 512>}, {pipeline_mode = #tpu.pipeline_mode<synchronous>, transform_indices = @transform_1, window_bounds = array<i64: 512, 64>}, {pipeline_mode = #tpu.pipeline_mode<synchronous>, transform_indices = @transform_2, window_bounds = array<i64: 1, 64>}, {pipeline_mode = #tpu.pipeline_mode<synchronous>, transform_indices = @transform_3, window_bounds = array<i64: 18, 64>}]} {
    %c0 = arith.constant 0 : index
    %c0_0 = arith.constant 0 : index
    %c0_1 = arith.constant 0 : index
    %0 = vector.load %arg1[%c0, %c0_0, %c0_1] : memref<4x18x512xf32, #tpu.memory_space<vmem>>, vector<1x18x512xf32>
    %1 = vector.shape_cast %0 : vector<1x18x512xf32> to vector<18x512xf32>
    %c0_2 = arith.constant 0 : index
    %c0_3 = arith.constant 0 : index
    %2 = vector.load %arg2[%c0_2, %c0_3] : memref<512x64xf32, #tpu.memory_space<vmem>>, vector<512x64xf32>
    %cst = arith.constant dense<0.000000e+00> : vector<18x64xf32>
    %3 = tpu.matmul %1, %2, %cst {dimension_numbers = #tpu.dot_dimension_numbers<[1], [0], [0], [1], [0, 0, 1, 1], [], []>} : vector<18x512xf32>, vector<512x64xf32>, vector<18x64xf32> -> vector<18x64xf32>
    %c1 = arith.constant 1 : index
    %c0_4 = arith.constant 0 : index
    %c0_5 = arith.constant 0 : index
    %4 = vector.load %arg1[%c1, %c0_4, %c0_5] : memref<4x18x512xf32, #tpu.memory_space<vmem>>, vector<1x18x512xf32>
    %5 = vector.shape_cast %4 : vector<1x18x512xf32> to vector<18x512xf32>
    %c0_6 = arith.constant 0 : index
    %c0_7 = arith.constant 0 : index
    %6 = vector.load %arg2[%c0_6, %c0_7] : memref<512x64xf32, #tpu.memory_space<vmem>>, vector<512x64xf32>
    %cst_8 = arith.constant dense<0.000000e+00> : vector<18x64xf32>
    %7 = tpu.matmul %5, %6, %cst_8 {dimension_numbers = #tpu.dot_dimension_numbers<[1], [0], [0], [1], [0, 0, 1, 1], [], []>} : vector<18x512xf32>, vector<512x64xf32>, vector<18x64xf32> -> vector<18x64xf32>
    %8 = arith.maximumf %3, %7 : vector<18x64xf32>
    %c2 = arith.constant 2 : index
    %c0_9 = arith.constant 0 : index
    %c0_10 = arith.constant 0 : index
    %9 = vector.load %arg1[%c2, %c0_9, %c0_10] : memref<4x18x512xf32, #tpu.memory_space<vmem>>, vector<1x18x512xf32>
    %10 = vector.shape_cast %9 : vector<1x18x512xf32> to vector<18x512xf32>
    %c0_11 = arith.constant 0 : index
    %c0_12 = arith.constant 0 : index
    %11 = vector.load %arg2[%c0_11, %c0_12] : memref<512x64xf32, #tpu.memory_space<vmem>>, vector<512x64xf32>
    %cst_13 = arith.constant dense<0.000000e+00> : vector<18x64xf32>
    %12 = tpu.matmul %10, %11, %cst_13 {dimension_numbers = #tpu.dot_dimension_numbers<[1], [0], [0], [1], [0, 0, 1, 1], [], []>} : vector<18x512xf32>, vector<512x64xf32>, vector<18x64xf32> -> vector<18x64xf32>
    %13 = arith.maximumf %8, %12 : vector<18x64xf32>
    %c3 = arith.constant 3 : index
    %c0_14 = arith.constant 0 : index
    %c0_15 = arith.constant 0 : index
    %14 = vector.load %arg1[%c3, %c0_14, %c0_15] : memref<4x18x512xf32, #tpu.memory_space<vmem>>, vector<1x18x512xf32>
    %15 = vector.shape_cast %14 : vector<1x18x512xf32> to vector<18x512xf32>
    %c0_16 = arith.constant 0 : index
    %c0_17 = arith.constant 0 : index
    %16 = vector.load %arg2[%c0_16, %c0_17] : memref<512x64xf32, #tpu.memory_space<vmem>>, vector<512x64xf32>
    %cst_18 = arith.constant dense<0.000000e+00> : vector<18x64xf32>
    %17 = tpu.matmul %15, %16, %cst_18 {dimension_numbers = #tpu.dot_dimension_numbers<[1], [0], [0], [1], [0, 0, 1, 1], [], []>} : vector<18x512xf32>, vector<512x64xf32>, vector<18x64xf32> -> vector<18x64xf32>
    %18 = arith.maximumf %13, %17 : vector<18x64xf32>
    %c0_19 = arith.constant 0 : index
    %c0_20 = arith.constant 0 : index
    %19 = vector.load %arg3[%c0_19, %c0_20] : memref<1x64xf32, #tpu.memory_space<vmem>>, vector<1x64xf32>
    %20 = vector.broadcast %19 : vector<1x64xf32> to vector<18x64xf32>
    %21 = arith.addf %18, %20 : vector<18x64xf32>
    %cst_21 = arith.constant 0.000000e+00 : f32
    %22 = vector.broadcast %cst_21 : f32 to vector<18x64xf32>
    %23 = arith.maximumf %21, %22 : vector<18x64xf32>
    %c0_22 = arith.constant 0 : index
    %c0_23 = arith.constant 0 : index
    %24 = vector.load %arg4[%c0_22, %c0_23] : memref<18x64xf32, #tpu.memory_space<vmem>>, vector<18x64xf32>
    tpu.vector_store %arg4[%c0_22, %c0_23], %23 {strides = array<i32>} : memref<18x64xf32, #tpu.memory_space<vmem>>, vector<18x64xf32>,
    return
  }
  func.func @transform_0(%arg0: i32) -> (i32, i32, i32) {
    %c0_i32 = arith.constant 0 : i32
    %c0_i32_0 = arith.constant 0 : i32
    %c0_i32_1 = arith.constant 0 : i32
    %c0_i32_2 = arith.constant 0 : i32
    return %c0_i32, %c0_i32_0, %c0_i32_1 : i32, i32, i32
  }
  func.func @transform_1(%arg0: i32) -> (i32, i32) {
    %c0_i32 = arith.constant 0 : i32
    %c0_i32_0 = arith.constant 0 : i32
    %c0_i32_1 = arith.constant 0 : i32
    return %c0_i32, %c0_i32_0 : i32, i32
  }
  func.func @transform_2(%arg0: i32) -> (i32, i32) {
    %c0_i32 = arith.constant 0 : i32
    %c0_i32_0 = arith.constant 0 : i32
    %c0_i32_1 = arith.constant 0 : i32
    return %c0_i32, %c0_i32_0 : i32, i32
  }
  func.func @transform_3(%arg0: i32) -> (i32, i32) {
    %c0_i32 = arith.constant 0 : i32
    %c0_i32_0 = arith.constant 0 : i32
    %c0_i32_1 = arith.constant 0 : i32
    return %c0_i32, %c0_i32_0 : i32, i32
  }
}

module attributes {stable_mosaic.version = 11 : i64} {
  func.func @_conv_pool_kernel(%arg0: i32, %arg1: memref<4x8x576xf32, #tpu.memory_space<vmem>>, %arg2: memref<576x64xf32, #tpu.memory_space<vmem>>, %arg3: memref<1x64xf32, #tpu.memory_space<vmem>>, %arg4: memref<8x64xf32, #tpu.memory_space<vmem>>) attributes {dimension_semantics = [#tpu.dimension_semantics<arbitrary>], iteration_bounds = array<i64: 1>, scalar_prefetch = 0 : i64, scratch_operands = 0 : i64, tpu.core_type = #tpu.core_type<tc>, window_params = [{pipeline_mode = #tpu.pipeline_mode<synchronous>, transform_indices = @transform_0, window_bounds = array<i64: 4, 8, 576>}, {pipeline_mode = #tpu.pipeline_mode<synchronous>, transform_indices = @transform_1, window_bounds = array<i64: 576, 64>}, {pipeline_mode = #tpu.pipeline_mode<synchronous>, transform_indices = @transform_2, window_bounds = array<i64: 1, 64>}, {pipeline_mode = #tpu.pipeline_mode<synchronous>, transform_indices = @transform_3, window_bounds = array<i64: 8, 64>}]} {
    %c0 = arith.constant 0 : index
    %c0_0 = arith.constant 0 : index
    %c0_1 = arith.constant 0 : index
    %0 = vector.load %arg1[%c0, %c0_0, %c0_1] : memref<4x8x576xf32, #tpu.memory_space<vmem>>, vector<1x8x576xf32>
    %1 = vector.shape_cast %0 : vector<1x8x576xf32> to vector<8x576xf32>
    %c0_2 = arith.constant 0 : index
    %c0_3 = arith.constant 0 : index
    %2 = vector.load %arg2[%c0_2, %c0_3] : memref<576x64xf32, #tpu.memory_space<vmem>>, vector<576x64xf32>
    %cst = arith.constant dense<0.000000e+00> : vector<8x64xf32>
    %3 = tpu.matmul %1, %2, %cst {dimension_numbers = #tpu.dot_dimension_numbers<[1], [0], [0], [1], [0, 0, 1, 1], [], []>} : vector<8x576xf32>, vector<576x64xf32>, vector<8x64xf32> -> vector<8x64xf32>
    %c1 = arith.constant 1 : index
    %c0_4 = arith.constant 0 : index
    %c0_5 = arith.constant 0 : index
    %4 = vector.load %arg1[%c1, %c0_4, %c0_5] : memref<4x8x576xf32, #tpu.memory_space<vmem>>, vector<1x8x576xf32>
    %5 = vector.shape_cast %4 : vector<1x8x576xf32> to vector<8x576xf32>
    %c0_6 = arith.constant 0 : index
    %c0_7 = arith.constant 0 : index
    %6 = vector.load %arg2[%c0_6, %c0_7] : memref<576x64xf32, #tpu.memory_space<vmem>>, vector<576x64xf32>
    %cst_8 = arith.constant dense<0.000000e+00> : vector<8x64xf32>
    %7 = tpu.matmul %5, %6, %cst_8 {dimension_numbers = #tpu.dot_dimension_numbers<[1], [0], [0], [1], [0, 0, 1, 1], [], []>} : vector<8x576xf32>, vector<576x64xf32>, vector<8x64xf32> -> vector<8x64xf32>
    %8 = arith.maximumf %3, %7 : vector<8x64xf32>
    %c2 = arith.constant 2 : index
    %c0_9 = arith.constant 0 : index
    %c0_10 = arith.constant 0 : index
    %9 = vector.load %arg1[%c2, %c0_9, %c0_10] : memref<4x8x576xf32, #tpu.memory_space<vmem>>, vector<1x8x576xf32>
    %10 = vector.shape_cast %9 : vector<1x8x576xf32> to vector<8x576xf32>
    %c0_11 = arith.constant 0 : index
    %c0_12 = arith.constant 0 : index
    %11 = vector.load %arg2[%c0_11, %c0_12] : memref<576x64xf32, #tpu.memory_space<vmem>>, vector<576x64xf32>
    %cst_13 = arith.constant dense<0.000000e+00> : vector<8x64xf32>
    %12 = tpu.matmul %10, %11, %cst_13 {dimension_numbers = #tpu.dot_dimension_numbers<[1], [0], [0], [1], [0, 0, 1, 1], [], []>} : vector<8x576xf32>, vector<576x64xf32>, vector<8x64xf32> -> vector<8x64xf32>
    %13 = arith.maximumf %8, %12 : vector<8x64xf32>
    %c3 = arith.constant 3 : index
    %c0_14 = arith.constant 0 : index
    %c0_15 = arith.constant 0 : index
    %14 = vector.load %arg1[%c3, %c0_14, %c0_15] : memref<4x8x576xf32, #tpu.memory_space<vmem>>, vector<1x8x576xf32>
    %15 = vector.shape_cast %14 : vector<1x8x576xf32> to vector<8x576xf32>
    %c0_16 = arith.constant 0 : index
    %c0_17 = arith.constant 0 : index
    %16 = vector.load %arg2[%c0_16, %c0_17] : memref<576x64xf32, #tpu.memory_space<vmem>>, vector<576x64xf32>
    %cst_18 = arith.constant dense<0.000000e+00> : vector<8x64xf32>
    %17 = tpu.matmul %15, %16, %cst_18 {dimension_numbers = #tpu.dot_dimension_numbers<[1], [0], [0], [1], [0, 0, 1, 1], [], []>} : vector<8x576xf32>, vector<576x64xf32>, vector<8x64xf32> -> vector<8x64xf32>
    %18 = arith.maximumf %13, %17 : vector<8x64xf32>
    %c0_19 = arith.constant 0 : index
    %c0_20 = arith.constant 0 : index
    %19 = vector.load %arg3[%c0_19, %c0_20] : memref<1x64xf32, #tpu.memory_space<vmem>>, vector<1x64xf32>
    %20 = vector.broadcast %19 : vector<1x64xf32> to vector<8x64xf32>
    %21 = arith.addf %18, %20 : vector<8x64xf32>
    %cst_21 = arith.constant 0.000000e+00 : f32
    %22 = vector.broadcast %cst_21 : f32 to vector<8x64xf32>
    %23 = arith.maximumf %21, %22 : vector<8x64xf32>
    %c0_22 = arith.constant 0 : index
    %c0_23 = arith.constant 0 : index
    %24 = vector.load %arg4[%c0_22, %c0_23] : memref<8x64xf32, #tpu.memory_space<vmem>>, vector<8x64xf32>
    tpu.vector_store %arg4[%c0_22, %c0_23], %23 {strides = array<i32>} : memref<8x64xf32, #tpu.memory_space<vmem>>, vector<8x64xf32>,
    return
  }
  func.func @transform_0(%arg0: i32) -> (i32, i32, i32) {
    %c0_i32 = arith.constant 0 : i32
    %c0_i32_0 = arith.constant 0 : i32
    %c0_i32_1 = arith.constant 0 : i32
    %c0_i32_2 = arith.constant 0 : i32
    return %c0_i32, %c0_i32_0, %c0_i32_1 : i32, i32, i32
  }
  func.func @transform_1(%arg0: i32) -> (i32, i32) {
    %c0_i32 = arith.constant 0 : i32
    %c0_i32_0 = arith.constant 0 : i32
    %c0_i32_1 = arith.constant 0 : i32
    return %c0_i32, %c0_i32_0 : i32, i32
  }
  func.func @transform_2(%arg0: i32) -> (i32, i32) {
    %c0_i32 = arith.constant 0 : i32
    %c0_i32_0 = arith.constant 0 : i32
    %c0_i32_1 = arith.constant 0 : i32
    return %c0_i32, %c0_i32_0 : i32, i32
  }
  func.func @transform_3(%arg0: i32) -> (i32, i32) {
    %c0_i32 = arith.constant 0 : i32
    %c0_i32_0 = arith.constant 0 : i32
    %c0_i32_1 = arith.constant 0 : i32
    return %c0_i32, %c0_i32_0 : i32, i32
  }
}

module attributes {stable_mosaic.version = 11 : i64} {
  func.func @_fc_kernel(%arg0: i32, %arg1: memref<2x256xf32, #tpu.memory_space<vmem>>, %arg2: memref<256x3xf32, #tpu.memory_space<vmem>>, %arg3: memref<1x3xf32, #tpu.memory_space<vmem>>, %arg4: memref<2x3xf32, #tpu.memory_space<vmem>>) attributes {dimension_semantics = [#tpu.dimension_semantics<arbitrary>], iteration_bounds = array<i64: 1>, scalar_prefetch = 0 : i64, scratch_operands = 0 : i64, tpu.core_type = #tpu.core_type<tc>, window_params = [{pipeline_mode = #tpu.pipeline_mode<synchronous>, transform_indices = @transform_0, window_bounds = array<i64: 2, 256>}, {pipeline_mode = #tpu.pipeline_mode<synchronous>, transform_indices = @transform_1, window_bounds = array<i64: 256, 3>}, {pipeline_mode = #tpu.pipeline_mode<synchronous>, transform_indices = @transform_2, window_bounds = array<i64: 1, 3>}, {pipeline_mode = #tpu.pipeline_mode<synchronous>, transform_indices = @transform_3, window_bounds = array<i64: 2, 3>}]} {
    %c0 = arith.constant 0 : index
    %c0_0 = arith.constant 0 : index
    %0 = vector.load %arg1[%c0, %c0_0] : memref<2x256xf32, #tpu.memory_space<vmem>>, vector<2x256xf32>
    %cst = arith.constant 0.000000e+00 : f32
    %1 = vector.broadcast %cst : f32 to vector<2x256xf32>
    %2 = arith.maximumf %0, %1 : vector<2x256xf32>
    %c0_1 = arith.constant 0 : index
    %c0_2 = arith.constant 0 : index
    %3 = vector.load %arg2[%c0_1, %c0_2] : memref<256x3xf32, #tpu.memory_space<vmem>>, vector<256x3xf32>
    %cst_3 = arith.constant dense<0.000000e+00> : vector<2x3xf32>
    %4 = tpu.matmul %2, %3, %cst_3 {dimension_numbers = #tpu.dot_dimension_numbers<[1], [0], [0], [1], [0, 0, 1, 1], [], []>} : vector<2x256xf32>, vector<256x3xf32>, vector<2x3xf32> -> vector<2x3xf32>
    %c0_4 = arith.constant 0 : index
    %c0_5 = arith.constant 0 : index
    %5 = vector.load %arg3[%c0_4, %c0_5] : memref<1x3xf32, #tpu.memory_space<vmem>>, vector<1x3xf32>
    %6 = vector.broadcast %5 : vector<1x3xf32> to vector<2x3xf32>
    %7 = arith.addf %4, %6 : vector<2x3xf32>
    %c0_6 = arith.constant 0 : index
    %c0_7 = arith.constant 0 : index
    %8 = vector.load %arg4[%c0_6, %c0_7] : memref<2x3xf32, #tpu.memory_space<vmem>>, vector<2x3xf32>
    tpu.vector_store %arg4[%c0_6, %c0_7], %7 {strides = array<i32>} : memref<2x3xf32, #tpu.memory_space<vmem>>, vector<2x3xf32>,
    return
  }
  func.func @transform_0(%arg0: i32) -> (i32, i32) {
    %c0_i32 = arith.constant 0 : i32
    %c0_i32_0 = arith.constant 0 : i32
    %c0_i32_1 = arith.constant 0 : i32
    return %c0_i32, %c0_i32_0 : i32, i32
  }
  func.func @transform_1(%arg0: i32) -> (i32, i32) {
    %c0_i32 = arith.constant 0 : i32
    %c0_i32_0 = arith.constant 0 : i32
    %c0_i32_1 = arith.constant 0 : i32
    return %c0_i32, %c0_i32_0 : i32, i32
  }
  func.func @transform_2(%arg0: i32) -> (i32, i32) {
    %c0_i32 = arith.constant 0 : i32
    %c0_i32_0 = arith.constant 0 : i32
    %c0_i32_1 = arith.constant 0 : i32
    return %c0_i32, %c0_i32_0 : i32, i32
  }
  func.func @transform_3(%arg0: i32) -> (i32, i32) {
    %c0_i32 = arith.constant 0 : i32
    %c0_i32_0 = arith.constant 0 : i32
    %c0_i32_1 = arith.constant 0 : i32
    return %c0_i32, %c0_i32_0 : i32, i32
  }
}

</mosaic_0001>

<bundles_post_ra>
// kernel: deep_qnet_forward.4
= control target key start
LH: loop header
LB: loop body
LE: loop exit
PB: predicated region body
PF: predicated region fallthrough
CT: control target
= control target key end

     0   :  { %v2022_v0 = vmov 0.0   ;;  %vm47_vm0 = vcmask 523264   ;;  %vm2023_vm1 = vmmov 0   ;;  %vm1318_vm2 = vcmask 261120   ;;  %s3097_s1 = inlined_call_operand.vmem [shape: f32[64,32], index: 1, kind: input, shape index: {}]   ;;  %s3098_s0 = inlined_call_operand.vmem [shape: f32[4,200,64], index: 0, kind: input, shape index: {}]   ;;  %s3099_s2 = inlined_call_operand.vmem [shape: f32[1,32], index: 2, kind: input, shape index: {}]   ;;  %s3100_s3 = inlined_call_operand.vmem [shape: f32[200,32], index: 3, kind: output, shape index: {}]  }
   0x1   :  { %1656 = vmatprep.subr.mxu0 %v2022_v0  ;;  %v46_v1 = vld [vmem:[%s3097_s1 + $0x38] sm:$0xff]  ;;  %1747 = vmatprep.subr.mxu1 %v2022_v0  ;;  %v2052_v2 = vld [vmem:[%s3097_s1 + $0x30] sm:$0xff]  ;;  %v2059_v3 = vld [vmem:[%s3097_s1 + $0x28] sm:$0xff] }
   0x2   :  { %1657 = vmatpush3.msra.mxu0 %v46_v1  ;;  %1748 = vmatpush3.msra.mxu1 %v46_v1  ;;  %v2068_v4 = vld [vmem:[%s3097_s1 + $0x20] sm:$0xff]  ;;  %v2077_v5 = vld [vmem:[%s3097_s1 + $0x18] sm:$0xff]  ;;  %v2086_v6 = vld [vmem:[%s3097_s1 + $0x10] sm:$0xff] }
   0x3   :  { %1658 = vmatprep.subr.mxu0 %v2022_v0  ;;  %1749 = vmatprep.subr.mxu1 %v2022_v0  ;;  %v2095_v7 = vld [vmem:[%s3097_s1 + $0x8] sm:$0xff]  ;;  %v2104_v8 = vld [vmem:[%s3097_s1] sm:$0xff]  ;;  %v1374_v12 = vld [vmem:[%s3098_s0 + $0xd0] sm:$0xff] }
   0x4   :  { %1659 = vmatpush3.msra.mxu0 %v2052_v2  ;;  %1750 = vmatpush3.msra.mxu1 %v2052_v2  ;;  %v14_v9 = vld [vmem:[%s3098_s0] sm:$0xff]  ;;  %v1373_v10 = vld [vmem:[%s3098_s0 + $0xc8] sm:$0xff]  ;;  %v16_v13 = vld [vmem:[%s3098_s0 + $0x10] sm:$0xff] }
   0x5   :  { %1660 = vmatprep.subr.mxu0 %v2022_v0  ;;  %1751 = vmatprep.subr.mxu1 %v2022_v0  ;;  %v15_v11 = vld [vmem:[%s3098_s0 + $0x8] sm:$0xff]  ;;  %v1375_v14 = vld [vmem:[%s3098_s0 + $0xd8] sm:$0xff]  ;;  %v1376_v16 = vld [vmem:[%s3098_s0 + $0xe0] sm:$0xff] }
   0x6   :  { %1661 = vmatpush3.msra.mxu0 %v2059_v3  ;;  %1752 = vmatpush3.msra.mxu1 %v2059_v3  ;;  %v17_v15 = vld [vmem:[%s3098_s0 + $0x18] sm:$0xff]  ;;  %v18_v17 = vld [vmem:[%s3098_s0 + $0x20] sm:$0xff]  ;;  %v1377_v18 = vld [vmem:[%s3098_s0 + $0xe8] sm:$0xff] }
   0x7   :  { %1662 = vmatprep.subr.mxu0 %v2022_v0  ;;  %1753 = vmatprep.subr.mxu1 %v2022_v0  ;;  %v19_v19 = vld [vmem:[%s3098_s0 + $0x28] sm:$0xff]  ;;  %v1378_v20 = vld [vmem:[%s3098_s0 + $0xf0] sm:$0xff]  ;;  %v1379_v22 = vld [vmem:[%s3098_s0 + $0xf8] sm:$0xff] }
   0x8   :  { %1663 = vmatpush3.msra.mxu0 %v2068_v4  ;;  %1754 = vmatpush3.msra.mxu1 %v2068_v4  ;;  %v20_v21 = vld [vmem:[%s3098_s0 + $0x30] sm:$0xff]  ;;  %v21_v23 = vld [vmem:[%s3098_s0 + $0x38] sm:$0xff]  ;;  %v1380_v24 = vld [vmem:[%s3098_s0 + $0x100] sm:$0xff] }
   0x9   :  { %1664 = vmatprep.subr.mxu0 %v2022_v0  ;;  %1755 = vmatprep.subr.mxu1 %v2022_v0  ;;  %v22_v25 = vld [vmem:[%s3098_s0 + $0x40] sm:$0xff]  ;;  %v1381_v26 = vld [vmem:[%s3098_s0 + $0x108] sm:$0xff]  ;;  %v1382_v28 = vld [vmem:[%s3098_s0 + $0x110] sm:$0xff] }
   0xa   :  { %1665 = vmatpush3.msra.mxu0 %v2077_v5  ;;  %1756 = vmatpush3.msra.mxu1 %v2077_v5  ;;  %v23_v27 = vld [vmem:[%s3098_s0 + $0x48] sm:$0xff]  ;;  %v24_v29 = vld [vmem:[%s3098_s0 + $0x50] sm:$0xff]  ;;  %v1383_v30 = vld [vmem:[%s3098_s0 + $0x118] sm:$0xff] }
   0xb   :  { %1666 = vmatprep.subr.mxu0 %v2022_v0  ;;  %1757 = vmatprep.subr.mxu1 %v2022_v0  ;;  %v25_v31 = vld [vmem:[%s3098_s0 + $0x58] sm:$0xff]  ;;  %v1384_v32 = vld [vmem:[%s3098_s0 + $0x120] sm:$0xff]  ;;  %v1385_v34 = vld [vmem:[%s3098_s0 + $0x128] sm:$0xff] }
   0xc   :  { %1667 = vmatpush3.msra.mxu0 %v2086_v6  ;;  %1758 = vmatpush3.msra.mxu1 %v2086_v6  ;;  %v26_v33 = vld [vmem:[%s3098_s0 + $0x60] sm:$0xff]  ;;  %v27_v35 = vld [vmem:[%s3098_s0 + $0x68] sm:$0xff]  ;;  %v1386_v36 = vld [vmem:[%s3098_s0 + $0x130] sm:$0xff] }
   0xd   :  { %1668 = vmatprep.subr.mxu0 %v2022_v0  ;;  %1759 = vmatprep.subr.mxu1 %v2022_v0  ;;  %v28_v37 = vld [vmem:[%s3098_s0 + $0x70] sm:$0xff]  ;;  %v1387_v38 = vld [vmem:[%s3098_s0 + $0x138] sm:$0xff]  ;;  %v1388_v40 = vld [vmem:[%s3098_s0 + $0x140] sm:$0xff] }
   0xe   :  { %1669 = vmatpush3.msra.mxu0 %v2095_v7  ;;  %1760 = vmatpush3.msra.mxu1 %v2095_v7  ;;  %v29_v39 = vld [vmem:[%s3098_s0 + $0x78] sm:$0xff]  ;;  %v30_v41 = vld [vmem:[%s3098_s0 + $0x80] sm:$0xff]  ;;  %v1389_v42 = vld [vmem:[%s3098_s0 + $0x148] sm:$0xff] }
   0xf   :  { %1670 = vmatprep.subr.mxu0 %v2022_v0  ;;  %1672 = vmatprep.mubr.msk.f32.mxu0 %vm2023_vm1, %v2022_v0  ;;  %v31_v43 = vld [vmem:[%s3098_s0 + $0x88] sm:$0xff]  ;;  %v1390_v44 = vld [vmem:[%s3098_s0 + $0x150] sm:$0xff]  ;;  %v1391_v46 = vld [vmem:[%s3098_s0 + $0x158] sm:$0xff] }
  0x10   :  { %1671 = vmatpush3.msra.mxu0 %v2104_v8  ;;  %1761 = vmatprep.subr.mxu1 %v2022_v0  ;;  %v32_v45 = vld [vmem:[%s3098_s0 + $0x90] sm:$0xff]  ;;  %v33_v47 = vld [vmem:[%s3098_s0 + $0x98] sm:$0xff]  ;;  %v1392_v48 = vld [vmem:[%s3098_s0 + $0x160] sm:$0xff] }
  0x11   :  { %1673 = vmatmul.mubr.msk.f32.vlgmr.msra.gmra.mxu0 %vm47_vm0, %v14_v9  ;;  %1762 = vmatpush3.msra.mxu1 %v2104_v8  ;;  %v34_v49 = vld [vmem:[%s3098_s0 + $0xa0] sm:$0xff]  ;;  %v1393_v50 = vld [vmem:[%s3098_s0 + $0x168] sm:$0xff]  ;;  %v1394_v52 = vld [vmem:[%s3098_s0 + $0x170] sm:$0xff] }
  0x12   :  { %1763 = vmatprep.mubr.msk.f32.mxu1 %vm2023_vm1, %v2022_v0  ;;  %1838 = vmatprep.subr.mxu0 %v2022_v0  ;;  %v35_v51 = vld [vmem:[%s3098_s0 + $0xa8] sm:$0xff]  ;;  %v36_v53 = vld [vmem:[%s3098_s0 + $0xb0] sm:$0xff]  ;;  %v1395_v54 = vld [vmem:[%s3098_s0 + $0x178] sm:$0xff] }
  0x13   :  { %1764 = vmatmul.mubr.msk.f32.vlgmr.msra.gmra.mxu1 %vm47_vm0, %v1373_v10  ;;  %1839 = vmatpush3.msra.mxu0 %v46_v1  ;;  %v37_v55 = vld [vmem:[%s3098_s0 + $0xb8] sm:$0xff]  ;;  %v1396_v56 = vld [vmem:[%s3098_s0 + $0x180] sm:$0xff]  ;;  %v1397_v58 = vld [vmem:[%s3098_s0 + $0x188] sm:$0xff] }
  0x14   :  { %1929 = vmatprep.subr.mxu1 %v2022_v0  ;;  %1675 = vmatprep.mubr.msk.f32.mxu0 %vm2023_vm1, %v2022_v0  ;;  %v38_v57 = vld [vmem:[%s3098_s0 + $0xc0] sm:$0xff]  ;;  %v1423_v59 = vld [vmem:[%s3098_s0 + $0x190] sm:$0xff]  ;;  %v1473_v60 = vld [vmem:[%s3098_s0 + $0x258] sm:$0xff] }
  0x15   :  { %1930 = vmatpush3.msra.mxu1 %v46_v1  ;;  %1676 = vmatmul.mubr.msk.f32.gmra.mxu0 %vm47_vm0, %v15_v11  ;;  %v1424_v61 = vld [vmem:[%s3098_s0 + $0x198] sm:$0xff]  ;;  %v1474_v62 = vld [vmem:[%s3098_s0 + $0x260] sm:$0xff]  ;;  %v1475_v1 = vld [vmem:[%s3098_s0 + $0x268] sm:$0xff] }
  0x16   :  { %1766 = vmatprep.mubr.msk.f32.mxu1 %vm2023_vm1, %v2022_v0  ;;  %1678 = vmatprep.mubr.msk.f32.mxu0 %vm2023_vm1, %v2022_v0  ;;  %v1425_v63 = vld [vmem:[%s3098_s0 + $0x1a0] sm:$0xff]  ;;  %v1479_v9 = vld [vmem:[%s3098_s0 + $0x288] sm:$0xff]  ;;  %v1480_v11 = vld [vmem:[%s3098_s0 + $0x290] sm:$0xff] }
  0x17   :  { %1767 = vmatmul.mubr.msk.f32.gmra.mxu1 %vm47_vm0, %v1374_v12  ;;  %1840 = vmatprep.subr.mxu0 %v2022_v0  ;;  %v1430_v10 = vld [vmem:[%s3098_s0 + $0x1c8] sm:$0xff]  ;;  %v1431_v12 = vld [vmem:[%s3098_s0 + $0x1d0] sm:$0xff] }
  0x18   :  { %1769 = vmatprep.mubr.msk.f32.mxu1 %vm2023_vm1, %v2022_v0  ;;  %1841 = vmatpush3.msra.mxu0 %v2052_v2 }
  0x19   :  { %1679 = vmatmul.mubr.msk.f32.gmra.mxu0 %vm47_vm0, %v16_v13  ;;  %1931 = vmatprep.subr.mxu1 %v2022_v0  ;;  %v1481_v13 = vld [vmem:[%s3098_s0 + $0x298] sm:$0xff] }
  0x1a   :  { %1681 = vmatprep.mubr.msk.f32.mxu0 %vm2023_vm1, %v2022_v0  ;;  %1932 = vmatpush3.msra.mxu1 %v2052_v2  ;;  %v1426_v2 = vld [vmem:[%s3098_s0 + $0x1a8] sm:$0xff] }
  0x1b   :  { %1770 = vmatmul.mubr.msk.f32.gmra.mxu1 %vm47_vm0, %v1375_v14  ;;  %1842 = vmatprep.subr.mxu0 %v2022_v0  ;;  %v1432_v14 = vld [vmem:[%s3098_s0 + $0x1d8] sm:$0xff] }
  0x1c   :  { %1772 = vmatprep.mubr.msk.f32.mxu1 %vm2023_vm1, %v2022_v0  ;;  %1843 = vmatpush3.msra.mxu0 %v2059_v3 }
  0x1d   :  { %1682 = vmatmul.mubr.msk.f32.gmra.mxu0 %vm47_vm0, %v17_v15  ;;  %1933 = vmatprep.subr.mxu1 %v2022_v0  ;;  %v1482_v15 = vld [vmem:[%s3098_s0 + $0x2a0] sm:$0xff] }
  0x1e   :  { %1684 = vmatprep.mubr.msk.f32.mxu0 %vm2023_vm1, %v2022_v0  ;;  %1934 = vmatpush3.msra.mxu1 %v2059_v3  ;;  %v1476_v3 = vld [vmem:[%s3098_s0 + $0x270] sm:$0xff] }
  0x1f   :  { %1773 = vmatmul.mubr.msk.f32.gmra.mxu1 %vm47_vm0, %v1376_v16  ;;  %1844 = vmatprep.subr.mxu0 %v2022_v0  ;;  %v1433_v16 = vld [vmem:[%s3098_s0 + $0x1e0] sm:$0xff] }
  0x20   :  { %1775 = vmatprep.mubr.msk.f32.mxu1 %vm2023_vm1, %v2022_v0  ;;  %1845 = vmatpush3.msra.mxu0 %v2068_v4 }
  0x21   :  { %1685 = vmatmul.mubr.msk.f32.gmra.mxu0 %vm47_vm0, %v18_v17  ;;  %1935 = vmatprep.subr.mxu1 %v2022_v0  ;;  %v1483_v17 = vld [vmem:[%s3098_s0 + $0x2a8] sm:$0xff] }
  0x22   :  { %1687 = vmatprep.mubr.msk.f32.mxu0 %vm2023_vm1, %v2022_v0  ;;  %1936 = vmatpush3.msra.mxu1 %v2068_v4  ;;  %v1427_v4 = vld [vmem:[%s3098_s0 + $0x1b0] sm:$0xff] }
  0x23   :  { %1776 = vmatmul.mubr.msk.f32.gmra.mxu1 %vm47_vm0, %v1377_v18  ;;  %1846 = vmatprep.subr.mxu0 %v2022_v0  ;;  %v1434_v18 = vld [vmem:[%s3098_s0 + $0x1e8] sm:$0xff] }
  0x24   :  { %1778 = vmatprep.mubr.msk.f32.mxu1 %vm2023_vm1, %v2022_v0  ;;  %1847 = vmatpush3.msra.mxu0 %v2077_v5 }
  0x25   :  { %1688 = vmatmul.mubr.msk.f32.gmra.mxu0 %vm47_vm0, %v19_v19  ;;  %1937 = vmatprep.subr.mxu1 %v2022_v0  ;;  %v1484_v19 = vld [vmem:[%s3098_s0 + $0x2b0] sm:$0xff] }
  0x26   :  { %1690 = vmatprep.mubr.msk.f32.mxu0 %vm2023_vm1, %v2022_v0  ;;  %1938 = vmatpush3.msra.mxu1 %v2077_v5  ;;  %v1477_v5 = vld [vmem:[%s3098_s0 + $0x278] sm:$0xff] }
  0x27   :  { %1779 = vmatmul.mubr.msk.f32.gmra.mxu1 %vm47_vm0, %v1378_v20  ;;  %1848 = vmatprep.subr.mxu0 %v2022_v0  ;;  %v1435_v20 = vld [vmem:[%s3098_s0 + $0x1f0] sm:$0xff] }
  0x28   :  { %1781 = vmatprep.mubr.msk.f32.mxu1 %vm2023_vm1, %v2022_v0  ;;  %1849 = vmatpush3.msra.mxu0 %v2086_v6 }
  0x29   :  { %1691 = vmatmul.mubr.msk.f32.gmra.mxu0 %vm47_vm0, %v20_v21  ;;  %1939 = vmatprep.subr.mxu1 %v2022_v0  ;;  %v1485_v21 = vld [vmem:[%s3098_s0 + $0x2b8] sm:$0xff] }
  0x2a   :  { %1693 = vmatprep.mubr.msk.f32.mxu0 %vm2023_vm1, %v2022_v0  ;;  %1940 = vmatpush3.msra.mxu1 %v2086_v6  ;;  %v1428_v6 = vld [vmem:[%s3098_s0 + $0x1b8] sm:$0xff] }
  0x2b   :  { %1782 = vmatmul.mubr.msk.f32.gmra.mxu1 %vm47_vm0, %v1379_v22  ;;  %1850 = vmatprep.subr.mxu0 %v2022_v0  ;;  %v1436_v22 = vld [vmem:[%s3098_s0 + $0x1f8] sm:$0xff] }
  0x2c   :  { %1784 = vmatprep.mubr.msk.f32.mxu1 %vm2023_vm1, %v2022_v0  ;;  %1851 = vmatpush3.msra.mxu0 %v2095_v7 }
  0x2d   :  { %1694 = vmatmul.mubr.msk.f32.gmra.mxu0 %vm47_vm0, %v21_v23  ;;  %1941 = vmatprep.subr.mxu1 %v2022_v0  ;;  %v1486_v23 = vld [vmem:[%s3098_s0 + $0x2c0] sm:$0xff] }
  0x2e   :  { %1696 = vmatprep.mubr.msk.f32.mxu0 %vm2023_vm1, %v2022_v0  ;;  %1942 = vmatpush3.msra.mxu1 %v2095_v7  ;;  %v1478_v7 = vld [vmem:[%s3098_s0 + $0x280] sm:$0xff] }
  0x2f   :  { %1785 = vmatmul.mubr.msk.f32.gmra.mxu1 %vm47_vm0, %v1380_v24  ;;  %1852 = vmatprep.subr.mxu0 %v2022_v0  ;;  %v1437_v24 = vld [vmem:[%s3098_s0 + $0x200] sm:$0xff] }
  0x30   :  { %1787 = vmatprep.mubr.msk.f32.mxu1 %vm2023_vm1, %v2022_v0  ;;  %1853 = vmatpush3.msra.mxu0 %v2104_v8 }
  0x31   :  { %1697 = vmatmul.mubr.msk.f32.gmra.mxu0 %vm47_vm0, %v22_v25  ;;  %1943 = vmatprep.subr.mxu1 %v2022_v0  ;;  %v1487_v25 = vld [vmem:[%s3098_s0 + $0x2c8] sm:$0xff] }
  0x32   :  { %1699 = vmatprep.mubr.msk.f32.mxu0 %vm2023_vm1, %v2022_v0  ;;  %1944 = vmatpush3.msra.mxu1 %v2104_v8  ;;  %v1429_v8 = vld [vmem:[%s3098_s0 + $0x1c0] sm:$0xff] }
  0x33   :  { %1788 = vmatmul.mubr.msk.f32.gmra.mxu1 %vm47_vm0, %v1381_v26  ;;  %v1438_v26 = vld [vmem:[%s3098_s0 + $0x208] sm:$0xff] }
  0x34   :  { %1790 = vmatprep.mubr.msk.f32.mxu1 %vm2023_vm1, %v2022_v0 }
  0x35   :  { %1700 = vmatmul.mubr.msk.f32.gmra.mxu0 %vm47_vm0, %v23_v27  ;;  %v1488_v27 = vld [vmem:[%s3098_s0 + $0x2d0] sm:$0xff] }
  0x36   :  { %1702 = vmatprep.mubr.msk.f32.mxu0 %vm2023_vm1, %v2022_v0 }
  0x37   :  { %1791 = vmatmul.mubr.msk.f32.gmra.mxu1 %vm47_vm0, %v1382_v28  ;;  %v1439_v28 = vld [vmem:[%s3098_s0 + $0x210] sm:$0xff] }
  0x38   :  { %1793 = vmatprep.mubr.msk.f32.mxu1 %vm2023_vm1, %v2022_v0 }
  0x39   :  { %1703 = vmatmul.mubr.msk.f32.gmra.mxu0 %vm47_vm0, %v24_v29  ;;  %v1489_v29 = vld [vmem:[%s3098_s0 + $0x2d8] sm:$0xff] }
  0x3a   :  { %1705 = vmatprep.mubr.msk.f32.mxu0 %vm2023_vm1, %v2022_v0 }
  0x3b   :  { %1794 = vmatmul.mubr.msk.f32.gmra.mxu1 %vm47_vm0, %v1383_v30  ;;  %v1440_v30 = vld [vmem:[%s3098_s0 + $0x218] sm:$0xff] }
  0x3c   :  { %1796 = vmatprep.mubr.msk.f32.mxu1 %vm2023_vm1, %v2022_v0 }
  0x3d   :  { %1706 = vmatmul.mubr.msk.f32.gmra.mxu0 %vm47_vm0, %v25_v31  ;;  %v1490_v31 = vld [vmem:[%s3098_s0 + $0x2e0] sm:$0xff] }
  0x3e   :  { %1708 = vmatprep.mubr.msk.f32.mxu0 %vm2023_vm1, %v2022_v0 }
  0x3f   :  { %1797 = vmatmul.mubr.msk.f32.gmra.mxu1 %vm47_vm0, %v1384_v32  ;;  %v1441_v32 = vld [vmem:[%s3098_s0 + $0x220] sm:$0xff] }
  0x40   :  { %1799 = vmatprep.mubr.msk.f32.mxu1 %vm2023_vm1, %v2022_v0 }
  0x41   :  { %1709 = vmatmul.mubr.msk.f32.gmra.mxu0 %vm47_vm0, %v26_v33  ;;  %v1491_v33 = vld [vmem:[%s3098_s0 + $0x2e8] sm:$0xff] }
  0x42   :  { %1711 = vmatprep.mubr.msk.f32.mxu0 %vm2023_vm1, %v2022_v0 }
  0x43   :  { %1800 = vmatmul.mubr.msk.f32.gmra.mxu1 %vm47_vm0, %v1385_v34  ;;  %v1442_v34 = vld [vmem:[%s3098_s0 + $0x228] sm:$0xff] }
  0x44   :  { %1802 = vmatprep.mubr.msk.f32.mxu1 %vm2023_vm1, %v2022_v0 }
  0x45   :  { %1712 = vmatmul.mubr.msk.f32.gmra.mxu0 %vm47_vm0, %v27_v35  ;;  %v1492_v35 = vld [vmem:[%s3098_s0 + $0x2f0] sm:$0xff] }
  0x46   :  { %1714 = vmatprep.mubr.msk.f32.mxu0 %vm2023_vm1, %v2022_v0 }
  0x47   :  { %1803 = vmatmul.mubr.msk.f32.gmra.mxu1 %vm47_vm0, %v1386_v36  ;;  %v1443_v36 = vld [vmem:[%s3098_s0 + $0x230] sm:$0xff] }
  0x48   :  { %1805 = vmatprep.mubr.msk.f32.mxu1 %vm2023_vm1, %v2022_v0 }
  0x49   :  { %1715 = vmatmul.mubr.msk.f32.gmra.mxu0 %vm47_vm0, %v28_v37  ;;  %v1493_v37 = vld [vmem:[%s3098_s0 + $0x2f8] sm:$0xff] }
  0x4a   :  { %1717 = vmatprep.mubr.msk.f32.mxu0 %vm2023_vm1, %v2022_v0 }
  0x4b   :  { %1806 = vmatmul.mubr.msk.f32.gmra.mxu1 %vm47_vm0, %v1387_v38  ;;  %v1444_v38 = vld [vmem:[%s3098_s0 + $0x238] sm:$0xff] }
  0x4c   :  { %1808 = vmatprep.mubr.msk.f32.mxu1 %vm2023_vm1, %v2022_v0 }
  0x4d   :  { %1718 = vmatmul.mubr.msk.f32.gmra.mxu0 %vm47_vm0, %v29_v39  ;;  %v1494_v39 = vld [vmem:[%s3098_s0 + $0x300] sm:$0xff] }
  0x4e   :  { %1720 = vmatprep.mubr.msk.f32.mxu0 %vm2023_vm1, %v2022_v0 }
  0x4f   :  { %1809 = vmatmul.mubr.msk.f32.gmra.mxu1 %vm47_vm0, %v1388_v40  ;;  %v1445_v40 = vld [vmem:[%s3098_s0 + $0x240] sm:$0xff] }
  0x50   :  { %1811 = vmatprep.mubr.msk.f32.mxu1 %vm2023_vm1, %v2022_v0 }
  0x51   :  { %1721 = vmatmul.mubr.msk.f32.gmra.mxu0 %vm47_vm0, %v30_v41  ;;  %v1495_v41 = vld [vmem:[%s3098_s0 + $0x308] sm:$0xff] }
  0x52   :  { %1723 = vmatprep.mubr.msk.f32.mxu0 %vm2023_vm1, %v2022_v0 }
  0x53   :  { %1812 = vmatmul.mubr.msk.f32.gmra.mxu1 %vm47_vm0, %v1389_v42  ;;  %v1446_v42 = vld [vmem:[%s3098_s0 + $0x248] sm:$0xff] }
  0x54   :  { %1814 = vmatprep.mubr.msk.f32.mxu1 %vm2023_vm1, %v2022_v0 }
  0x55   :  { %1724 = vmatmul.mubr.msk.f32.gmra.mxu0 %vm47_vm0, %v31_v43  ;;  %v1496_v43 = vld [vmem:[%s3098_s0 + $0x310] sm:$0xff] }
  0x56   :  { %1726 = vmatprep.mubr.msk.f32.mxu0 %vm2023_vm1, %v2022_v0 }
  0x57   :  { %1815 = vmatmul.mubr.msk.f32.gmra.mxu1 %vm47_vm0, %v1390_v44 }
  0x58   :  { %1817 = vmatprep.mubr.msk.f32.mxu1 %vm2023_vm1, %v2022_v0 }
  0x59   :  { %1727 = vmatmul.mubr.msk.f32.gmra.mxu0 %vm47_vm0, %v32_v45  ;;  %v1447_v45 = vld [vmem:[%s3098_s0 + $0x250] sm:$0xff] }
  0x5a   :  { %1729 = vmatprep.mubr.msk.f32.mxu0 %vm2023_vm1, %v2022_v0 }
  0x5b   :  { %1818 = vmatmul.mubr.msk.f32.gmra.mxu1 %vm47_vm0, %v1391_v46 }
  0x5c   :  { %1820 = vmatprep.mubr.msk.f32.mxu1 %vm2023_vm1, %v2022_v0 }
  0x5d   :  { %1730 = vmatmul.mubr.msk.f32.gmra.mxu0 %vm47_vm0, %v33_v47 }
  0x5e   :  { %1732 = vmatprep.mubr.msk.f32.mxu0 %vm2023_vm1, %v2022_v0 }
  0x5f   :  { %1821 = vmatmul.mubr.msk.f32.gmra.mxu1 %vm47_vm0, %v1392_v48 }
  0x60   :  { %1823 = vmatprep.mubr.msk.f32.mxu1 %vm2023_vm1, %v2022_v0 }
  0x61   :  { %1733 = vmatmul.mubr.msk.f32.gmra.mxu0 %vm47_vm0, %v34_v49  ;;  %v1497_v49 = vld [vmem:[%s3098_s0 + $0x318] sm:$0xff] }
  0x62   :  { %1735 = vmatprep.mubr.msk.f32.mxu0 %vm2023_vm1, %v2022_v0 }
  0x63   :  { %1824 = vmatmul.mubr.msk.f32.gmra.mxu1 %vm47_vm0, %v1393_v50 }
  0x64   :  { %1826 = vmatprep.mubr.msk.f32.mxu1 %vm2023_vm1, %v2022_v0 }
  0x65   :  { %1736 = vmatmul.mubr.msk.f32.gmra.mxu0 %vm47_vm0, %v35_v51 }
  0x66   :  { %1738 = vmatprep.mubr.msk.f32.mxu0 %vm2023_vm1, %v2022_v0 }
  0x67   :  { %1827 = vmatmul.mubr.msk.f32.gmra.mxu1 %vm47_vm0, %v1394_v52 }
  0x68   :  { %1829 = vmatprep.mubr.msk.f32.mxu1 %vm2023_vm1, %v2022_v0 }
  0x69   :  { %1739 = vmatmul.mubr.msk.f32.gmra.mxu0 %vm47_vm0, %v36_v53 }
  0x6a   :  { %1741 = vmatprep.mubr.msk.f32.mxu0 %vm2023_vm1, %v2022_v0 }
  0x6b   :  { %1830 = vmatmul.mubr.msk.f32.gmra.mxu1 %vm47_vm0, %v1395_v54 }
  0x6c   :  { %1832 = vmatprep.mubr.msk.f32.mxu1 %vm2023_vm1, %v2022_v0 }
  0x6d   :  { %1742 = vmatmul.mubr.msk.f32.gmra.mxu0 %vm47_vm0, %v37_v55 }
  0x6e   :  { %1744 = vmatprep.mubr.msk.f32.mxu0 %vm2023_vm1, %v2022_v0 }
  0x6f   :  { %1833 = vmatmul.mubr.msk.f32.gmra.mxu1 %vm47_vm0, %v1396_v56 }
  0x70   :  { %1835 = vmatprep.mubr.msk.f32.mxu1 %vm2023_vm1, %v2022_v0 }
  0x71   :  { %1745 = vmatmul.mubr.msk.f32.gmra.mxu0 %vm47_vm0, %v38_v57 }
  0x72   :  { %1854 = vmatprep.mubr.msk.f32.mxu0 %vm2023_vm1, %v2022_v0 }
  0x73   :  { %1836 = vmatmul.mubr.msk.f32.gmra.mxu1 %vm47_vm0, %v1397_v58 }
  0x74   :  { %1945 = vmatprep.mubr.msk.f32.mxu1 %vm2023_vm1, %v2022_v0 }
  0x75   :  { %1855 = vmatmul.mubr.msk.f32.vlgmr.msra.gmra.mxu0 %vm47_vm0, %v1423_v59 }
  0x76   :  { %1857 = vmatprep.mubr.msk.f32.mxu0 %vm2023_vm1, %v2022_v0 }
  0x77   :  { %1946 = vmatmul.mubr.msk.f32.vlgmr.msra.gmra.mxu1 %vm47_vm0, %v1473_v60 }
  0x78   :  { %1948 = vmatprep.mubr.msk.f32.mxu1 %vm2023_vm1, %v2022_v0 }
  0x79   :  { %1858 = vmatmul.mubr.msk.f32.gmra.mxu0 %vm47_vm0, %v1424_v61 }
  0x7a   :  { %1860 = vmatprep.mubr.msk.f32.mxu0 %vm2023_vm1, %v2022_v0 }
  0x7b   :  { %1949 = vmatmul.mubr.msk.f32.gmra.mxu1 %vm47_vm0, %v1474_v62 }
  0x7c   :  { %1951 = vmatprep.mubr.msk.f32.mxu1 %vm2023_vm1, %v2022_v0 }
  0x7d   :  { %1861 = vmatmul.mubr.msk.f32.gmra.mxu0 %vm47_vm0, %v1425_v63 }
  0x7e   :  { %1863 = vmatprep.mubr.msk.f32.mxu0 %vm2023_vm1, %v2022_v0 }
  0x7f   :  { %1952 = vmatmul.mubr.msk.f32.gmra.mxu1 %vm47_vm0, %v1475_v1 }
  0x80   :  { %1954 = vmatprep.mubr.msk.f32.mxu1 %vm2023_vm1, %v2022_v0 }
  0x81   :  { %1864 = vmatmul.mubr.msk.f32.gmra.mxu0 %vm47_vm0, %v1426_v2 }
  0x82   :  { %1866 = vmatprep.mubr.msk.f32.mxu0 %vm2023_vm1, %v2022_v0 }
  0x83   :  { %1955 = vmatmul.mubr.msk.f32.gmra.mxu1 %vm47_vm0, %v1476_v3 }
  0x84   :  { %1957 = vmatprep.mubr.msk.f32.mxu1 %vm2023_vm1, %v2022_v0 }
  0x85   :  { %1867 = vmatmul.mubr.msk.f32.gmra.mxu0 %vm47_vm0, %v1427_v4 }
  0x86   :  { %1869 = vmatprep.mubr.msk.f32.mxu0 %vm2023_vm1, %v2022_v0 }
  0x87   :  { %1958 = vmatmul.mubr.msk.f32.gmra.mxu1 %vm47_vm0, %v1477_v5 }
  0x88   :  { %1960 = vmatprep.mubr.msk.f32.mxu1 %vm2023_vm1, %v2022_v0 }
  0x89   :  { %1870 = vmatmul.mubr.msk.f32.gmra.mxu0 %vm47_vm0, %v1428_v6 }
  0x8a   :  { %1872 = vmatprep.mubr.msk.f32.mxu0 %vm2023_vm1, %v2022_v0 }
  0x8b   :  { %1961 = vmatmul.mubr.msk.f32.gmra.mxu1 %vm47_vm0, %v1478_v7 }
  0x8c   :  { %1963 = vmatprep.mubr.msk.f32.mxu1 %vm2023_vm1, %v2022_v0 }
  0x8d   :  { %1873 = vmatmul.mubr.msk.f32.gmra.mxu0 %vm47_vm0, %v1429_v8 }
  0x8e   :  { %1875 = vmatprep.mubr.msk.f32.mxu0 %vm2023_vm1, %v2022_v0 }
  0x8f   :  { %1964 = vmatmul.mubr.msk.f32.gmra.mxu1 %vm47_vm0, %v1479_v9 }
  0x90   :  { %1966 = vmatprep.mubr.msk.f32.mxu1 %vm2023_vm1, %v2022_v0 }
  0x91   :  { %1876 = vmatmul.mubr.msk.f32.gmra.mxu0 %vm47_vm0, %v1430_v10 }
  0x92   :  { %1878 = vmatprep.mubr.msk.f32.mxu0 %vm2023_vm1, %v2022_v0 }
  0x93   :  { %1967 = vmatmul.mubr.msk.f32.gmra.mxu1 %vm47_vm0, %v1480_v11 }
  0x94   :  { %1969 = vmatprep.mubr.msk.f32.mxu1 %vm2023_vm1, %v2022_v0 }
  0x95   :  { %1879 = vmatmul.mubr.msk.f32.gmra.mxu0 %vm47_vm0, %v1431_v12 }
  0x96   :  { %1881 = vmatprep.mubr.msk.f32.mxu0 %vm2023_vm1, %v2022_v0 }
  0x97   :  { %1970 = vmatmul.mubr.msk.f32.gmra.mxu1 %vm47_vm0, %v1481_v13 }
  0x98   :  { %1972 = vmatprep.mubr.msk.f32.mxu1 %vm2023_vm1, %v2022_v0 }
  0x99   :  { %1882 = vmatmul.mubr.msk.f32.gmra.mxu0 %vm47_vm0, %v1432_v14 }
  0x9a   :  { %1884 = vmatprep.mubr.msk.f32.mxu0 %vm2023_vm1, %v2022_v0 }
  0x9b   :  { %1973 = vmatmul.mubr.msk.f32.gmra.mxu1 %vm47_vm0, %v1482_v15 }
  0x9c   :  { %1975 = vmatprep.mubr.msk.f32.mxu1 %vm2023_vm1, %v2022_v0 }
  0x9d   :  { %1885 = vmatmul.mubr.msk.f32.gmra.mxu0 %vm47_vm0, %v1433_v16 }
  0x9e   :  { %1887 = vmatprep.mubr.msk.f32.mxu0 %vm2023_vm1, %v2022_v0 }
  0x9f   :  { %1976 = vmatmul.mubr.msk.f32.gmra.mxu1 %vm47_vm0, %v1483_v17 }
  0xa0   :  { %1978 = vmatprep.mubr.msk.f32.mxu1 %vm2023_vm1, %v2022_v0 }
  0xa1   :  { %1888 = vmatmul.mubr.msk.f32.gmra.mxu0 %vm47_vm0, %v1434_v18 }
  0xa2   :  { %1890 = vmatprep.mubr.msk.f32.mxu0 %vm2023_vm1, %v2022_v0 }
  0xa3   :  { %1979 = vmatmul.mubr.msk.f32.gmra.mxu1 %vm47_vm0, %v1484_v19 }
  0xa4   :  { %1981 = vmatprep.mubr.msk.f32.mxu1 %vm2023_vm1, %v2022_v0 }
  0xa5   :  { %1891 = vmatmul.mubr.msk.f32.gmra.mxu0 %vm47_vm0, %v1435_v20 }
  0xa6   :  { %1893 = vmatprep.mubr.msk.f32.mxu0 %vm2023_vm1, %v2022_v0 }
  0xa7   :  { %1982 = vmatmul.mubr.msk.f32.gmra.mxu1 %vm47_vm0, %v1485_v21 }
  0xa8   :  { %1984 = vmatprep.mubr.msk.f32.mxu1 %vm2023_vm1, %v2022_v0 }
  0xa9   :  { %1894 = vmatmul.mubr.msk.f32.gmra.mxu0 %vm47_vm0, %v1436_v22 }
  0xaa   :  { %1896 = vmatprep.mubr.msk.f32.mxu0 %vm2023_vm1, %v2022_v0 }
  0xab   :  { %1985 = vmatmul.mubr.msk.f32.gmra.mxu1 %vm47_vm0, %v1486_v23 }
  0xac   :  { %1987 = vmatprep.mubr.msk.f32.mxu1 %vm2023_vm1, %v2022_v0 }
  0xad   :  { %1897 = vmatmul.mubr.msk.f32.gmra.mxu0 %vm47_vm0, %v1437_v24 }
  0xae   :  { %1899 = vmatprep.mubr.msk.f32.mxu0 %vm2023_vm1, %v2022_v0 }
  0xaf   :  { %1988 = vmatmul.mubr.msk.f32.gmra.mxu1 %vm47_vm0, %v1487_v25 }
  0xb0   :  { %1990 = vmatprep.mubr.msk.f32.mxu1 %vm2023_vm1, %v2022_v0 }
  0xb1   :  { %1900 = vmatmul.mubr.msk.f32.gmra.mxu0 %vm47_vm0, %v1438_v26 }
  0xb2   :  { %1902 = vmatprep.mubr.msk.f32.mxu0 %vm2023_vm1, %v2022_v0 }
  0xb3   :  { %1991 = vmatmul.mubr.msk.f32.gmra.mxu1 %vm47_vm0, %v1488_v27 }
  0xb4   :  { %1993 = vmatprep.mubr.msk.f32.mxu1 %vm2023_vm1, %v2022_v0 }
  0xb5   :  { %1903 = vmatmul.mubr.msk.f32.gmra.mxu0 %vm47_vm0, %v1439_v28 }
  0xb6   :  { %1905 = vmatprep.mubr.msk.f32.mxu0 %vm2023_vm1, %v2022_v0 }
  0xb7   :  { %1994 = vmatmul.mubr.msk.f32.gmra.mxu1 %vm47_vm0, %v1489_v29 }
  0xb8   :  { %1996 = vmatprep.mubr.msk.f32.mxu1 %vm2023_vm1, %v2022_v0 }
  0xb9   :  { %1906 = vmatmul.mubr.msk.f32.gmra.mxu0 %vm47_vm0, %v1440_v30 }
  0xba   :  { %1908 = vmatprep.mubr.msk.f32.mxu0 %vm2023_vm1, %v2022_v0 }
  0xbb   :  { %1997 = vmatmul.mubr.msk.f32.gmra.mxu1 %vm47_vm0, %v1490_v31 }
  0xbc   :  { %1999 = vmatprep.mubr.msk.f32.mxu1 %vm2023_vm1, %v2022_v0 }
  0xbd   :  { %1909 = vmatmul.mubr.msk.f32.gmra.mxu0 %vm47_vm0, %v1441_v32 }
  0xbe   :  { %1911 = vmatprep.mubr.msk.f32.mxu0 %vm2023_vm1, %v2022_v0 }
  0xbf   :  { %2000 = vmatmul.mubr.msk.f32.gmra.mxu1 %vm47_vm0, %v1491_v33 }
  0xc0   :  { %2002 = vmatprep.mubr.msk.f32.mxu1 %vm2023_vm1, %v2022_v0 }
  0xc1   :  { %1912 = vmatmul.mubr.msk.f32.gmra.mxu0 %vm47_vm0, %v1442_v34 }
  0xc2   :  { %1914 = vmatprep.mubr.msk.f32.mxu0 %vm2023_vm1, %v2022_v0 }
  0xc3   :  { %2003 = vmatmul.mubr.msk.f32.gmra.mxu1 %vm47_vm0, %v1492_v35 }
  0xc4   :  { %2005 = vmatprep.mubr.msk.f32.mxu1 %vm2023_vm1, %v2022_v0 }
  0xc5   :  { %1915 = vmatmul.mubr.msk.f32.gmra.mxu0 %vm47_vm0, %v1443_v36 }
  0xc6   :  { %1917 = vmatprep.mubr.msk.f32.mxu0 %vm2023_vm1, %v2022_v0 }
  0xc7   :  { %2006 = vmatmul.mubr.msk.f32.gmra.mxu1 %vm47_vm0, %v1493_v37 }
  0xc8   :  { %2008 = vmatprep.mubr.msk.f32.mxu1 %vm2023_vm1, %v2022_v0 }
  0xc9   :  { %1918 = vmatmul.mubr.msk.f32.gmra.mxu0 %vm47_vm0, %v1444_v38 }
  0xca   :  { %1920 = vmatprep.mubr.msk.f32.mxu0 %vm2023_vm1, %v2022_v0 }
  0xcb   :  { %2009 = vmatmul.mubr.msk.f32.gmra.mxu1 %vm47_vm0, %v1494_v39 }
  0xcc   :  { %2011 = vmatprep.mubr.msk.f32.mxu1 %vm2023_vm1, %v2022_v0 }
  0xcd   :  { %1921 = vmatmul.mubr.msk.f32.gmra.mxu0 %vm47_vm0, %v1445_v40 }
  0xce   :  { %1923 = vmatprep.mubr.msk.f32.mxu0 %vm2023_vm1, %v2022_v0 }
  0xcf   :  { %2012 = vmatmul.mubr.msk.f32.gmra.mxu1 %vm47_vm0, %v1495_v41 }
  0xd0   :  { %2014 = vmatprep.mubr.msk.f32.mxu1 %vm2023_vm1, %v2022_v0 }
  0xd1   :  { %v2728_v44 = vpop.f32.mrf.mxu0  ;;  %1924 = vmatmul.mubr.msk.f32.gmra.mxu0 %vm47_vm0, %v1446_v42 }
  0xd2   :  { %1926 = vmatprep.mubr.msk.f32.mxu0 %vm2023_vm1, %v2022_v0 }
  0xd3   :  { %v2736_v46 = vpop.f32.mrf.mxu1  ;;  %2015 = vmatmul.mubr.msk.f32.gmra.mxu1 %vm47_vm0, %v1496_v43  ;;  %v1674_v47 = vpop.f32.mrf.mxu0 }
  0xd4   :  { %v604_v48 = vmax.f32 %v2728_v44, %v2736_v46  ;;  %2017 = vmatprep.mubr.msk.f32.mxu1 %vm2023_vm1, %v2022_v0 }
  0xd5   :  { %v1765_v50 = vpop.f32.mrf.mxu1  ;;  %v2746_v51 = vpop.f32.mrf.mxu0  ;;  %1927 = vmatmul.mubr.msk.f32.gmra.mxu0 %vm47_vm0, %v1447_v45 }
  0xd7   :  { %v2749_v52 = vpop.f32.mrf.mxu1  ;;  %2018 = vmatmul.mubr.msk.f32.gmra.mxu1 %vm47_vm0, %v1497_v49  ;;  %v1677_v53 = vpop.f32.mrf.mxu0 }
  0xd8   :  { %v605_v54 = vmax.f32 %v2746_v51, %v2749_v52 }
  0xd9   :  { %v1768_v55 = vpop.f32.mrf.mxu1  ;;  %v2754_v56 = vpop.f32.mrf.mxu0 }
  0xdb   :  { %v2756_v0 = vpop.f32.mrf.mxu1  ;;  %v1680_v57 = vpop.f32.mrf.mxu0 }
  0xdd   :  { %v1771_v59 = vpop.f32.mrf.mxu1  ;;  %v2760_v60 = vpop.f32.mrf.mxu0 }
  0xdf   :  { %v2762_v61 = vpop.f32.mrf.mxu1  ;;  %v1683_v62 = vpop.f32.mrf.mxu0 }
  0xe1   :  { %v1774_v1 = vpop.f32.mrf.mxu1  ;;  %v2766_v2 = vpop.f32.mrf.mxu0 }
  0xe3   :  { %v2768_v3 = vpop.f32.mrf.mxu1  ;;  %v1686_v4 = vpop.f32.mrf.mxu0 }
  0xe5   :  { %v1777_v6 = vpop.f32.mrf.mxu1  ;;  %v2772_v7 = vpop.f32.mrf.mxu0 }
  0xe7   :  { %v2774_v8 = vpop.f32.mrf.mxu1  ;;  %v1689_v9 = vpop.f32.mrf.mxu0 }
  0xe9   :  { %v1780_v11 = vpop.f32.mrf.mxu1  ;;  %v2778_v12 = vpop.f32.mrf.mxu0 }
  0xeb   :  { %v2780_v13 = vpop.f32.mrf.mxu1  ;;  %v1692_v14 = vpop.f32.mrf.mxu0 }
  0xed   :  { %v1783_v16 = vpop.f32.mrf.mxu1  ;;  %v2784_v17 = vpop.f32.mrf.mxu0 }
  0xef   :  { %v2786_v18 = vpop.f32.mrf.mxu1  ;;  %v1695_v19 = vpop.f32.mrf.mxu0 }
  0xf1   :  { %v1786_v21 = vpop.f32.mrf.mxu1  ;;  %v2790_v22 = vpop.f32.mrf.mxu0 }
  0xf3   :  { %v2792_v23 = vpop.f32.mrf.mxu1  ;;  %v1698_v24 = vpop.f32.mrf.mxu0 }
  0xf5   :  { %v1789_v26 = vpop.f32.mrf.mxu1  ;;  %v2796_v27 = vpop.f32.mrf.mxu0 }
  0xf7   :  { %v2798_v28 = vpop.f32.mrf.mxu1  ;;  %v1701_v29 = vpop.f32.mrf.mxu0 }
  0xf9   :  { %v1792_v31 = vpop.f32.mrf.mxu1  ;;  %v2802_v32 = vpop.f32.mrf.mxu0 }
  0xfb   :  { %v2804_v33 = vpop.f32.mrf.mxu1  ;;  %v1704_v34 = vpop.f32.mrf.mxu0 }
  0xfd   :  { %v1795_v36 = vpop.f32.mrf.mxu1  ;;  %v2808_v37 = vpop.f32.mrf.mxu0 }
  0xff   :  { %v2810_v38 = vpop.f32.mrf.mxu1  ;;  %v1707_v39 = vpop.f32.mrf.mxu0 }
 0x101   :  { %v1798_v41 = vpop.f32.mrf.mxu1  ;;  %v2814_v42 = vpop.f32.mrf.mxu0 }
 0x103   :  { %v2816_v43 = vpop.f32.mrf.mxu1  ;;  %v1710_v45 = vpop.f32.mrf.mxu0 }
 0x105   :  { %v1801_v49 = vpop.f32.mrf.mxu1  ;;  %v2820_v50 = vpop.f32.mrf.mxu0 }
 0x107   :  { %v2822_v53 = vpop.f32.mrf.mxu1  ;;  %v1713_v55 = vpop.f32.mrf.mxu0 }
 0x109   :  { %v1804_v59 = vpop.f32.mrf.mxu1  ;;  %v2826_v62 = vpop.f32.mrf.mxu0 }
 0x10b   :  { %v2828_v1 = vpop.f32.mrf.mxu1  ;;  %v1716_v4 = vpop.f32.mrf.mxu0 }
 0x10d   :  { %v1807_v9 = vpop.f32.mrf.mxu1  ;;  %v2832_v11 = vpop.f32.mrf.mxu0 }
 0x10f   :  { %v2834_v14 = vpop.f32.mrf.mxu1  ;;  %v1719_v16 = vpop.f32.mrf.mxu0 }
 0x111   :  { %v1810_v21 = vpop.f32.mrf.mxu1  ;;  %v2838_v24 = vpop.f32.mrf.mxu0 }
 0x113   :  { %v2840_v26 = vpop.f32.mrf.mxu1  ;;  %v1722_v29 = vpop.f32.mrf.mxu0 }
 0x115   :  { %v1813_v34 = vpop.f32.mrf.mxu1  ;;  %v2844_v36 = vpop.f32.mrf.mxu0 }
 0x117   :  { %v2846_v39 = vpop.f32.mrf.mxu1  ;;  %v1725_v41 = vpop.f32.mrf.mxu0 }
 0x119   :  { %v1816_v49 = vpop.f32.mrf.mxu1  ;;  %v2850_v55 = vpop.f32.mrf.mxu0 }
 0x11b   :  { %v2852_v59 = vpop.f32.mrf.mxu1  ;;  %v1728_v4 = vpop.f32.mrf.mxu0 }
 0x11d   :  { %v1819_v16 = vpop.f32.mrf.mxu1  ;;  %v2856_v21 = vpop.f32.mrf.mxu0 }
 0x11f   :  { %v2858_v29 = vpop.f32.mrf.mxu1  ;;  %v1731_v34 = vpop.f32.mrf.mxu0 }
 0x121   :  { %v1822_v31 = vpop.f32.mrf.mxu1  ;;  %v2862_v45 = vpop.f32.mrf.mxu0 }
 0x123   :  { %v2864_v49 = vpop.f32.mrf.mxu1  ;;  %v1734_v19 = vpop.f32.mrf.mxu0 }
 0x125   :  { %v1825_v6 = vpop.f32.mrf.mxu1  ;;  %v2868_v9 = vpop.f32.mrf.mxu0 }
 0x127   :  { %v2870_v16 = vpop.f32.mrf.mxu1  ;;  %v1737_v57 = vpop.f32.mrf.mxu0 }
 0x129   :  { %v1828_v47 = vpop.f32.mrf.mxu1  ;;  %v2874_v41 = vpop.f32.mrf.mxu0 }
 0x12b   :  { %v2876_v31 = vpop.f32.mrf.mxu1  ;;  %v1740_v40 = vpop.f32.mrf.mxu0 }
 0x12d   :  { %v1831_v35 = vpop.f32.mrf.mxu1  ;;  %v2880_v4 = vpop.f32.mrf.mxu0 }
 0x12f   :  { %v2882_v6 = vpop.f32.mrf.mxu1  ;;  %v1743_v30 = vpop.f32.mrf.mxu0 }
 0x130   :  { %v2898_v30 = vld [vmem:[%s3099_s2] ss:$0 sm:$0xff] }
 0x131   :  { %v1834_v25 = vpop.f32.mrf.mxu1  ;;  %v2886_v34 = vpop.f32.mrf.mxu0 }
 0x133   :  { %v2888_v47 = vpop.f32.mrf.mxu1  ;;  %v1746_v20 = vpop.f32.mrf.mxu0 }
 0x135   :  { %v1837_v15 = vpop.f32.mrf.mxu1  ;;  %v796_v19 = vpop.f32.mrf.mxu0 }
 0x136   :  { %v920_v35 = vmax.f32 %v604_v48, %v796_v19 }
 0x137   :  { %v1112_v10 = vpop.f32.mrf.mxu1  ;;  %v1856_v25 = vpop.f32.mrf.mxu0 }
 0x138   :  { %v1236_v57 = vmax.f32 %v920_v35, %v1112_v10  ;;  %v3101_v10 = vmax.f32 %v2754_v56, %v2756_v0 }
 0x139   :  { %v1947_v5 = vpop.f32.mrf.mxu1  ;;  %v801_v63 = vpop.f32.mrf.mxu0 }
 0x13a   :  { %v1268_v20 = vadd.f32 %v2898_v30, %v1236_v57  ;;  %v921_v15 = vmax.f32 %v605_v54, %v801_v63 }
 0x13b   :  { %v1117_v40 = vpop.f32.mrf.mxu1  ;;  %v1859_v44 = vpop.f32.mrf.mxu0 }
 0x13c   :  { %v1293_v46 = vmax.f32 %v1268_v20, 0.0  ;;  %v1237_v48 = vmax.f32 %v921_v15, %v1117_v40  ;;  %v3102_v20 = vmax.f32 %v2760_v60, %v2762_v61 }
 0x13d   :  { %v1950_v19 = vpop.f32.mrf.mxu1  ;;  %v806_v58 = vpop.f32.mrf.mxu0 }
 0x13e   :  { %1319 = vst.msk [vmem:[%s3100_s3] sm:$0xff] %vm1318_vm2, %v1293_v46  ;;  %v1269_v5 = vadd.f32 %v2898_v30, %v1237_v48  ;;  %v922_v57 = vmax.f32 %v3101_v10, %v806_v58 }
 0x13f   :  { %v1122_v51 = vpop.f32.mrf.mxu1  ;;  %v1862_v52 = vpop.f32.mrf.mxu0 }
 0x140   :  { %v1294_v54 = vmax.f32 %v1269_v5, 0.0  ;;  %v1238_v63 = vmax.f32 %v922_v57, %v1122_v51  ;;  %v3103_v5 = vmax.f32 %v2766_v2, %v2768_v3 }
 0x141   :  { %v1953_v35 = vpop.f32.mrf.mxu1  ;;  %v811_v25 = vpop.f32.mrf.mxu0 }
 0x142   :  { %1320 = vst.msk [vmem:[%s3100_s3 + $0x8] sm:$0xff] %vm1318_vm2, %v1294_v54  ;;  %v1270_v40 = vadd.f32 %v2898_v30, %v1238_v63  ;;  %v923_v15 = vmax.f32 %v3102_v20, %v811_v25  ;;  %v3104_v35 = vmax.f32 %v2772_v7, %v2774_v8 }
 0x143   :  { %v1127_v44 = vpop.f32.mrf.mxu1  ;;  %v1865_v56 = vpop.f32.mrf.mxu0 }
 0x144   :  { %v1295_v0 = vmax.f32 %v1270_v40, 0.0  ;;  %v1239_v58 = vmax.f32 %v923_v15, %v1127_v44 }
 0x145   :  { %v1956_v46 = vpop.f32.mrf.mxu1  ;;  %v816_v48 = vpop.f32.mrf.mxu0 }
 0x146   :  { %1321 = vst.msk [vmem:[%s3100_s3 + $0x10] sm:$0xff] %vm1318_vm2, %v1295_v0  ;;  %v1271_v19 = vadd.f32 %v2898_v30, %v1239_v58  ;;  %v924_v10 = vmax.f32 %v3103_v5, %v816_v48  ;;  %v3105_v0 = vmax.f32 %v2778_v12, %v2780_v13 }
 0x147   :  { %v1132_v57 = vpop.f32.mrf.mxu1  ;;  %v1868_v60 = vpop.f32.mrf.mxu0 }
 0x148   :  { %v1296_v61 = vmax.f32 %v1271_v19, 0.0  ;;  %v1240_v51 = vmax.f32 %v924_v10, %v1132_v57  ;;  %v3106_v57 = vmax.f32 %v2784_v17, %v2786_v18 }
 0x149   :  { %v1959_v52 = vpop.f32.mrf.mxu1  ;;  %v821_v54 = vpop.f32.mrf.mxu0 }
 0x14a   :  { %1322 = vst.msk [vmem:[%s3100_s3 + $0x18] sm:$0xff] %vm1318_vm2, %v1296_v61  ;;  %v1272_v63 = vadd.f32 %v2898_v30, %v1240_v51  ;;  %v925_v25 = vmax.f32 %v3104_v35, %v821_v54  ;;  %v3107_v35 = vmax.f32 %v2790_v22, %v2792_v23 }
 0x14b   :  { %v1137_v40 = vpop.f32.mrf.mxu1  ;;  %v1871_v2 = vpop.f32.mrf.mxu0 }
 0x14c   :  { %v1297_v3 = vmax.f32 %v1272_v63, 0.0  ;;  %v1241_v20 = vmax.f32 %v925_v25, %v1137_v40 }
 0x14d   :  { %v1962_v15 = vpop.f32.mrf.mxu1  ;;  %v826_v44 = vpop.f32.mrf.mxu0 }
 0x14e   :  { %1323 = vst.msk [vmem:[%s3100_s3 + $0x20] sm:$0xff] %vm1318_vm2, %v1297_v3  ;;  %v1273_v56 = vadd.f32 %v2898_v30, %v1241_v20  ;;  %v926_v58 = vmax.f32 %v3105_v0, %v826_v44  ;;  %v3108_v44 = vmax.f32 %v2796_v27, %v2798_v28 }
 0x14f   :  { %v1142_v46 = vpop.f32.mrf.mxu1  ;;  %v1874_v7 = vpop.f32.mrf.mxu0 }
 0x150   :  { %v1298_v8 = vmax.f32 %v1273_v56, 0.0  ;;  %v1242_v48 = vmax.f32 %v926_v58, %v1142_v46 }
 0x151   :  { %v1965_v19 = vpop.f32.mrf.mxu1  ;;  %v831_v5 = vpop.f32.mrf.mxu0 }
 0x152   :  { %1324 = vst.msk [vmem:[%s3100_s3 + $0x28] sm:$0xff] %vm1318_vm2, %v1298_v8  ;;  %v1274_v10 = vadd.f32 %v2898_v30, %v1242_v48  ;;  %v927_v60 = vmax.f32 %v3106_v57, %v831_v5  ;;  %v3109_v48 = vmax.f32 %v2802_v32, %v2804_v33 }
 0x153   :  { %v1147_v61 = vpop.f32.mrf.mxu1  ;;  %v1877_v12 = vpop.f32.mrf.mxu0 }
 0x154   :  { %v1299_v13 = vmax.f32 %v1274_v10, 0.0  ;;  %v1243_v51 = vmax.f32 %v927_v60, %v1147_v61  ;;  %v3110_v12 = vmax.f32 %v2808_v37, %v2810_v38 }
 0x155   :  { %v1968_v52 = vpop.f32.mrf.mxu1  ;;  %v836_v54 = vpop.f32.mrf.mxu0 }
 0x156   :  { %1325 = vst.msk [vmem:[%s3100_s3 + $0x30] sm:$0xff] %vm1318_vm2, %v1299_v13  ;;  %v1275_v63 = vadd.f32 %v2898_v30, %v1243_v51  ;;  %v928_v25 = vmax.f32 %v3107_v35, %v836_v54 }
 0x157   :  { %v1152_v40 = vpop.f32.mrf.mxu1  ;;  %v1880_v17 = vpop.f32.mrf.mxu0 }
 0x158   :  { %v1300_v18 = vmax.f32 %v1275_v63, 0.0  ;;  %v1244_v2 = vmax.f32 %v928_v25, %v1152_v40  ;;  %v3111_v25 = vmax.f32 %v2814_v42, %v2816_v43 }
 0x159   :  { %v1971_v3 = vpop.f32.mrf.mxu1  ;;  %v841_v20 = vpop.f32.mrf.mxu0 }
 0x15a   :  { %1326 = vst.msk [vmem:[%s3100_s3 + $0x38] sm:$0xff] %vm1318_vm2, %v1300_v18  ;;  %v1276_v15 = vadd.f32 %v2898_v30, %v1244_v2  ;;  %v929_v56 = vmax.f32 %v3108_v44, %v841_v20 }
 0x15b   :  { %v1157_v0 = vpop.f32.mrf.mxu1  ;;  %v1883_v22 = vpop.f32.mrf.mxu0 }
 0x15c   :  { %v1301_v23 = vmax.f32 %v1276_v15, 0.0  ;;  %v1245_v58 = vmax.f32 %v929_v56, %v1157_v0  ;;  %v3112_v15 = vmax.f32 %v2820_v50, %v2822_v53 }
 0x15d   :  { %v1974_v46 = vpop.f32.mrf.mxu1  ;;  %v846_v7 = vpop.f32.mrf.mxu0 }
 0x15e   :  { %1327 = vst.msk [vmem:[%s3100_s3 + $0x40] sm:$0xff] %vm1318_vm2, %v1301_v23  ;;  %v1277_v8 = vadd.f32 %v2898_v30, %v1245_v58  ;;  %v930_v19 = vmax.f32 %v3109_v48, %v846_v7  ;;  %v3113_v46 = vmax.f32 %v2826_v62, %v2828_v1 }
 0x15f   :  { %v1162_v5 = vpop.f32.mrf.mxu1  ;;  %v1886_v27 = vpop.f32.mrf.mxu0 }
 0x160   :  { %v1302_v28 = vmax.f32 %v1277_v8, 0.0  ;;  %v1246_v10 = vmax.f32 %v930_v19, %v1162_v5 }
 0x161   :  { %v1977_v57 = vpop.f32.mrf.mxu1  ;;  %v851_v60 = vpop.f32.mrf.mxu0 }
 0x162   :  { %1328 = vst.msk [vmem:[%s3100_s3 + $0x48] sm:$0xff] %vm1318_vm2, %v1302_v28  ;;  %v1278_v61 = vadd.f32 %v2898_v30, %v1246_v10  ;;  %v931_v13 = vmax.f32 %v3110_v12, %v851_v60  ;;  %v3114_v28 = vmax.f32 %v2832_v11, %v2834_v14 }
 0x163   :  { %v1167_v51 = vpop.f32.mrf.mxu1  ;;  %v1889_v32 = vpop.f32.mrf.mxu0 }
 0x164   :  { %v1303_v33 = vmax.f32 %v1278_v61, 0.0  ;;  %v1247_v52 = vmax.f32 %v931_v13, %v1167_v51  ;;  %v3115_v51 = vmax.f32 %v2838_v24, %v2840_v26 }
 0x165   :  { %v1980_v54 = vpop.f32.mrf.mxu1  ;;  %v856_v63 = vpop.f32.mrf.mxu0 }
 0x166   :  { %1329 = vst.msk [vmem:[%s3100_s3 + $0x50] sm:$0xff] %vm1318_vm2, %v1303_v33  ;;  %v1279_v35 = vadd.f32 %v2898_v30, %v1247_v52  ;;  %v932_v40 = vmax.f32 %v3111_v25, %v856_v63  ;;  %v3116_v25 = vmax.f32 %v2844_v36, %v2846_v39 }
 0x167   :  { %v1172_v17 = vpop.f32.mrf.mxu1  ;;  %v1892_v37 = vpop.f32.mrf.mxu0 }
 0x168   :  { %v1304_v38 = vmax.f32 %v1279_v35, 0.0  ;;  %v1248_v18 = vmax.f32 %v932_v40, %v1172_v17 }
 0x169   :  { %v1983_v2 = vpop.f32.mrf.mxu1  ;;  %v861_v3 = vpop.f32.mrf.mxu0 }
 0x16a   :  { %1330 = vst.msk [vmem:[%s3100_s3 + $0x58] sm:$0xff] %vm1318_vm2, %v1304_v38  ;;  %v1280_v20 = vadd.f32 %v2898_v30, %v1248_v18  ;;  %v933_v44 = vmax.f32 %v3112_v15, %v861_v3  ;;  %v3117_v3 = vmax.f32 %v2850_v55, %v2852_v59 }
 0x16b   :  { %v1177_v56 = vpop.f32.mrf.mxu1  ;;  %v1895_v42 = vpop.f32.mrf.mxu0 }
 0x16c   :  { %v1305_v43 = vmax.f32 %v1280_v20, 0.0  ;;  %v1249_v0 = vmax.f32 %v933_v44, %v1177_v56 }
 0x16d   :  { %v1986_v22 = vpop.f32.mrf.mxu1  ;;  %v866_v23 = vpop.f32.mrf.mxu0 }
 0x16e   :  { %1331 = vst.msk [vmem:[%s3100_s3 + $0x60] sm:$0xff] %vm1318_vm2, %v1305_v43  ;;  %v1281_v58 = vadd.f32 %v2898_v30, %v1249_v0  ;;  %v934_v7 = vmax.f32 %v3113_v46, %v866_v23  ;;  %v3118_v0 = vmax.f32 %v2856_v21, %v2858_v29 }
 0x16f   :  { %v1182_v8 = vpop.f32.mrf.mxu1  ;;  %v1898_v50 = vpop.f32.mrf.mxu0 }
 0x170   :  { %v1306_v53 = vmax.f32 %v1281_v58, 0.0  ;;  %v1250_v48 = vmax.f32 %v934_v7, %v1182_v8  ;;  %v3119_v50 = vmax.f32 %v2862_v45, %v2864_v49 }
 0x171   :  { %v1989_v19 = vpop.f32.mrf.mxu1  ;;  %v871_v5 = vpop.f32.mrf.mxu0 }
 0x172   :  { %1332 = vst.msk [vmem:[%s3100_s3 + $0x68] sm:$0xff] %vm1318_vm2, %v1306_v53  ;;  %v1282_v27 = vadd.f32 %v2898_v30, %v1250_v48  ;;  %v935_v10 = vmax.f32 %v3114_v28, %v871_v5 }
 0x173   :  { %v1187_v57 = vpop.f32.mrf.mxu1  ;;  %v1901_v62 = vpop.f32.mrf.mxu0 }
 0x174   :  { %v1307_v1 = vmax.f32 %v1282_v27, 0.0  ;;  %v1251_v60 = vmax.f32 %v935_v10, %v1187_v57  ;;  %v3120_v10 = vmax.f32 %v2868_v9, %v2870_v16 }
 0x175   :  { %v1992_v61 = vpop.f32.mrf.mxu1  ;;  %v876_v12 = vpop.f32.mrf.mxu0 }
 0x176   :  { %1333 = vst.msk [vmem:[%s3100_s3 + $0x70] sm:$0xff] %vm1318_vm2, %v1307_v1  ;;  %v1283_v13 = vadd.f32 %v2898_v30, %v1251_v60  ;;  %v936_v32 = vmax.f32 %v3115_v51, %v876_v12 }
 0x177   :  { %v1192_v33 = vpop.f32.mrf.mxu1  ;;  %v1904_v11 = vpop.f32.mrf.mxu0 }
 0x178   :  { %v1308_v14 = vmax.f32 %v1283_v13, 0.0  ;;  %v1252_v52 = vmax.f32 %v936_v32, %v1192_v33  ;;  %v3121_v13 = vmax.f32 %v2874_v41, %v2876_v31 }
 0x179   :  { %v1995_v54 = vpop.f32.mrf.mxu1  ;;  %v881_v63 = vpop.f32.mrf.mxu0 }
 0x17a   :  { %1334 = vst.msk [vmem:[%s3100_s3 + $0x78] sm:$0xff] %vm1318_vm2, %v1308_v14  ;;  %v1284_v35 = vadd.f32 %v2898_v30, %v1252_v52  ;;  %v937_v40 = vmax.f32 %v3116_v25, %v881_v63  ;;  %v3122_v54 = vmax.f32 %v2880_v4, %v2882_v6 }
 0x17b   :  { %v1197_v17 = vpop.f32.mrf.mxu1  ;;  %v1907_v24 = vpop.f32.mrf.mxu0 }
 0x17c   :  { %v1309_v26 = vmax.f32 %v1284_v35, 0.0  ;;  %v1253_v37 = vmax.f32 %v937_v40, %v1197_v17 }
 0x17d   :  { %v1998_v38 = vpop.f32.mrf.mxu1  ;;  %v886_v18 = vpop.f32.mrf.mxu0 }
 0x17e   :  { %1335 = vst.msk [vmem:[%s3100_s3 + $0x80] sm:$0xff] %vm1318_vm2, %v1309_v26  ;;  %v1285_v2 = vadd.f32 %v2898_v30, %v1253_v37  ;;  %v938_v20 = vmax.f32 %v3117_v3, %v886_v18  ;;  %v3123_v26 = vmax.f32 %v2886_v34, %v2888_v47 }
 0x17f   :  { %v1202_v15 = vpop.f32.mrf.mxu1  ;;  %v1910_v36 = vpop.f32.mrf.mxu0 }
 0x180   :  { %v1310_v39 = vmax.f32 %v1285_v2, 0.0  ;;  %v1254_v44 = vmax.f32 %v938_v20, %v1202_v15 }
 0x181   :  { %v2001_v56 = vpop.f32.mrf.mxu1  ;;  %v891_v42 = vpop.f32.mrf.mxu0 }
 0x182   :  { %1336 = vst.msk [vmem:[%s3100_s3 + $0x88] sm:$0xff] %vm1318_vm2, %v1310_v39  ;;  %v1286_v43 = vadd.f32 %v2898_v30, %v1254_v44  ;;  %v939_v22 = vmax.f32 %v3118_v0, %v891_v42 }
 0x183   :  { %v1207_v23 = vpop.f32.mrf.mxu1  ;;  %v1913_v55 = vpop.f32.mrf.mxu0 }
 0x184   :  { %v1311_v59 = vmax.f32 %v1286_v43, 0.0  ;;  %v1255_v58 = vmax.f32 %v939_v22, %v1207_v23 }
 0x185   :  { %v2004_v46 = vpop.f32.mrf.mxu1  ;;  %v896_v7 = vpop.f32.mrf.mxu0 }
 0x186   :  { %1337 = vst.msk [vmem:[%s3100_s3 + $0x90] sm:$0xff] %vm1318_vm2, %v1311_v59  ;;  %v1287_v8 = vadd.f32 %v2898_v30, %v1255_v58  ;;  %v940_v53 = vmax.f32 %v3119_v50, %v896_v7 }
 0x187   :  { %v1212_v48 = vpop.f32.mrf.mxu1  ;;  %v1916_v21 = vpop.f32.mrf.mxu0 }
 0x188   :  { %v1312_v29 = vmax.f32 %v1287_v8, 0.0  ;;  %v1256_v19 = vmax.f32 %v940_v53, %v1212_v48 }
 0x189   :  { %v2007_v5 = vpop.f32.mrf.mxu1  ;;  %v901_v27 = vpop.f32.mrf.mxu0 }
 0x18a   :  { %1338 = vst.msk [vmem:[%s3100_s3 + $0x98] sm:$0xff] %vm1318_vm2, %v1312_v29  ;;  %v1288_v28 = vadd.f32 %v2898_v30, %v1256_v19  ;;  %v941_v57 = vmax.f32 %v3120_v10, %v901_v27 }
 0x18b   :  { %v1217_v62 = vpop.f32.mrf.mxu1  ;;  %v1919_v45 = vpop.f32.mrf.mxu0 }
 0x18c   :  { %v1313_v49 = vmax.f32 %v1288_v28, 0.0  ;;  %v1257_v1 = vmax.f32 %v941_v57, %v1217_v62 }
 0x18d   :  { %v2010_v60 = vpop.f32.mrf.mxu1  ;;  %v906_v61 = vpop.f32.mrf.mxu0 }
 0x18e   :  { %1339 = vst.msk [vmem:[%s3100_s3 + $0xa0] sm:$0xff] %vm1318_vm2, %v1313_v49  ;;  %v1289_v12 = vadd.f32 %v2898_v30, %v1257_v1  ;;  %v942_v51 = vmax.f32 %v3121_v13, %v906_v61 }
 0x18f   :  { %v1222_v32 = vpop.f32.mrf.mxu1  ;;  %v1922_v9 = vpop.f32.mrf.mxu0 }
 0x190   :  { %v1314_v16 = vmax.f32 %v1289_v12, 0.0  ;;  %v1258_v33 = vmax.f32 %v942_v51, %v1222_v32 }
 0x191   :  { %v2013_v11 = vpop.f32.mrf.mxu1  ;;  %v911_v14 = vpop.f32.mrf.mxu0 }
 0x192   :  { %1340 = vst.msk [vmem:[%s3100_s3 + $0xa8] sm:$0xff] %vm1318_vm2, %v1314_v16  ;;  %v1290_v52 = vadd.f32 %v2898_v30, %v1258_v33  ;;  %v943_v63 = vmax.f32 %v3122_v54, %v911_v14 }
 0x193   :  { %v1227_v35 = vpop.f32.mrf.mxu1  ;;  %v1925_v41 = vpop.f32.mrf.mxu0 }
 0x194   :  { %v1315_v31 = vmax.f32 %v1290_v52, 0.0  ;;  %v1259_v25 = vmax.f32 %v943_v63, %v1227_v35 }
 0x195   :  { %v2016_v40 = vpop.f32.mrf.mxu1  ;;  %v916_v17 = vpop.f32.mrf.mxu0 }
 0x196   :  { %1341 = vst.msk [vmem:[%s3100_s3 + $0xb0] sm:$0xff] %vm1318_vm2, %v1315_v31  ;;  %v1291_v24 = vadd.f32 %v2898_v30, %v1259_v25  ;;  %v944_v37 = vmax.f32 %v3123_v26, %v916_v17 }
 0x197   :  { %v1232_v38 = vpop.f32.mrf.mxu1  ;;  %v1928_v4 = vpop.f32.mrf.mxu0 }
 0x198   :  { %v1316_v6 = vmax.f32 %v1291_v24, 0.0  ;;  %v1260_v18 = vmax.f32 %v944_v37, %v1232_v38 }
 0x199   :  { %v2019_v2 = vpop.f32.mrf.mxu1 }
 0x19a   :  { %1342 = vst.msk [vmem:[%s3100_s3 + $0xb8] sm:$0xff] %vm1318_vm2, %v1316_v6  ;;  %v1292_v3 = vadd.f32 %v2898_v30, %v1260_v18 }
 0x19c   :  { %v1317_v20 = vmax.f32 %v1292_v3, 0.0 }
 0x19e   :  { %1343 = vst.msk [vmem:[%s3100_s3 + $0xc0] sm:$0xff] %vm1318_vm2, %v1317_v20 }

// kernel: deep_qnet_forward.5
= control target key start
LH: loop header
LB: loop body
LE: loop exit
PB: predicated region body
PF: predicated region fallthrough
CT: control target
= control target key end

     0   :  { %vm791_vm0 = vcmask 523264   ;;  %vm794_vm1 = vcmask 517120   ;;  %s1917_s1 = inlined_call_operand.vmem [shape: f32[512,64], index: 1, kind: input, shape index: {}]   ;;  %s1918_s0 = inlined_call_operand.vmem [shape: f32[4,18,512], index: 0, kind: input, shape index: {}]   ;;  %s1919_s2 = inlined_call_operand.vmem [shape: f32[1,64], index: 2, kind: input, shape index: {}]   ;;  %s1920_s3 = inlined_call_operand.vmem [shape: f32[18,64], index: 3, kind: output, shape index: {}]  }
   0x1   :  { %v1188_v0 = vld [vmem:[%s1917_s1 + $0xf8] sm:$0xff]  ;;  %v1210_v4 = vld [vmem:[%s1917_s1 + $0xf0] sm:$0xff]  ;;  %v1232_v8 = vld [vmem:[%s1917_s1 + $0xe8] sm:$0xff] }
   0x2   :  { %v1193_v1 = vld [vmem:[%s1917_s1 + $0x1f8] sm:$0xff]  ;;  %837 = vmatprep.subr.mxu0 %v1188_v0  ;;  %v1215_v5 = vld [vmem:[%s1917_s1 + $0x1f0] sm:$0xff]  ;;  %v1239_v9 = vld [vmem:[%s1917_s1 + $0x1e8] sm:$0xff] }
   0x3   :  { %v1198_v2 = vld [vmem:[%s1917_s1 + $0x78] sm:$0xff]  ;;  %878 = vmatprep.subr.mxu1 %v1193_v1  ;;  %v1222_v6 = vld [vmem:[%s1917_s1 + $0x70] sm:$0xff]  ;;  %v1244_v10 = vld [vmem:[%s1917_s1 + $0x68] sm:$0xff] }
   0x4   :  { %v1205_v3 = vld [vmem:[%s1917_s1 + $0x178] sm:$0xff]  ;;  %838 = vmatpush3.msra.mxu0 %v1198_v2  ;;  %v1227_v7 = vld [vmem:[%s1917_s1 + $0x170] sm:$0xff]  ;;  %v1249_v11 = vld [vmem:[%s1917_s1 + $0x168] sm:$0xff] }
   0x5   :  { %879 = vmatpush3.msra.mxu1 %v1205_v3  ;;  %839 = vmatprep.subr.mxu0 %v1210_v4  ;;  %v1256_v12 = vld [vmem:[%s1917_s1 + $0xe0] sm:$0xff]  ;;  %v1280_v16 = vld [vmem:[%s1917_s1 + $0xd8] sm:$0xff]  ;;  %v1304_v20 = vld [vmem:[%s1917_s1 + $0xd0] sm:$0xff] }
   0x6   :  { %880 = vmatprep.subr.mxu1 %v1215_v5  ;;  %840 = vmatpush3.msra.mxu0 %v1222_v6  ;;  %v1261_v13 = vld [vmem:[%s1917_s1 + $0x1e0] sm:$0xff]  ;;  %v1285_v17 = vld [vmem:[%s1917_s1 + $0x1d8] sm:$0xff]  ;;  %v1309_v21 = vld [vmem:[%s1917_s1 + $0x1d0] sm:$0xff] }
   0x7   :  { %881 = vmatpush3.msra.mxu1 %v1227_v7  ;;  %841 = vmatprep.subr.mxu0 %v1232_v8  ;;  %v1268_v14 = vld [vmem:[%s1917_s1 + $0x60] sm:$0xff]  ;;  %v1292_v18 = vld [vmem:[%s1917_s1 + $0x58] sm:$0xff]  ;;  %v1316_v22 = vld [vmem:[%s1917_s1 + $0x50] sm:$0xff] }
   0x8   :  { %882 = vmatprep.subr.mxu1 %v1239_v9  ;;  %v1273_v15 = vld [vmem:[%s1917_s1 + $0x160] sm:$0xff]  ;;  %842 = vmatpush3.msra.mxu0 %v1244_v10  ;;  %v1297_v19 = vld [vmem:[%s1917_s1 + $0x158] sm:$0xff]  ;;  %v1321_v23 = vld [vmem:[%s1917_s1 + $0x150] sm:$0xff] }
   0x9   :  { %883 = vmatpush3.msra.mxu1 %v1249_v11  ;;  %843 = vmatprep.subr.mxu0 %v1256_v12  ;;  %v1328_v24 = vld [vmem:[%s1917_s1 + $0xc8] sm:$0xff]  ;;  %v1352_v28 = vld [vmem:[%s1917_s1 + $0xc0] sm:$0xff]  ;;  %v1376_v32 = vld [vmem:[%s1917_s1 + $0xb8] sm:$0xff] }
   0xa   :  { %884 = vmatprep.subr.mxu1 %v1261_v13  ;;  %844 = vmatpush3.msra.mxu0 %v1268_v14  ;;  %v1333_v25 = vld [vmem:[%s1917_s1 + $0x1c8] sm:$0xff]  ;;  %v1357_v29 = vld [vmem:[%s1917_s1 + $0x1c0] sm:$0xff]  ;;  %v1381_v33 = vld [vmem:[%s1917_s1 + $0x1b8] sm:$0xff] }
   0xb   :  { %885 = vmatpush3.msra.mxu1 %v1273_v15  ;;  %845 = vmatprep.subr.mxu0 %v1280_v16  ;;  %v1340_v26 = vld [vmem:[%s1917_s1 + $0x48] sm:$0xff]  ;;  %v1364_v30 = vld [vmem:[%s1917_s1 + $0x40] sm:$0xff]  ;;  %v1388_v34 = vld [vmem:[%s1917_s1 + $0x38] sm:$0xff] }
   0xc   :  { %886 = vmatprep.subr.mxu1 %v1285_v17  ;;  %846 = vmatpush3.msra.mxu0 %v1292_v18  ;;  %v1345_v27 = vld [vmem:[%s1917_s1 + $0x148] sm:$0xff]  ;;  %v1369_v31 = vld [vmem:[%s1917_s1 + $0x140] sm:$0xff]  ;;  %v1393_v35 = vld [vmem:[%s1917_s1 + $0x138] sm:$0xff] }
   0xd   :  { %887 = vmatpush3.msra.mxu1 %v1297_v19  ;;  %847 = vmatprep.subr.mxu0 %v1304_v20  ;;  %v1400_v36 = vld [vmem:[%s1917_s1 + $0xb0] sm:$0xff]  ;;  %v1424_v40 = vld [vmem:[%s1917_s1 + $0xa8] sm:$0xff]  ;;  %v1448_v44 = vld [vmem:[%s1917_s1 + $0xa0] sm:$0xff] }
   0xe   :  { %888 = vmatprep.subr.mxu1 %v1309_v21  ;;  %848 = vmatpush3.msra.mxu0 %v1316_v22  ;;  %v1405_v37 = vld [vmem:[%s1917_s1 + $0x1b0] sm:$0xff]  ;;  %v1429_v41 = vld [vmem:[%s1917_s1 + $0x1a8] sm:$0xff]  ;;  %v1453_v45 = vld [vmem:[%s1917_s1 + $0x1a0] sm:$0xff] }
   0xf   :  { %889 = vmatpush3.msra.mxu1 %v1321_v23  ;;  %849 = vmatprep.subr.mxu0 %v1328_v24  ;;  %v1412_v38 = vld [vmem:[%s1917_s1 + $0x30] sm:$0xff]  ;;  %v1436_v42 = vld [vmem:[%s1917_s1 + $0x28] sm:$0xff]  ;;  %v1460_v46 = vld [vmem:[%s1917_s1 + $0x20] sm:$0xff] }
  0x10   :  { %890 = vmatprep.subr.mxu1 %v1333_v25  ;;  %850 = vmatpush3.msra.mxu0 %v1340_v26  ;;  %v1417_v39 = vld [vmem:[%s1917_s1 + $0x130] sm:$0xff]  ;;  %1945 = vst [vmem:[#allocation2_spill] sm:$0xff] %v1436_v42  ;;  %v1441_v43 = vld [vmem:[%s1917_s1 + $0x128] sm:$0xff]  ;;  %v1465_v47 = vld [vmem:[%s1917_s1 + $0x120] sm:$0xff] }
  0x11   :  { %891 = vmatpush3.msra.mxu1 %v1345_v27  ;;  %851 = vmatprep.subr.mxu0 %v1352_v28  ;;  %1946 = vst [vmem:[#allocation3_spill] sm:$0xff] %v1441_v43  ;;  %v1472_v48 = vld [vmem:[%s1917_s1 + $0x98] sm:$0xff]  ;;  %v1496_v52 = vld [vmem:[%s1917_s1 + $0x90] sm:$0xff]  ;;  %v1520_v56 = vld [vmem:[%s1917_s1 + $0x88] sm:$0xff] }
  0x12   :  { %892 = vmatprep.subr.mxu1 %v1357_v29  ;;  %852 = vmatpush3.msra.mxu0 %v1364_v30  ;;  %v1477_v49 = vld [vmem:[%s1917_s1 + $0x198] sm:$0xff]  ;;  %v1501_v53 = vld [vmem:[%s1917_s1 + $0x190] sm:$0xff]  ;;  %1952 = vst [vmem:[#allocation9_spill] sm:$0xff] %v1520_v56  ;;  %v1525_v57 = vld [vmem:[%s1917_s1 + $0x188] sm:$0xff] }
  0x13   :  { %893 = vmatpush3.msra.mxu1 %v1369_v31  ;;  %853 = vmatprep.subr.mxu0 %v1376_v32  ;;  %v1484_v50 = vld [vmem:[%s1917_s1 + $0x18] sm:$0xff]  ;;  %1949 = vst [vmem:[#allocation6_spill] sm:$0xff] %v1501_v53  ;;  %v1508_v54 = vld [vmem:[%s1917_s1 + $0x10] sm:$0xff]  ;;  %1953 = vst [vmem:[#allocation10_spill] sm:$0xff] %v1525_v57 }
  0x14   :  { %894 = vmatprep.subr.mxu1 %v1381_v33  ;;  %854 = vmatpush3.msra.mxu0 %v1388_v34  ;;  %1947 = vst [vmem:[#allocation4_spill] sm:$0xff] %v1484_v50  ;;  %v1489_v51 = vld [vmem:[%s1917_s1 + $0x118] sm:$0xff]  ;;  %1950 = vst [vmem:[#allocation7_spill] sm:$0xff] %v1508_v54  ;;  %v1513_v55 = vld [vmem:[%s1917_s1 + $0x110] sm:$0xff] }
  0x15   :  { %895 = vmatpush3.msra.mxu1 %v1393_v35  ;;  %855 = vmatprep.subr.mxu0 %v1400_v36  ;;  %1948 = vst [vmem:[#allocation5_spill] sm:$0xff] %v1489_v51  ;;  %1951 = vst [vmem:[#allocation8_spill] sm:$0xff] %v1513_v55  ;;  %v1532_v58 = vld [vmem:[%s1917_s1 + $0x8] sm:$0xff]  ;;  %v1544_v60 = vld [vmem:[%s1917_s1 + $0x80] sm:$0xff] }
  0x16   :  { %896 = vmatprep.subr.mxu1 %v1405_v37  ;;  %856 = vmatpush3.msra.mxu0 %v1412_v38  ;;  %v1537_v59 = vld [vmem:[%s1917_s1 + $0x108] sm:$0xff]  ;;  %1955 = vst [vmem:[#allocation12_spill] sm:$0xff] %v1544_v60  ;;  %v1549_v61 = vld [vmem:[%s1917_s1 + $0x180] sm:$0xff] }
  0x17   :  { %897 = vmatpush3.msra.mxu1 %v1417_v39  ;;  %857 = vmatprep.subr.mxu0 %v1424_v40  ;;  %1954 = vst [vmem:[#allocation11_spill] sm:$0xff] %v1537_v59  ;;  %1956 = vst [vmem:[#allocation13_spill] sm:$0xff] %v1549_v61  ;;  %v1556_v62 = vld [vmem:[%s1917_s1] sm:$0xff]  ;;  %v15_v63 = vld [vmem:[%s1918_s0 + $0x8] sm:$0xff] }
  0x18   :  { %898 = vmatprep.subr.mxu1 %v1429_v41  ;;  %858 = vmatpush3.msra.mxu0 %v1436_v42 }
  0x19   :  { %899 = vmatpush3.msra.mxu1 %v1441_v43  ;;  %859 = vmatprep.subr.mxu0 %v1448_v44 }
  0x1a   :  { %900 = vmatprep.subr.mxu1 %v1453_v45  ;;  %860 = vmatpush3.msra.mxu0 %v1460_v46 }
  0x1b   :  { %901 = vmatpush3.msra.mxu1 %v1465_v47  ;;  %861 = vmatprep.subr.mxu0 %v1472_v48 }
  0x1c   :  { %902 = vmatprep.subr.mxu1 %v1477_v49  ;;  %862 = vmatpush3.msra.mxu0 %v1484_v50 }
  0x1d   :  { %903 = vmatpush3.msra.mxu1 %v1489_v51  ;;  %863 = vmatprep.subr.mxu0 %v1496_v52 }
  0x1e   :  { %904 = vmatprep.subr.mxu1 %v1501_v53  ;;  %864 = vmatpush3.msra.mxu0 %v1508_v54 }
  0x1f   :  { %905 = vmatpush3.msra.mxu1 %v1513_v55  ;;  %865 = vmatprep.subr.mxu0 %v1520_v56  ;;  %v1566_v55 = vld [vmem:[%s1917_s1 + $0x100] sm:$0xff] }
  0x20   :  { %906 = vmatprep.subr.mxu1 %v1525_v57  ;;  %866 = vmatpush3.msra.mxu0 %v1532_v58  ;;  %v17_v57 = vld [vmem:[%s1918_s0 + $0x18] sm:$0xff]  ;;  %v14_v56 = vld [vmem:[%s1918_s0] sm:$0xff] }
  0x21   :  { %907 = vmatpush3.msra.mxu1 %v1537_v59  ;;  %867 = vmatprep.subr.mxu0 %v1544_v60  ;;  %v16_v59 = vld [vmem:[%s1918_s0 + $0x10] sm:$0xff] }
  0x22   :  { %908 = vmatprep.subr.mxu1 %v1549_v61  ;;  %868 = vmatpush3.msra.mxu0 %v1556_v62 }
  0x23   :  { %154 = vmatprep.mubr.f32.mxu0 %v15_v63  ;;  %909 = vmatpush3.msra.mxu1 %v1566_v55  ;;  %v20_v63 = vld [vmem:[%s1918_s0 + $0x30] sm:$0xff] }
  0x24   :  { %234 = vmatprep.mubr.f32.mxu1 %v17_v57  ;;  %155 = vmatmul.mubr.f32.vlgmr.msra.gmra.mxu0 %v14_v56  ;;  %v19_v56 = vld [vmem:[%s1918_s0 + $0x28] sm:$0xff]  ;;  %v21_v57 = vld [vmem:[%s1918_s0 + $0x38] sm:$0xff] }
  0x25   :  { %235 = vmatmul.mubr.f32.vlgmr.msra.gmra.mxu1 %v16_v59  ;;  %919 = vmatprep.subr.mxu0 %v1188_v0  ;;  %v18_v59 = vld [vmem:[%s1918_s0 + $0x20] sm:$0xff] }
  0x26   :  { %960 = vmatprep.subr.mxu1 %v1193_v1  ;;  %920 = vmatpush3.msra.mxu0 %v1198_v2 }
  0x27   :  { %961 = vmatpush3.msra.mxu1 %v1205_v3  ;;  %921 = vmatprep.subr.mxu0 %v1210_v4 }
  0x28   :  { %962 = vmatprep.subr.mxu1 %v1215_v5  ;;  %922 = vmatpush3.msra.mxu0 %v1222_v6 }
  0x29   :  { %963 = vmatpush3.msra.mxu1 %v1227_v7  ;;  %923 = vmatprep.subr.mxu0 %v1232_v8 }
  0x2a   :  { %964 = vmatprep.subr.mxu1 %v1239_v9  ;;  %924 = vmatpush3.msra.mxu0 %v1244_v10 }
  0x2b   :  { %965 = vmatpush3.msra.mxu1 %v1249_v11  ;;  %925 = vmatprep.subr.mxu0 %v1256_v12 }
  0x2c   :  { %966 = vmatprep.subr.mxu1 %v1261_v13  ;;  %926 = vmatpush3.msra.mxu0 %v1268_v14 }
  0x2d   :  { %967 = vmatpush3.msra.mxu1 %v1273_v15  ;;  %927 = vmatprep.subr.mxu0 %v1280_v16 }
  0x2e   :  { %968 = vmatprep.subr.mxu1 %v1285_v17  ;;  %928 = vmatpush3.msra.mxu0 %v1292_v18 }
  0x2f   :  { %969 = vmatpush3.msra.mxu1 %v1297_v19  ;;  %929 = vmatprep.subr.mxu0 %v1304_v20 }
  0x30   :  { %970 = vmatprep.subr.mxu1 %v1309_v21  ;;  %930 = vmatpush3.msra.mxu0 %v1316_v22 }
  0x31   :  { %971 = vmatpush3.msra.mxu1 %v1321_v23  ;;  %931 = vmatprep.subr.mxu0 %v1328_v24 }
  0x32   :  { %972 = vmatprep.subr.mxu1 %v1333_v25  ;;  %932 = vmatpush3.msra.mxu0 %v1340_v26 }
  0x33   :  { %973 = vmatpush3.msra.mxu1 %v1345_v27  ;;  %933 = vmatprep.subr.mxu0 %v1352_v28 }
  0x34   :  { %974 = vmatprep.subr.mxu1 %v1357_v29  ;;  %934 = vmatpush3.msra.mxu0 %v1364_v30 }
  0x35   :  { %975 = vmatpush3.msra.mxu1 %v1369_v31  ;;  %935 = vmatprep.subr.mxu0 %v1376_v32 }
  0x36   :  { %976 = vmatprep.subr.mxu1 %v1381_v33  ;;  %936 = vmatpush3.msra.mxu0 %v1388_v34 }
  0x37   :  { %977 = vmatpush3.msra.mxu1 %v1393_v35  ;;  %937 = vmatprep.subr.mxu0 %v1400_v36 }
  0x38   :  { %978 = vmatprep.subr.mxu1 %v1405_v37  ;;  %938 = vmatpush3.msra.mxu0 %v1412_v38 }
  0x39   :  { %979 = vmatpush3.msra.mxu1 %v1417_v39  ;;  %939 = vmatprep.subr.mxu0 %v1424_v40 }
  0x3a   :  { %980 = vmatprep.subr.mxu1 %v1429_v41  ;;  %940 = vmatpush3.msra.mxu0 %v1436_v42  ;;  %v25_v42 = vld [vmem:[%s1918_s0 + $0x58] sm:$0x3] }
  0x3b   :  { %981 = vmatpush3.msra.mxu1 %v1441_v43  ;;  %159 = vmatprep.mubr.f32.mxu0 %v19_v56  ;;  %v23_v43 = vld [vmem:[%s1918_s0 + $0x48] sm:$0x3]  ;;  %v22_v56 = vld [vmem:[%s1918_s0 + $0x40] sm:$0x3] }
  0x3c   :  { %239 = vmatprep.mubr.f32.mxu1 %v21_v57  ;;  %941 = vmatprep.subr.mxu0 %v1448_v44  ;;  %v24_v57 = vld [vmem:[%s1918_s0 + $0x50] sm:$0x3] }
  0x3d   :  { %982 = vmatprep.subr.mxu1 %v1453_v45  ;;  %160 = vmatmul.mubr.f32.gmra.mxu0 %v18_v59  ;;  %v1957_v59 = vld [vmem:[#allocation8_spill] sm:$0xff] }
  0x3e   :  { %240 = vmatmul.mubr.f32.gmra.mxu1 %v20_v63  ;;  %942 = vmatpush3.msra.mxu0 %v1460_v46  ;;  %v1958_v63 = vld [vmem:[#allocation9_spill] sm:$0xff] }
  0x3f   :  { %983 = vmatpush3.msra.mxu1 %v1465_v47  ;;  %943 = vmatprep.subr.mxu0 %v1472_v48 }
  0x40   :  { %984 = vmatprep.subr.mxu1 %v1477_v49  ;;  %944 = vmatpush3.msra.mxu0 %v1484_v50  ;;  %v801_v50 = vld [vmem:[%s1918_s0 + $0x68] sm:$0xff] }
  0x41   :  { %985 = vmatpush3.msra.mxu1 %v1489_v51  ;;  %164 = vmatprep.mubr.f32.mxu0 %v23_v43  ;;  %v1959_v51 = vld [vmem:[#allocation10_spill] sm:$0xff]  ;;  %v803_v43 = vld [vmem:[%s1918_s0 + $0x78] sm:$0xff] }
  0x42   :  { %244 = vmatprep.mubr.f32.mxu1 %v25_v42  ;;  %945 = vmatprep.subr.mxu0 %v1496_v52  ;;  %v1960_v42 = vld [vmem:[#allocation11_spill] sm:$0xff] }
  0x43   :  { %986 = vmatprep.subr.mxu1 %v1501_v53  ;;  %165 = vmatmul.mubr.f32.gmra.mxu0 %v22_v56  ;;  %v800_v56 = vld [vmem:[%s1918_s0 + $0x60] sm:$0xff] }
  0x44   :  { %245 = vmatmul.mubr.f32.gmra.mxu1 %v24_v57  ;;  %946 = vmatpush3.msra.mxu0 %v1508_v54  ;;  %v802_v57 = vld [vmem:[%s1918_s0 + $0x70] sm:$0xff] }
  0x45   :  { %987 = vmatpush3.msra.mxu1 %v1957_v59  ;;  %947 = vmatprep.subr.mxu0 %v1958_v63 }
  0x46   :  { %988 = vmatprep.subr.mxu1 %v1959_v51  ;;  %948 = vmatpush3.msra.mxu0 %v1532_v58 }
  0x47   :  { %989 = vmatpush3.msra.mxu1 %v1960_v42  ;;  %949 = vmatprep.subr.mxu0 %v1544_v60  ;;  %v807_v60 = vld [vmem:[%s1918_s0 + $0x98] sm:$0xff] }
  0x48   :  { %990 = vmatprep.subr.mxu1 %v1549_v61  ;;  %950 = vmatpush3.msra.mxu0 %v1556_v62  ;;  %v805_v61 = vld [vmem:[%s1918_s0 + $0x88] sm:$0xff] }
  0x49   :  { %327 = vmatprep.mubr.f32.mxu0 %v801_v50  ;;  %991 = vmatpush3.msra.mxu1 %v1566_v55  ;;  %v804_v50 = vld [vmem:[%s1918_s0 + $0x80] sm:$0xff] }
  0x4a   :  { %407 = vmatprep.mubr.f32.mxu1 %v803_v43  ;;  %328 = vmatmul.mubr.f32.vlgmr.msra.gmra.mxu0 %v800_v56  ;;  %v806_v43 = vld [vmem:[%s1918_s0 + $0x90] sm:$0xff]  ;;  %v809_v56 = vld [vmem:[%s1918_s0 + $0xa8] sm:$0x3] }
  0x4b   :  { %408 = vmatmul.mubr.f32.vlgmr.msra.gmra.mxu1 %v802_v57  ;;  %1001 = vmatprep.subr.mxu0 %v1188_v0  ;;  %v811_v57 = vld [vmem:[%s1918_s0 + $0xb8] sm:$0x3] }
  0x4c   :  { %1042 = vmatprep.subr.mxu1 %v1193_v1  ;;  %1002 = vmatpush3.msra.mxu0 %v1198_v2 }
  0x4d   :  { %1043 = vmatpush3.msra.mxu1 %v1205_v3  ;;  %1003 = vmatprep.subr.mxu0 %v1210_v4 }
  0x4e   :  { %1044 = vmatprep.subr.mxu1 %v1215_v5  ;;  %332 = vmatprep.mubr.f32.mxu0 %v805_v61  ;;  %v810_v61 = vld [vmem:[%s1918_s0 + $0xb0] sm:$0x3] }
  0x4f   :  { %412 = vmatprep.mubr.f32.mxu1 %v807_v60  ;;  %1004 = vmatpush3.msra.mxu0 %v1222_v6  ;;  %v808_v60 = vld [vmem:[%s1918_s0 + $0xa0] sm:$0x3] }
  0x50   :  { %1045 = vmatpush3.msra.mxu1 %v1227_v7  ;;  %333 = vmatmul.mubr.f32.gmra.mxu0 %v804_v50  ;;  %v1961_v50 = vld [vmem:[#allocation2_spill] sm:$0xff] }
  0x51   :  { %413 = vmatmul.mubr.f32.gmra.mxu1 %v806_v43  ;;  %1005 = vmatprep.subr.mxu0 %v1232_v8  ;;  %v1962_v43 = vld [vmem:[#allocation3_spill] sm:$0xff] }
  0x52   :  { %1046 = vmatprep.subr.mxu1 %v1239_v9  ;;  %1006 = vmatpush3.msra.mxu0 %v1244_v10 }
  0x53   :  { %1047 = vmatpush3.msra.mxu1 %v1249_v11  ;;  %1007 = vmatprep.subr.mxu0 %v1256_v12 }
  0x54   :  { %1048 = vmatprep.subr.mxu1 %v1261_v13  ;;  %337 = vmatprep.mubr.f32.mxu0 %v809_v56  ;;  %v1963_v56 = vld [vmem:[#allocation4_spill] sm:$0xff] }
  0x55   :  { %417 = vmatprep.mubr.f32.mxu1 %v811_v57  ;;  %1008 = vmatpush3.msra.mxu0 %v1268_v14  ;;  %v1964_v57 = vld [vmem:[#allocation5_spill] sm:$0xff] }
  0x56   :  { %1049 = vmatpush3.msra.mxu1 %v1273_v15  ;;  %338 = vmatmul.mubr.f32.gmra.mxu0 %v808_v60  ;;  %v813_v60 = vld [vmem:[%s1918_s0 + $0xc8] sm:$0xff] }
  0x57   :  { %418 = vmatmul.mubr.f32.gmra.mxu1 %v810_v61  ;;  %1009 = vmatprep.subr.mxu0 %v1280_v16  ;;  %v815_v61 = vld [vmem:[%s1918_s0 + $0xd8] sm:$0xff] }
  0x58   :  { %1050 = vmatprep.subr.mxu1 %v1285_v17  ;;  %1010 = vmatpush3.msra.mxu0 %v1292_v18 }
  0x59   :  { %1051 = vmatpush3.msra.mxu1 %v1297_v19  ;;  %1011 = vmatprep.subr.mxu0 %v1304_v20 }
  0x5a   :  { %1052 = vmatprep.subr.mxu1 %v1309_v21  ;;  %1012 = vmatpush3.msra.mxu0 %v1316_v22 }
  0x5b   :  { %1053 = vmatpush3.msra.mxu1 %v1321_v23  ;;  %1013 = vmatprep.subr.mxu0 %v1328_v24 }
  0x5c   :  { %1054 = vmatprep.subr.mxu1 %v1333_v25  ;;  %1014 = vmatpush3.msra.mxu0 %v1340_v26 }
  0x5d   :  { %1055 = vmatpush3.msra.mxu1 %v1345_v27  ;;  %1015 = vmatprep.subr.mxu0 %v1352_v28 }
  0x5e   :  { %1056 = vmatprep.subr.mxu1 %v1357_v29  ;;  %1016 = vmatpush3.msra.mxu0 %v1364_v30 }
  0x5f   :  { %1057 = vmatpush3.msra.mxu1 %v1369_v31  ;;  %1017 = vmatprep.subr.mxu0 %v1376_v32 }
  0x60   :  { %1058 = vmatprep.subr.mxu1 %v1381_v33  ;;  %1018 = vmatpush3.msra.mxu0 %v1388_v34 }
  0x61   :  { %1059 = vmatpush3.msra.mxu1 %v1393_v35  ;;  %1019 = vmatprep.subr.mxu0 %v1400_v36 }
  0x62   :  { %1060 = vmatprep.subr.mxu1 %v1405_v37  ;;  %1020 = vmatpush3.msra.mxu0 %v1412_v38 }
  0x63   :  { %1061 = vmatpush3.msra.mxu1 %v1417_v39  ;;  %1021 = vmatprep.subr.mxu0 %v1424_v40 }
  0x64   :  { %1062 = vmatprep.subr.mxu1 %v1429_v41  ;;  %1022 = vmatpush3.msra.mxu0 %v1961_v50 }
  0x65   :  { %1063 = vmatpush3.msra.mxu1 %v1962_v43  ;;  %1023 = vmatprep.subr.mxu0 %v1448_v44 }
  0x66   :  { %1064 = vmatprep.subr.mxu1 %v1453_v45  ;;  %1024 = vmatpush3.msra.mxu0 %v1460_v46 }
  0x67   :  { %1065 = vmatpush3.msra.mxu1 %v1465_v47  ;;  %1025 = vmatprep.subr.mxu0 %v1472_v48 }
  0x68   :  { %1066 = vmatprep.subr.mxu1 %v1477_v49  ;;  %1026 = vmatpush3.msra.mxu0 %v1963_v56 }
  0x69   :  { %1067 = vmatpush3.msra.mxu1 %v1964_v57  ;;  %1027 = vmatprep.subr.mxu0 %v1496_v52 }
  0x6a   :  { %1068 = vmatprep.subr.mxu1 %v1501_v53  ;;  %1028 = vmatpush3.msra.mxu0 %v1508_v54  ;;  %v1965_v53 = vld [vmem:[#allocation12_spill] sm:$0xff]  ;;  %v1966_v54 = vld [vmem:[#allocation13_spill] sm:$0xff] }
  0x6b   :  { %1069 = vmatpush3.msra.mxu1 %v1957_v59  ;;  %1029 = vmatprep.subr.mxu0 %v1958_v63  ;;  %v814_v63 = vld [vmem:[%s1918_s0 + $0xd0] sm:$0xff] }
  0x6c   :  { %1070 = vmatprep.subr.mxu1 %v1959_v51  ;;  %1030 = vmatpush3.msra.mxu0 %v1532_v58  ;;  %v812_v51 = vld [vmem:[%s1918_s0 + $0xc0] sm:$0xff] }
  0x6d   :  { %1071 = vmatpush3.msra.mxu1 %v1960_v42  ;;  %1031 = vmatprep.subr.mxu0 %v1965_v53  ;;  %v819_v53 = vld [vmem:[%s1918_s0 + $0xf8] sm:$0xff] }
  0x6e   :  { %1072 = vmatprep.subr.mxu1 %v1966_v54  ;;  %1032 = vmatpush3.msra.mxu0 %v1556_v62  ;;  %v817_v54 = vld [vmem:[%s1918_s0 + $0xe8] sm:$0xff] }
  0x6f   :  { %503 = vmatprep.mubr.f32.mxu0 %v813_v60  ;;  %1073 = vmatpush3.msra.mxu1 %v1566_v55 }
  0x70   :  { %583 = vmatprep.mubr.f32.mxu1 %v815_v61  ;;  %504 = vmatmul.mubr.f32.vlgmr.msra.gmra.mxu0 %v812_v51 }
  0x71   :  { %584 = vmatmul.mubr.f32.vlgmr.msra.gmra.mxu1 %v814_v63  ;;  %1083 = vmatprep.subr.mxu0 %v1188_v0  ;;  %v816_v0 = vld [vmem:[%s1918_s0 + $0xe0] sm:$0xff] }
  0x72   :  { %1124 = vmatprep.subr.mxu1 %v1193_v1  ;;  %1084 = vmatpush3.msra.mxu0 %v1198_v2  ;;  %v818_v1 = vld [vmem:[%s1918_s0 + $0xf0] sm:$0xff]  ;;  %v821_v2 = vld [vmem:[%s1918_s0 + $0x108] sm:$0x3] }
  0x73   :  { %1125 = vmatpush3.msra.mxu1 %v1205_v3  ;;  %1085 = vmatprep.subr.mxu0 %v1210_v4  ;;  %v823_v3 = vld [vmem:[%s1918_s0 + $0x118] sm:$0x3]  ;;  %v820_v4 = vld [vmem:[%s1918_s0 + $0x100] sm:$0x3] }
  0x74   :  { %1126 = vmatprep.subr.mxu1 %v1215_v5  ;;  %508 = vmatprep.mubr.f32.mxu0 %v817_v54  ;;  %v822_v5 = vld [vmem:[%s1918_s0 + $0x110] sm:$0x3] }
  0x75   :  { %588 = vmatprep.mubr.f32.mxu1 %v819_v53  ;;  %1086 = vmatpush3.msra.mxu0 %v1222_v6  ;;  %v1967_v6 = vld [vmem:[#allocation6_spill] sm:$0xff] }
  0x76   :  { %1127 = vmatpush3.msra.mxu1 %v1227_v7  ;;  %509 = vmatmul.mubr.f32.gmra.mxu0 %v816_v0  ;;  %v1968_v7 = vld [vmem:[#allocation7_spill] sm:$0xff] }
  0x77   :  { %589 = vmatmul.mubr.f32.gmra.mxu1 %v818_v1  ;;  %1087 = vmatprep.subr.mxu0 %v1232_v8  ;;  %v1969_v8 = vld [vmem:[#allocation9_spill] sm:$0xff] }
  0x78   :  { %1128 = vmatprep.subr.mxu1 %v1239_v9  ;;  %1088 = vmatpush3.msra.mxu0 %v1244_v10  ;;  %v1970_v9 = vld [vmem:[#allocation10_spill] sm:$0xff]  ;;  %v825_v10 = vld [vmem:[%s1918_s0 + $0x128] sm:$0xff] }
  0x79   :  { %1129 = vmatpush3.msra.mxu1 %v1249_v11  ;;  %1089 = vmatprep.subr.mxu0 %v1256_v12  ;;  %v827_v11 = vld [vmem:[%s1918_s0 + $0x138] sm:$0xff]  ;;  %v1971_v12 = vld [vmem:[#allocation12_spill] sm:$0xff] }
  0x7a   :  { %1130 = vmatprep.subr.mxu1 %v1261_v13  ;;  %513 = vmatprep.mubr.f32.mxu0 %v821_v2  ;;  %v1972_v13 = vld [vmem:[#allocation13_spill] sm:$0xff] }
  0x7b   :  { %593 = vmatprep.mubr.f32.mxu1 %v823_v3  ;;  %1090 = vmatpush3.msra.mxu0 %v1268_v14  ;;  %v824_v14 = vld [vmem:[%s1918_s0 + $0x120] sm:$0xff] }
  0x7c   :  { %1131 = vmatpush3.msra.mxu1 %v1273_v15  ;;  %514 = vmatmul.mubr.f32.gmra.mxu0 %v820_v4  ;;  %v826_v15 = vld [vmem:[%s1918_s0 + $0x130] sm:$0xff] }
  0x7d   :  { %594 = vmatmul.mubr.f32.gmra.mxu1 %v822_v5  ;;  %1091 = vmatprep.subr.mxu0 %v1280_v16  ;;  %v829_v16 = vld [vmem:[%s1918_s0 + $0x148] sm:$0xff] }
  0x7e   :  { %1132 = vmatprep.subr.mxu1 %v1285_v17  ;;  %1092 = vmatpush3.msra.mxu0 %v1292_v18  ;;  %v831_v17 = vld [vmem:[%s1918_s0 + $0x158] sm:$0xff]  ;;  %v828_v18 = vld [vmem:[%s1918_s0 + $0x140] sm:$0xff] }
  0x7f   :  { %1133 = vmatpush3.msra.mxu1 %v1297_v19  ;;  %1093 = vmatprep.subr.mxu0 %v1304_v20  ;;  %v830_v19 = vld [vmem:[%s1918_s0 + $0x150] sm:$0xff]  ;;  %v833_v20 = vld [vmem:[%s1918_s0 + $0x168] sm:$0x3] }
  0x80   :  { %1134 = vmatprep.subr.mxu1 %v1309_v21  ;;  %1094 = vmatpush3.msra.mxu0 %v1316_v22  ;;  %v835_v21 = vld [vmem:[%s1918_s0 + $0x178] sm:$0x3]  ;;  %v832_v22 = vld [vmem:[%s1918_s0 + $0x160] sm:$0x3] }
  0x81   :  { %1135 = vmatpush3.msra.mxu1 %v1321_v23  ;;  %1095 = vmatprep.subr.mxu0 %v1328_v24  ;;  %v834_v23 = vld [vmem:[%s1918_s0 + $0x170] sm:$0x3] }
  0x82   :  { %1136 = vmatprep.subr.mxu1 %v1333_v25  ;;  %1096 = vmatpush3.msra.mxu0 %v1340_v26 }
  0x83   :  { %1137 = vmatpush3.msra.mxu1 %v1345_v27  ;;  %1097 = vmatprep.subr.mxu0 %v1352_v28 }
  0x84   :  { %1138 = vmatprep.subr.mxu1 %v1357_v29  ;;  %1098 = vmatpush3.msra.mxu0 %v1364_v30 }
  0x85   :  { %1139 = vmatpush3.msra.mxu1 %v1369_v31  ;;  %1099 = vmatprep.subr.mxu0 %v1376_v32 }
  0x86   :  { %1140 = vmatprep.subr.mxu1 %v1381_v33  ;;  %1100 = vmatpush3.msra.mxu0 %v1388_v34 }
  0x87   :  { %1141 = vmatpush3.msra.mxu1 %v1393_v35  ;;  %1101 = vmatprep.subr.mxu0 %v1400_v36 }
  0x88   :  { %1142 = vmatprep.subr.mxu1 %v1405_v37  ;;  %1102 = vmatpush3.msra.mxu0 %v1412_v38 }
  0x89   :  { %1143 = vmatpush3.msra.mxu1 %v1417_v39  ;;  %1103 = vmatprep.subr.mxu0 %v1424_v40 }
  0x8a   :  { %1144 = vmatprep.subr.mxu1 %v1429_v41  ;;  %1104 = vmatpush3.msra.mxu0 %v1961_v50 }
  0x8b   :  { %1145 = vmatpush3.msra.mxu1 %v1962_v43  ;;  %1105 = vmatprep.subr.mxu0 %v1448_v44 }
  0x8c   :  { %1146 = vmatprep.subr.mxu1 %v1453_v45  ;;  %1106 = vmatpush3.msra.mxu0 %v1460_v46 }
  0x8d   :  { %1147 = vmatpush3.msra.mxu1 %v1465_v47  ;;  %1107 = vmatprep.subr.mxu0 %v1472_v48 }
  0x8e   :  { %1148 = vmatprep.subr.mxu1 %v1477_v49  ;;  %1108 = vmatpush3.msra.mxu0 %v1963_v56 }
  0x8f   :  { %1149 = vmatpush3.msra.mxu1 %v1964_v57  ;;  %1109 = vmatprep.subr.mxu0 %v1496_v52 }
  0x90   :  { %1150 = vmatprep.subr.mxu1 %v1967_v6  ;;  %1110 = vmatpush3.msra.mxu0 %v1968_v7 }
  0x91   :  { %1151 = vmatpush3.msra.mxu1 %v1957_v59  ;;  %1111 = vmatprep.subr.mxu0 %v1969_v8 }
  0x92   :  { %1152 = vmatprep.subr.mxu1 %v1970_v9  ;;  %1112 = vmatpush3.msra.mxu0 %v1532_v58 }
  0x93   :  { %1153 = vmatpush3.msra.mxu1 %v1960_v42  ;;  %1113 = vmatprep.subr.mxu0 %v1971_v12 }
  0x94   :  { %1154 = vmatprep.subr.mxu1 %v1972_v13  ;;  %1114 = vmatpush3.msra.mxu0 %v1556_v62 }
  0x95   :  { %679 = vmatprep.mubr.f32.mxu0 %v825_v10  ;;  %1155 = vmatpush3.msra.mxu1 %v1566_v55 }
  0x96   :  { %759 = vmatprep.mubr.f32.mxu1 %v827_v11  ;;  %680 = vmatmul.mubr.f32.vlgmr.msra.gmra.mxu0 %v824_v14 }
  0x97   :  { %760 = vmatmul.mubr.f32.vlgmr.msra.gmra.mxu1 %v826_v15  ;;  %684 = vmatprep.mubr.f32.mxu0 %v829_v16 }
  0x98   :  { %764 = vmatprep.mubr.f32.mxu1 %v831_v17 }
  0x9a   :  { %685 = vmatmul.mubr.f32.gmra.mxu0 %v828_v18 }
  0x9b   :  { %765 = vmatmul.mubr.f32.gmra.mxu1 %v830_v19  ;;  %689 = vmatprep.mubr.f32.mxu0 %v833_v20 }
  0x9c   :  { %769 = vmatprep.mubr.f32.mxu1 %v835_v21 }
  0x9e   :  { %690 = vmatmul.mubr.f32.gmra.mxu0 %v832_v22 }
  0x9f   :  { %770 = vmatmul.mubr.f32.gmra.mxu1 %v834_v23 }
  0xe4   :  { %v869_v24 = vpop.f32.mrf.mxu0 }
  0xe5   :  { %v910_v25 = vpop.f32.mrf.mxu1 }
  0xe6   :  { %v870_v26 = vpop.f32.mrf.mxu0 }
  0xe7   :  { %v911_v27 = vpop.f32.mrf.mxu1  ;;  %v871_v56 = vadd.f32 %v870_v26, %v869_v24 }
  0xe8   :  { %v912_v57 = vadd.f32 %v911_v27, %v910_v25 }
  0xea   :  { %v237_v5 = vadd.f32 %v912_v57, %v871_v56 }
  0xfd   :  { %v872_v28 = vpop.f32.mrf.mxu0 }
  0xfe   :  { %v913_v29 = vpop.f32.mrf.mxu1 }
  0xff   :  { %v873_v30 = vpop.f32.mrf.mxu0 }
 0x100   :  { %v914_v31 = vpop.f32.mrf.mxu1  ;;  %v874_v6 = vadd.f32 %v873_v30, %v872_v28 }
 0x101   :  { %v915_v7 = vadd.f32 %v914_v31, %v913_v29 }
 0x103   :  { %v875_v32 = vpop.f32.mrf.mxu0  ;;  %v242_v21 = vadd.f32 %v915_v7, %v874_v6 }
 0x104   :  { %v916_v33 = vpop.f32.mrf.mxu1 }
 0x105   :  { %v876_v34 = vpop.f32.mrf.mxu0 }
 0x106   :  { %v917_v35 = vpop.f32.mrf.mxu1  ;;  %v877_v22 = vadd.f32 %v876_v34, %v875_v32 }
 0x107   :  { %v918_v23 = vadd.f32 %v917_v35, %v916_v33 }
 0x109   :  { %v247_v32 = vadd.f32 %v918_v23, %v877_v22 }
 0x10a   :  { %v951_v36 = vpop.f32.mrf.mxu0 }
 0x10b   :  { %v992_v37 = vpop.f32.mrf.mxu1 }
 0x10c   :  { %v952_v38 = vpop.f32.mrf.mxu0 }
 0x10d   :  { %v993_v39 = vpop.f32.mrf.mxu1  ;;  %v953_v63 = vadd.f32 %v952_v38, %v951_v36  ;;  %v836_v36 = vld [vmem:[%s1919_s2] ss:$0 sm:$0xff] }
 0x10e   :  { %v994_v42 = vadd.f32 %v993_v39, %v992_v37 }
 0x110   :  { %v954_v40 = vpop.f32.mrf.mxu0  ;;  %v410_v0 = vadd.f32 %v994_v42, %v953_v63 }
 0x111   :  { %v995_v41 = vpop.f32.mrf.mxu1 }
 0x112   :  { %v955_v44 = vpop.f32.mrf.mxu0  ;;  %v423_v13 = vmax.f32 %v237_v5, %v410_v0 }
 0x113   :  { %v996_v45 = vpop.f32.mrf.mxu1  ;;  %v956_v3 = vadd.f32 %v955_v44, %v954_v40 }
 0x114   :  { %v997_v4 = vadd.f32 %v996_v45, %v995_v41 }
 0x116   :  { %v957_v46 = vpop.f32.mrf.mxu0  ;;  %v415_v18 = vadd.f32 %v997_v4, %v956_v3 }
 0x117   :  { %v998_v47 = vpop.f32.mrf.mxu1 }
 0x118   :  { %v958_v48 = vpop.f32.mrf.mxu0  ;;  %v424_v39 = vmax.f32 %v242_v21, %v415_v18 }
 0x119   :  { %v999_v49 = vpop.f32.mrf.mxu1  ;;  %v959_v14 = vadd.f32 %v958_v48, %v957_v46 }
 0x11a   :  { %v1000_v15 = vadd.f32 %v999_v49, %v998_v47 }
 0x11c   :  { %v420_v31 = vadd.f32 %v1000_v15, %v959_v14 }
 0x11e   :  { %v425_v48 = vmax.f32 %v247_v32, %v420_v31 }
 0x130   :  { %v1033_v51 = vpop.f32.mrf.mxu0 }
 0x131   :  { %v1074_v52 = vpop.f32.mrf.mxu1 }
 0x132   :  { %v1034_v53 = vpop.f32.mrf.mxu0 }
 0x133   :  { %v1075_v54 = vpop.f32.mrf.mxu1  ;;  %v1035_v60 = vadd.f32 %v1034_v53, %v1033_v51 }
 0x134   :  { %v1076_v61 = vadd.f32 %v1075_v54, %v1074_v52 }
 0x136   :  { %v1036_v55 = vpop.f32.mrf.mxu0  ;;  %v586_v8 = vadd.f32 %v1076_v61, %v1035_v60 }
 0x137   :  { %v1077_v58 = vpop.f32.mrf.mxu1 }
 0x138   :  { %v1037_v62 = vpop.f32.mrf.mxu0  ;;  %v599_v24 = vmax.f32 %v423_v13, %v586_v8 }
 0x139   :  { %v1078_v59 = vpop.f32.mrf.mxu1  ;;  %v1038_v11 = vadd.f32 %v1037_v62, %v1036_v55 }
 0x13a   :  { %v1079_v12 = vadd.f32 %v1078_v59, %v1077_v58 }
 0x13c   :  { %v1039_v50 = vpop.f32.mrf.mxu0  ;;  %v591_v27 = vadd.f32 %v1079_v12, %v1038_v11 }
 0x13d   :  { %v1080_v43 = vpop.f32.mrf.mxu1 }
 0x13e   :  { %v1040_v1 = vpop.f32.mrf.mxu0  ;;  %v600_v35 = vmax.f32 %v424_v39, %v591_v27 }
 0x13f   :  { %v1081_v2 = vpop.f32.mrf.mxu1  ;;  %v1041_v28 = vadd.f32 %v1040_v1, %v1039_v50 }
 0x140   :  { %v1082_v29 = vadd.f32 %v1081_v2, %v1080_v43 }
 0x142   :  { %v596_v45 = vadd.f32 %v1082_v29, %v1041_v28 }
 0x144   :  { %v601_v58 = vmax.f32 %v425_v48, %v596_v45 }
 0x156   :  { %v1115_v9 = vpop.f32.mrf.mxu0 }
 0x157   :  { %v1156_v10 = vpop.f32.mrf.mxu1 }
 0x158   :  { %v1116_v16 = vpop.f32.mrf.mxu0 }
 0x159   :  { %v1157_v17 = vpop.f32.mrf.mxu1  ;;  %v1117_v19 = vadd.f32 %v1116_v16, %v1115_v9 }
 0x15a   :  { %v1158_v20 = vadd.f32 %v1157_v17, %v1156_v10  ;;  %v1118_v25 = vpop.f32.mrf.mxu0 }
 0x15b   :  { %v1159_v26 = vpop.f32.mrf.mxu1 }
 0x15c   :  { %v762_v30 = vadd.f32 %v1158_v20, %v1117_v19  ;;  %v1119_v37 = vpop.f32.mrf.mxu0 }
 0x15d   :  { %v1160_v38 = vpop.f32.mrf.mxu1  ;;  %v1120_v41 = vadd.f32 %v1119_v37, %v1118_v25 }
 0x15e   :  { %v775_v40 = vmax.f32 %v599_v24, %v762_v30  ;;  %v1161_v44 = vadd.f32 %v1160_v38, %v1159_v26  ;;  %v1121_v33 = vpop.f32.mrf.mxu0 }
 0x15f   :  { %v1162_v34 = vpop.f32.mrf.mxu1 }
 0x160   :  { %v785_v46 = vadd.f32 %v836_v36, %v775_v40  ;;  %v767_v47 = vadd.f32 %v1161_v44, %v1120_v41  ;;  %v1122_v49 = vpop.f32.mrf.mxu0 }
 0x161   :  { %v1163_v51 = vpop.f32.mrf.mxu1  ;;  %v1123_v54 = vadd.f32 %v1122_v49, %v1121_v33 }
 0x162   :  { %v788_v52 = vmax.f32 %v785_v46, 0.0  ;;  %v776_v53 = vmax.f32 %v600_v35, %v767_v47  ;;  %v1164_v55 = vadd.f32 %v1163_v51, %v1162_v34 }
 0x164   :  { %792 = vst.msk [vmem:[%s1920_s3] sm:$0xff] %vm791_vm0, %v788_v52  ;;  %v786_v62 = vadd.f32 %v836_v36, %v776_v53  ;;  %v772_v59 = vadd.f32 %v1164_v55, %v1123_v54 }
 0x166   :  { %v789_v63 = vmax.f32 %v786_v62, 0.0  ;;  %v777_v42 = vmax.f32 %v601_v58, %v772_v59 }
 0x168   :  { %793 = vst.msk [vmem:[%s1920_s3 + $0x8] sm:$0xff] %vm791_vm0, %v789_v63  ;;  %v787_v50 = vadd.f32 %v836_v36, %v777_v42 }
 0x16a   :  { %v790_v43 = vmax.f32 %v787_v50, 0.0 }
 0x16c   :  { %795 = vst.msk [vmem:[%s1920_s3 + $0x10] sm:$0x3] %vm794_vm1, %v790_v43 }

// kernel: deep_qnet_forward.7
= control target key start
LH: loop header
LB: loop body
LE: loop exit
PB: predicated region body
PF: predicated region fallthrough
CT: control target
= control target key end

     0   :  { %v213_v4 = vmov 1983009808   ;;  %v60_v6 = vlaneseq  ;;  %s340_s0 = inlined_call_operand.vmem [shape: f32[2,256], index: 0, kind: input, shape index: {}]   ;;  %s341_s1 = inlined_call_operand.vmem [shape: f32[256,3], index: 1, kind: input, shape index: {}]   ;;  %s342_s2 = inlined_call_operand.vmem [shape: f32[1,3], index: 2, kind: input, shape index: {}]   ;;  %s343_s3 = inlined_call_operand.hbm [shape: f32[2,3], index: 3, kind: output, shape index: {}]  }
   0x1   :  { %v48_v0 = vld [vmem:[%s341_s1 + $0xf8] sm:$0xff]  ;;  %v47_v2 = vld [vmem:[%s341_s1 + $0xf0] sm:$0xff]  ;;  %v58_v5 = vunpack.c.l.s4 %v213_v4  ;;  %v46_v7 = vld [vmem:[%s341_s1 + $0xe8] sm:$0xff] }
   0x2   :  { %v32_v1 = vld [vmem:[%s341_s1 + $0x78] sm:$0xff]  ;;  %154 = vmatprep.subr.mxu0 %v48_v0  ;;  %v31_v3 = vld [vmem:[%s341_s1 + $0x70] sm:$0xff]  ;;  %v30_v8 = vld [vmem:[%s341_s1 + $0x68] sm:$0xff]  ;;  %v61_v12 = vshrl.u32 %v60_v6, 7 }
   0x3   :  { %155 = vmatpush3.msra.mxu0 %v32_v1  ;;  %v45_v9 = vld [vmem:[%s341_s1 + $0xe0] sm:$0xff]  ;;  %v59_v11 = vunpack.c.0.s8 %v58_v5  ;;  %v44_v13 = vld [vmem:[%s341_s1 + $0xd8] sm:$0xff]  ;;  %v43_v15 = vld [vmem:[%s341_s1 + $0xd0] sm:$0xff] }
   0x4   :  { %156 = vmatprep.subr.mxu0 %v47_v2  ;;  %v29_v10 = vld [vmem:[%s341_s1 + $0x60] sm:$0xff]  ;;  %v28_v14 = vld [vmem:[%s341_s1 + $0x58] sm:$0xff]  ;;  %v27_v16 = vld [vmem:[%s341_s1 + $0x50] sm:$0xff] }
   0x5   :  { %157 = vmatpush3.msra.mxu0 %v31_v3  ;;  %v62_v17 = vsub.s32 %v59_v11, %v61_v12  ;;  %v42_v18 = vld [vmem:[%s341_s1 + $0xc8] sm:$0xff]  ;;  %v15_v19 = vld [vmem:[%s340_s0] sm:$0xf] }
   0x6   :  { %158 = vmatprep.subr.mxu0 %v46_v7  ;;  %v26_v20 = vld [vmem:[%s341_s1 + $0x48] sm:$0xff]  ;;  %v16_v21 = vmax.f32 %v15_v19, 0.0 }
   0x7   :  { %159 = vmatpush3.msra.mxu0 %v30_v8 }
   0x8   :  { %160 = vmatprep.subr.mxu0 %v45_v9 }
   0x9   :  { %161 = vmatpush3.msra.mxu0 %v29_v10 }
   0xa   :  { %162 = vmatprep.subr.mxu0 %v44_v13 }
   0xb   :  { %163 = vmatpush3.msra.mxu0 %v28_v14 }
   0xc   :  { %164 = vmatprep.subr.mxu0 %v43_v15 }
   0xd   :  { %8 = vsyncpa [#allocation3], 0  ;;  %165 = vmatpush3.msra.mxu0 %v27_v16  ;;  %v41_v22 = vld [vmem:[%s341_s1 + $0xc0] sm:$0xff]  ;;  %v63_v24 = vrot.slane %v16_v21, %v62_v17  ;;  %v40_v25 = vld [vmem:[%s341_s1 + $0xb8] sm:$0xff]  ;;  %s214_s24 = smov [#allocation2]   ;;  %vm137_vm0 = vcmask 17408  }
   0xe   :  { %166 = vmatprep.subr.mxu0 %v42_v18  ;;  %v25_v23 = vld [vmem:[%s341_s1 + $0x40] sm:$0xff]  ;;  %v24_v26 = vld [vmem:[%s341_s1 + $0x38] sm:$0xff]  ;;  %v39_v28 = vld [vmem:[%s341_s1 + $0xb0] sm:$0xff]  ;;  %s145_s25 = sshll.u32 %s214_s24, 4  ;;  %s146_s25 = int_to_ptr.vmem [resolvable:$true] %s145_s25 }
   0xf   :  { %167 = vmatpush3.msra.mxu0 %v26_v20  ;;  %v64_v27 = vcombine.high %v63_v24, %v63_v24  ;;  %v23_v29 = vld [vmem:[%s341_s1 + $0x30] sm:$0xff]  ;;  %v38_v30 = vld [vmem:[%s341_s1 + $0xa8] sm:$0xff]  ;;  %v37_v32 = vld [vmem:[%s341_s1 + $0xa0] sm:$0xff]  ;;  %s191_s26 = scalar_lea.vmem %s146_s25, 32  ;;  %p196_p1 = scmp.lt.s32.totalorder %s146_s25, %s146_s25 }
  0x10   :  { %168 = vmatprep.subr.mxu0 %v41_v22  ;;  %v22_v31 = vld [vmem:[%s341_s1 + $0x28] sm:$0xff]  ;;  %v21_v33 = vld [vmem:[%s341_s1 + $0x20] sm:$0xff]  ;;  %v36_v34 = vld [vmem:[%s341_s1 + $0x98] sm:$0xff]  ;;  %p192_p0 = scmp.ne.s32.totalorder %s146_s25, %s191_s26  ;;  %p197_p2 = scmp.lt.s32.totalorder %s191_s26, %s191_s26 }
  0x11   :  { %169 = vmatpush3.msra.mxu0 %v25_v23  ;;  %131 = vmatprep.mubr.f32.mxu0 %v64_v27  ;;  %v20_v35 = vld [vmem:[%s341_s1 + $0x18] sm:$0xff]  ;;  %v35_v36 = vld [vmem:[%s341_s1 + $0x90] sm:$0xff]  ;;  %v34_v38 = vld [vmem:[%s341_s1 + $0x88] sm:$0xff] }
  0x12   :  { %170 = vmatprep.subr.mxu0 %v40_v25  ;;  %v19_v37 = vld [vmem:[%s341_s1 + $0x10] sm:$0xff]  ;;  %v18_v39 = vld [vmem:[%s341_s1 + $0x8] sm:$0xff]  ;;  %v33_v40 = vld [vmem:[%s341_s1 + $0x80] sm:$0xff]  ;;  %p198_p3 = por %p197_p2, %p196_p1 }
  0x13   :  { %171 = vmatpush3.msra.mxu0 %v24_v26  ;;  %v17_v41 = vld [vmem:[%s341_s1] sm:$0xff] }
  0x14   :  { %172 = vmatprep.subr.mxu0 %v39_v28  ;;  %v153_v43 = vld [vmem:[%s342_s2] ss:$0 sm:$0xff]  ;;  %p199_p4 = pnand %p198_p3, %p192_p0 }
  0x15   :  { %173 = vmatpush3.msra.mxu0 %v23_v29 }
  0x16   :  { %174 = vmatprep.subr.mxu0 %v38_v30 }
  0x17   :  { %175 = vmatpush3.msra.mxu0 %v22_v31 }
  0x18   :  { %176 = vmatprep.subr.mxu0 %v37_v32 }
  0x19   :  { %177 = vmatpush3.msra.mxu0 %v21_v33 }
  0x1a   :  { %178 = vmatprep.subr.mxu0 %v36_v34 }
  0x1b   :  { %179 = vmatpush3.msra.mxu0 %v20_v35 }
  0x1c   :  { %180 = vmatprep.subr.mxu0 %v35_v36 }
  0x1d   :  { %181 = vmatpush3.msra.mxu0 %v19_v37 }
  0x1e   :  { %182 = vmatprep.subr.mxu0 %v34_v38 }
  0x1f   :  { %183 = vmatpush3.msra.mxu0 %v18_v39 }
  0x20   :  { %184 = vmatprep.subr.mxu0 %v33_v40 }
  0x21   :  { %185 = vmatpush3.msra.mxu0 %v17_v41 }
  0x22   :  { %132 = vmatmul.mubr.f32.vlgmr.msra.gmra.mxu0 %v63_v24 }
  0xe2   :  { %v186_v42 = vpop.f32.mrf.mxu0 }
  0xe4   :  { %v187_v44 = vpop.f32.mrf.mxu0 }
  0xe5   :  { %v188_v45 = vadd.f32 %v187_v44, %v186_v42 }
  0xe7   :  { %v134_v46 = vadd.f32 %v188_v45, %v153_v43 }
  0xe9   :  { %138 = vst.msk [vmem:[#allocation2] sm:$0x3] %vm137_vm0, %v134_v46 }
  0xea   :  { %202 = shalt.err (!%p199_p4)
}
  0xeb   :  { %148 = dma.vmem_to_hbm [thread:$0]  %s146_s25, 32, %s343_s3, [#allocation3]  }
  0xec   :  { %211 = dma.done.wait [#allocation3], 32  }
  0xed   :  { %212 = vsyncadd [#allocation3], 4294967264 }
  0xee   :  { %152 = vsyncpa [#allocation3], 1 }

// kernel: deep_qnet_forward.6
= control target key start
LH: loop header
LB: loop body
LE: loop exit
PB: predicated region body
PF: predicated region fallthrough
CT: control target
= control target key end

     0   :  { %vm91_vm0 = vcmask 523264   ;;  %vm1394_vm1 = vmmov 0   ;;  %s2174_s1 = inlined_call_operand.vmem [shape: f32[576,64], index: 1, kind: input, shape index: {}]   ;;  %s2175_s0 = inlined_call_operand.vmem [shape: f32[4,8,576], index: 0, kind: input, shape index: {}]   ;;  %s2176_s2 = inlined_call_operand.vmem [shape: f32[1,64], index: 2, kind: input, shape index: {}]   ;;  %s2177_s3 = inlined_call_operand.vmem [shape: f32[8,64], index: 3, kind: output, shape index: {}]  }
   0x1   :  { %v1418_v0 = vld [vmem:[%s2174_s1 + $0xf8] sm:$0xff]  ;;  %v1440_v4 = vld [vmem:[%s2174_s1 + $0xf0] sm:$0xff]  ;;  %v1462_v8 = vld [vmem:[%s2174_s1 + $0xe8] sm:$0xff] }
   0x2   :  { %v1423_v1 = vld [vmem:[%s2174_s1 + $0x1f8] sm:$0xff]  ;;  %999 = vmatprep.subr.mxu0 %v1418_v0  ;;  %v1445_v5 = vld [vmem:[%s2174_s1 + $0x1f0] sm:$0xff]  ;;  %v1469_v9 = vld [vmem:[%s2174_s1 + $0x1e8] sm:$0xff] }
   0x3   :  { %v1428_v2 = vld [vmem:[%s2174_s1 + $0x78] sm:$0xff]  ;;  %1034 = vmatprep.subr.mxu1 %v1423_v1  ;;  %v1452_v6 = vld [vmem:[%s2174_s1 + $0x70] sm:$0xff]  ;;  %v1474_v10 = vld [vmem:[%s2174_s1 + $0x68] sm:$0xff] }
   0x4   :  { %v1435_v3 = vld [vmem:[%s2174_s1 + $0x178] sm:$0xff]  ;;  %1000 = vmatpush3.msra.mxu0 %v1428_v2  ;;  %v1457_v7 = vld [vmem:[%s2174_s1 + $0x170] sm:$0xff]  ;;  %v1479_v11 = vld [vmem:[%s2174_s1 + $0x168] sm:$0xff] }
   0x5   :  { %1035 = vmatpush3.msra.mxu1 %v1435_v3  ;;  %1001 = vmatprep.subr.mxu0 %v1440_v4  ;;  %v1486_v12 = vld [vmem:[%s2174_s1 + $0xe0] sm:$0xff]  ;;  %v1510_v16 = vld [vmem:[%s2174_s1 + $0xd8] sm:$0xff]  ;;  %v1534_v20 = vld [vmem:[%s2174_s1 + $0xd0] sm:$0xff] }
   0x6   :  { %1036 = vmatprep.subr.mxu1 %v1445_v5  ;;  %1002 = vmatpush3.msra.mxu0 %v1452_v6  ;;  %v1491_v13 = vld [vmem:[%s2174_s1 + $0x1e0] sm:$0xff]  ;;  %v1515_v17 = vld [vmem:[%s2174_s1 + $0x1d8] sm:$0xff]  ;;  %2229 = vst [vmem:[#allocation4_spill] sm:$0xff] %v1534_v20  ;;  %v1539_v21 = vld [vmem:[%s2174_s1 + $0x1d0] sm:$0xff] }
   0x7   :  { %1037 = vmatpush3.msra.mxu1 %v1457_v7  ;;  %1003 = vmatprep.subr.mxu0 %v1462_v8  ;;  %v1498_v14 = vld [vmem:[%s2174_s1 + $0x60] sm:$0xff]  ;;  %v1522_v18 = vld [vmem:[%s2174_s1 + $0x58] sm:$0xff]  ;;  %v1546_v22 = vld [vmem:[%s2174_s1 + $0x50] sm:$0xff] }
   0x8   :  { %1038 = vmatprep.subr.mxu1 %v1469_v9  ;;  %2227 = vst [vmem:[#allocation2_spill] sm:$0xff] %v1498_v14  ;;  %v1503_v15 = vld [vmem:[%s2174_s1 + $0x160] sm:$0xff]  ;;  %1004 = vmatpush3.msra.mxu0 %v1474_v10  ;;  %2228 = vst [vmem:[#allocation3_spill] sm:$0xff] %v1522_v18  ;;  %v1527_v19 = vld [vmem:[%s2174_s1 + $0x158] sm:$0xff] }
   0x9   :  { %1039 = vmatpush3.msra.mxu1 %v1479_v11  ;;  %1005 = vmatprep.subr.mxu0 %v1486_v12  ;;  %v1551_v23 = vld [vmem:[%s2174_s1 + $0x150] sm:$0xff]  ;;  %v1558_v24 = vld [vmem:[%s2174_s1 + $0xc8] sm:$0xff]  ;;  %v1582_v28 = vld [vmem:[%s2174_s1 + $0xc0] sm:$0xff] }
   0xa   :  { %1040 = vmatprep.subr.mxu1 %v1491_v13  ;;  %1006 = vmatpush3.msra.mxu0 %v1498_v14  ;;  %v1563_v25 = vld [vmem:[%s2174_s1 + $0x1c8] sm:$0xff]  ;;  %v1587_v29 = vld [vmem:[%s2174_s1 + $0x1c0] sm:$0xff]  ;;  %v1606_v32 = vld [vmem:[%s2174_s1 + $0xb8] sm:$0xff] }
   0xb   :  { %1041 = vmatpush3.msra.mxu1 %v1503_v15  ;;  %1007 = vmatprep.subr.mxu0 %v1510_v16  ;;  %v1570_v26 = vld [vmem:[%s2174_s1 + $0x48] sm:$0xff]  ;;  %v1594_v30 = vld [vmem:[%s2174_s1 + $0x40] sm:$0xff]  ;;  %v1611_v33 = vld [vmem:[%s2174_s1 + $0x1b8] sm:$0xff] }
   0xc   :  { %1042 = vmatprep.subr.mxu1 %v1515_v17  ;;  %1008 = vmatpush3.msra.mxu0 %v1522_v18  ;;  %v1575_v27 = vld [vmem:[%s2174_s1 + $0x148] sm:$0xff]  ;;  %v1599_v31 = vld [vmem:[%s2174_s1 + $0x140] sm:$0xff]  ;;  %v1618_v34 = vld [vmem:[%s2174_s1 + $0x38] sm:$0xff] }
   0xd   :  { %1043 = vmatpush3.msra.mxu1 %v1527_v19  ;;  %1009 = vmatprep.subr.mxu0 %v1534_v20  ;;  %v1623_v35 = vld [vmem:[%s2174_s1 + $0x138] sm:$0xff]  ;;  %v1630_v36 = vld [vmem:[%s2174_s1 + $0xb0] sm:$0xff]  ;;  %v1654_v40 = vld [vmem:[%s2174_s1 + $0xa8] sm:$0xff] }
   0xe   :  { %1044 = vmatprep.subr.mxu1 %v1539_v21  ;;  %1010 = vmatpush3.msra.mxu0 %v1546_v22  ;;  %v1635_v37 = vld [vmem:[%s2174_s1 + $0x1b0] sm:$0xff]  ;;  %v1659_v41 = vld [vmem:[%s2174_s1 + $0x1a8] sm:$0xff]  ;;  %v1678_v44 = vld [vmem:[%s2174_s1 + $0xa0] sm:$0xff] }
   0xf   :  { %1045 = vmatpush3.msra.mxu1 %v1551_v23  ;;  %1011 = vmatprep.subr.mxu0 %v1558_v24  ;;  %v1642_v38 = vld [vmem:[%s2174_s1 + $0x30] sm:$0xff]  ;;  %v1666_v42 = vld [vmem:[%s2174_s1 + $0x28] sm:$0xff]  ;;  %v1683_v45 = vld [vmem:[%s2174_s1 + $0x1a0] sm:$0xff] }
  0x10   :  { %1046 = vmatprep.subr.mxu1 %v1563_v25  ;;  %1012 = vmatpush3.msra.mxu0 %v1570_v26  ;;  %v1647_v39 = vld [vmem:[%s2174_s1 + $0x130] sm:$0xff]  ;;  %v1671_v43 = vld [vmem:[%s2174_s1 + $0x128] sm:$0xff]  ;;  %2230 = vst [vmem:[#allocation5_spill] sm:$0xff] %v1683_v45  ;;  %v1690_v46 = vld [vmem:[%s2174_s1 + $0x20] sm:$0xff] }
  0x11   :  { %1047 = vmatpush3.msra.mxu1 %v1575_v27  ;;  %1013 = vmatprep.subr.mxu0 %v1582_v28  ;;  %v1695_v47 = vld [vmem:[%s2174_s1 + $0x120] sm:$0xff]  ;;  %v1702_v48 = vld [vmem:[%s2174_s1 + $0x98] sm:$0xff]  ;;  %v1726_v52 = vld [vmem:[%s2174_s1 + $0x90] sm:$0xff] }
  0x12   :  { %1048 = vmatprep.subr.mxu1 %v1587_v29  ;;  %1014 = vmatpush3.msra.mxu0 %v1594_v30  ;;  %2231 = vst [vmem:[#allocation6_spill] sm:$0xff] %v1695_v47  ;;  %v1707_v49 = vld [vmem:[%s2174_s1 + $0x198] sm:$0xff]  ;;  %v1731_v53 = vld [vmem:[%s2174_s1 + $0x190] sm:$0xff]  ;;  %v1750_v56 = vld [vmem:[%s2174_s1 + $0x88] sm:$0xff] }
  0x13   :  { %1049 = vmatpush3.msra.mxu1 %v1599_v31  ;;  %1015 = vmatprep.subr.mxu0 %v1606_v32  ;;  %2232 = vst [vmem:[#allocation7_spill] sm:$0xff] %v1707_v49  ;;  %v1714_v50 = vld [vmem:[%s2174_s1 + $0x18] sm:$0xff]  ;;  %2234 = vst [vmem:[#allocation9_spill] sm:$0xff] %v1731_v53  ;;  %v1738_v54 = vld [vmem:[%s2174_s1 + $0x10] sm:$0xff] }
  0x14   :  { %1050 = vmatprep.subr.mxu1 %v1611_v33  ;;  %1016 = vmatpush3.msra.mxu0 %v1618_v34  ;;  %v1719_v51 = vld [vmem:[%s2174_s1 + $0x118] sm:$0xff]  ;;  %v1743_v55 = vld [vmem:[%s2174_s1 + $0x110] sm:$0xff]  ;;  %v1755_v57 = vld [vmem:[%s2174_s1 + $0x188] sm:$0xff] }
  0x15   :  { %1051 = vmatpush3.msra.mxu1 %v1623_v35  ;;  %1017 = vmatprep.subr.mxu0 %v1630_v36  ;;  %2233 = vst [vmem:[#allocation8_spill] sm:$0xff] %v1719_v51  ;;  %2235 = vst [vmem:[#allocation10_spill] sm:$0xff] %v1743_v55  ;;  %v1762_v58 = vld [vmem:[%s2174_s1 + $0x8] sm:$0xff]  ;;  %v1774_v60 = vld [vmem:[%s2174_s1 + $0x80] sm:$0xff] }
  0x16   :  { %1052 = vmatprep.subr.mxu1 %v1635_v37  ;;  %1018 = vmatpush3.msra.mxu0 %v1642_v38  ;;  %2236 = vst [vmem:[#allocation11_spill] sm:$0xff] %v1755_v57  ;;  %2237 = vst [vmem:[#allocation12_spill] sm:$0xff] %v1762_v58  ;;  %v1767_v59 = vld [vmem:[%s2174_s1 + $0x108] sm:$0xff]  ;;  %v1779_v61 = vld [vmem:[%s2174_s1 + $0x180] sm:$0xff] }
  0x17   :  { %1053 = vmatpush3.msra.mxu1 %v1647_v39  ;;  %1019 = vmatprep.subr.mxu0 %v1654_v40  ;;  %2238 = vst [vmem:[#allocation13_spill] sm:$0xff] %v1767_v59  ;;  %2239 = vst [vmem:[#allocation14_spill] sm:$0xff] %v1774_v60  ;;  %v1786_v62 = vld [vmem:[%s2174_s1] sm:$0xff]  ;;  %v15_v63 = vld [vmem:[%s2175_s0 + $0x8] sm:$0xff] }
  0x18   :  { %1054 = vmatprep.subr.mxu1 %v1659_v41  ;;  %1020 = vmatpush3.msra.mxu0 %v1666_v42  ;;  %2240 = vst [vmem:[#allocation15_spill] sm:$0xff] %v1779_v61  ;;  %2241 = vst [vmem:[#allocation16_spill] sm:$0xff] %v1786_v62 }
  0x19   :  { %1055 = vmatpush3.msra.mxu1 %v1671_v43  ;;  %1021 = vmatprep.subr.mxu0 %v1678_v44 }
  0x1a   :  { %1056 = vmatprep.subr.mxu1 %v1683_v45  ;;  %1022 = vmatpush3.msra.mxu0 %v1690_v46 }
  0x1b   :  { %1057 = vmatpush3.msra.mxu1 %v1695_v47  ;;  %1023 = vmatprep.subr.mxu0 %v1702_v48 }
  0x1c   :  { %1058 = vmatprep.subr.mxu1 %v1707_v49  ;;  %1024 = vmatpush3.msra.mxu0 %v1714_v50  ;;  %v1821_v49 = vld [vmem:[%s2174_s1 + $0x230] sm:$0xff] }
  0x1d   :  { %1059 = vmatpush3.msra.mxu1 %v1719_v51  ;;  %1025 = vmatprep.subr.mxu0 %v1726_v52  ;;  %v1814_v51 = vld [vmem:[%s2174_s1 + $0x238] sm:$0xff]  ;;  %2243 = vst [vmem:[#allocation18_spill] sm:$0xff] %v1821_v49 }
  0x1e   :  { %1060 = vmatprep.subr.mxu1 %v1731_v53  ;;  %1026 = vmatpush3.msra.mxu0 %v1738_v54  ;;  %v14_v53 = vld [vmem:[%s2175_s0] sm:$0xff]  ;;  %2242 = vst [vmem:[#allocation17_spill] sm:$0xff] %v1814_v51 }
  0x1f   :  { %1061 = vmatpush3.msra.mxu1 %v1743_v55  ;;  %1027 = vmatprep.subr.mxu0 %v1750_v56  ;;  %v1796_v55 = vld [vmem:[%s2174_s1 + $0x100] sm:$0xff] }
  0x20   :  { %1062 = vmatprep.subr.mxu1 %v1755_v57  ;;  %1028 = vmatpush3.msra.mxu0 %v1762_v58  ;;  %v17_v57 = vld [vmem:[%s2175_s0 + $0x18] sm:$0xff] }
  0x21   :  { %1063 = vmatpush3.msra.mxu1 %v1767_v59  ;;  %1029 = vmatprep.subr.mxu0 %v1774_v60  ;;  %v16_v59 = vld [vmem:[%s2175_s0 + $0x10] sm:$0xff] }
  0x22   :  { %1064 = vmatprep.subr.mxu1 %v1779_v61  ;;  %1030 = vmatpush3.msra.mxu0 %v1786_v62  ;;  %v2198_v61 = vmov 0.0  }
  0x23   :  { %159 = vmatprep.mubr.f32.mxu0 %v15_v63  ;;  %1065 = vmatpush3.msra.mxu1 %v1796_v55  ;;  %v1857_v63 = vld [vmem:[%s2174_s1 + $0x210] sm:$0xff] }
  0x24   :  { %229 = vmatprep.mubr.f32.mxu1 %v17_v57  ;;  %160 = vmatmul.mubr.f32.vlgmr.msra.gmra.mxu0 %v14_v53  ;;  %v1830_v53 = vld [vmem:[%s2174_s1 + $0x228] sm:$0xff]  ;;  %v1839_v57 = vld [vmem:[%s2174_s1 + $0x220] sm:$0xff]  ;;  %2247 = vst [vmem:[#allocation22_spill] sm:$0xff] %v1857_v63 }
  0x25   :  { %230 = vmatmul.mubr.f32.vlgmr.msra.gmra.mxu1 %v16_v59  ;;  %1315 = vmatprep.subr.mxu0 %v2198_v61  ;;  %2244 = vst [vmem:[#allocation19_spill] sm:$0xff] %v1830_v53  ;;  %2245 = vst [vmem:[#allocation20_spill] sm:$0xff] %v1839_v57  ;;  %v1848_v59 = vld [vmem:[%s2174_s1 + $0x218] sm:$0xff] }
  0x26   :  { %1078 = vmatprep.subr.mxu1 %v1418_v0  ;;  %1316 = vmatpush3.msra.mxu0 %v1814_v51  ;;  %2246 = vst [vmem:[#allocation21_spill] sm:$0xff] %v1848_v59 }
  0x27   :  { %1079 = vmatpush3.msra.mxu1 %v1428_v2  ;;  %1317 = vmatprep.subr.mxu0 %v2198_v61 }
  0x28   :  { %1080 = vmatprep.subr.mxu1 %v1440_v4  ;;  %1318 = vmatpush3.msra.mxu0 %v1821_v49 }
  0x29   :  { %1081 = vmatpush3.msra.mxu1 %v1452_v6  ;;  %1319 = vmatprep.subr.mxu0 %v2198_v61 }
  0x2a   :  { %1082 = vmatprep.subr.mxu1 %v1462_v8  ;;  %1320 = vmatpush3.msra.mxu0 %v1830_v53 }
  0x2b   :  { %1083 = vmatpush3.msra.mxu1 %v1474_v10  ;;  %1321 = vmatprep.subr.mxu0 %v2198_v61 }
  0x2c   :  { %1084 = vmatprep.subr.mxu1 %v1486_v12  ;;  %1322 = vmatpush3.msra.mxu0 %v1839_v57 }
  0x2d   :  { %1085 = vmatpush3.msra.mxu1 %v1498_v14  ;;  %1323 = vmatprep.subr.mxu0 %v2198_v61  ;;  %v1866_v14 = vld [vmem:[%s2174_s1 + $0x208] sm:$0xff] }
  0x2e   :  { %1086 = vmatprep.subr.mxu1 %v1510_v16  ;;  %1324 = vmatpush3.msra.mxu0 %v1848_v59 }
  0x2f   :  { %1087 = vmatpush3.msra.mxu1 %v1522_v18  ;;  %1325 = vmatprep.subr.mxu0 %v2198_v61  ;;  %v1875_v18 = vld [vmem:[%s2174_s1 + $0x200] sm:$0xff] }
  0x30   :  { %1088 = vmatprep.subr.mxu1 %v1534_v20  ;;  %1326 = vmatpush3.msra.mxu0 %v1857_v63  ;;  %v18_v20 = vld [vmem:[%s2175_s0 + $0x20] sm:$0xff] }
  0x31   :  { %1089 = vmatpush3.msra.mxu1 %v1546_v22  ;;  %1327 = vmatprep.subr.mxu0 %v2198_v61 }
  0x32   :  { %1090 = vmatprep.subr.mxu1 %v1558_v24  ;;  %1328 = vmatpush3.msra.mxu0 %v1866_v14 }
  0x33   :  { %1091 = vmatpush3.msra.mxu1 %v1570_v26  ;;  %1329 = vmatprep.subr.mxu0 %v2198_v61 }
  0x34   :  { %1092 = vmatprep.subr.mxu1 %v1582_v28  ;;  %1330 = vmatpush3.msra.mxu0 %v1875_v18 }
  0x35   :  { %1331 = vmatprep.mubr.msk.f32.mxu0 %vm1394_vm1, %v2198_v61  ;;  %1093 = vmatpush3.msra.mxu1 %v1594_v30  ;;  %v980_v61 = vld [vmem:[%s2175_s0 + $0x28] sm:$0xff] }
  0x36   :  { %1332 = vmatmul.mubr.msk.f32.vlgmr.msra.gmra.mxu0 %vm91_vm0, %v18_v20  ;;  %1094 = vmatprep.subr.mxu1 %v1606_v32  ;;  %v981_v20 = vld [vmem:[%s2175_s0 + $0x30] sm:$0xff] }
  0x37   :  { %1113 = vmatprep.subr.mxu0 %v1423_v1  ;;  %1095 = vmatpush3.msra.mxu1 %v1618_v34 }
  0x38   :  { %1114 = vmatpush3.msra.mxu0 %v1435_v3  ;;  %1096 = vmatprep.subr.mxu1 %v1630_v36 }
  0x39   :  { %1115 = vmatprep.subr.mxu0 %v1445_v5  ;;  %1097 = vmatpush3.msra.mxu1 %v1642_v38 }
  0x3a   :  { %1116 = vmatpush3.msra.mxu0 %v1457_v7  ;;  %1098 = vmatprep.subr.mxu1 %v1654_v40 }
  0x3b   :  { %1117 = vmatprep.subr.mxu0 %v1469_v9  ;;  %1099 = vmatpush3.msra.mxu1 %v1666_v42 }
  0x3c   :  { %1118 = vmatpush3.msra.mxu0 %v1479_v11  ;;  %1100 = vmatprep.subr.mxu1 %v1678_v44 }
  0x3d   :  { %1119 = vmatprep.subr.mxu0 %v1491_v13  ;;  %1101 = vmatpush3.msra.mxu1 %v1690_v46 }
  0x3e   :  { %1120 = vmatpush3.msra.mxu0 %v1503_v15  ;;  %1102 = vmatprep.subr.mxu1 %v1702_v48 }
  0x3f   :  { %1121 = vmatprep.subr.mxu0 %v1515_v17  ;;  %1103 = vmatpush3.msra.mxu1 %v1714_v50 }
  0x40   :  { %1122 = vmatpush3.msra.mxu0 %v1527_v19  ;;  %1104 = vmatprep.subr.mxu1 %v1726_v52 }
  0x41   :  { %1123 = vmatprep.subr.mxu0 %v1539_v21  ;;  %1105 = vmatpush3.msra.mxu1 %v1738_v54 }
  0x42   :  { %1124 = vmatpush3.msra.mxu0 %v1551_v23  ;;  %1106 = vmatprep.subr.mxu1 %v1750_v56 }
  0x43   :  { %1125 = vmatprep.subr.mxu0 %v1563_v25  ;;  %1107 = vmatpush3.msra.mxu1 %v1762_v58  ;;  %v2248_v58 = vmov 0.0  }
  0x44   :  { %1126 = vmatpush3.msra.mxu0 %v1575_v27  ;;  %1108 = vmatprep.subr.mxu1 %v1774_v60  ;;  %v2255_v60 = vld [vmem:[#allocation15_spill] sm:$0xff] }
  0x45   :  { %1127 = vmatprep.subr.mxu0 %v1587_v29  ;;  %1109 = vmatpush3.msra.mxu1 %v1786_v62  ;;  %v2254_v62 = vld [vmem:[#allocation13_spill] sm:$0xff] }
  0x46   :  { %1128 = vmatpush3.msra.mxu0 %v1599_v31  ;;  %378 = vmatprep.mubr.f32.mxu1 %v981_v20  ;;  %v2250_v20 = vld [vmem:[#allocation8_spill] sm:$0xff] }
  0x47   :  { %1129 = vmatprep.subr.mxu0 %v1611_v33  ;;  %1334 = vmatprep.subr.mxu1 %v2248_v58 }
  0x48   :  { %379 = vmatmul.mubr.f32.vlgmr.msra.gmra.mxu1 %v980_v61  ;;  %1130 = vmatpush3.msra.mxu0 %v1623_v35  ;;  %v2249_v61 = vld [vmem:[#allocation7_spill] sm:$0xff] }
  0x49   :  { %1335 = vmatpush3.msra.mxu1 %v1814_v51  ;;  %1131 = vmatprep.subr.mxu0 %v1635_v37  ;;  %v2253_v51 = vld [vmem:[#allocation11_spill] sm:$0xff] }
  0x4a   :  { %1336 = vmatprep.subr.mxu1 %v2248_v58  ;;  %1132 = vmatpush3.msra.mxu0 %v1647_v39 }
  0x4b   :  { %1337 = vmatpush3.msra.mxu1 %v1821_v49  ;;  %1133 = vmatprep.subr.mxu0 %v1659_v41  ;;  %v2251_v49 = vld [vmem:[#allocation9_spill] sm:$0xff] }
  0x4c   :  { %1338 = vmatprep.subr.mxu1 %v2248_v58  ;;  %1134 = vmatpush3.msra.mxu0 %v1671_v43 }
  0x4d   :  { %1339 = vmatpush3.msra.mxu1 %v1830_v53  ;;  %1135 = vmatprep.subr.mxu0 %v1683_v45  ;;  %v2252_v53 = vld [vmem:[#allocation10_spill] sm:$0xff] }
  0x4e   :  { %1340 = vmatprep.subr.mxu1 %v2248_v58  ;;  %1136 = vmatpush3.msra.mxu0 %v1695_v47 }
  0x4f   :  { %1341 = vmatpush3.msra.mxu1 %v1839_v57  ;;  %1137 = vmatprep.subr.mxu0 %v2249_v61  ;;  %v983_v57 = vld [vmem:[%s2175_s0 + $0x40] sm:$0xff] }
  0x50   :  { %1342 = vmatprep.subr.mxu1 %v2248_v58  ;;  %1138 = vmatpush3.msra.mxu0 %v2250_v20 }
  0x51   :  { %1343 = vmatpush3.msra.mxu1 %v1848_v59  ;;  %1139 = vmatprep.subr.mxu0 %v2251_v49  ;;  %v982_v59 = vld [vmem:[%s2175_s0 + $0x38] sm:$0xff] }
  0x52   :  { %1344 = vmatprep.subr.mxu1 %v2248_v58  ;;  %1140 = vmatpush3.msra.mxu0 %v2252_v53 }
  0x53   :  { %1345 = vmatpush3.msra.mxu1 %v1857_v63  ;;  %1141 = vmatprep.subr.mxu0 %v2253_v51  ;;  %v984_v63 = vld [vmem:[%s2175_s0 + $0x48] sm:$0xff] }
  0x54   :  { %1346 = vmatprep.subr.mxu1 %v2248_v58  ;;  %1142 = vmatpush3.msra.mxu0 %v2254_v62 }
  0x55   :  { %1347 = vmatpush3.msra.mxu1 %v1866_v14  ;;  %1143 = vmatprep.subr.mxu0 %v2255_v60 }
  0x56   :  { %1348 = vmatprep.subr.mxu1 %v2248_v58  ;;  %1144 = vmatpush3.msra.mxu0 %v1796_v55 }
  0x57   :  { %448 = vmatprep.mubr.f32.mxu0 %v983_v57  ;;  %1349 = vmatpush3.msra.mxu1 %v1875_v18  ;;  %v2256_v57 = vld [vmem:[#allocation2_spill] sm:$0xff] }
  0x58   :  { %449 = vmatmul.mubr.f32.vlgmr.msra.gmra.mxu0 %v982_v59  ;;  %1350 = vmatprep.mubr.msk.f32.mxu1 %vm1394_vm1, %v2248_v58  ;;  %v2257_v59 = vld [vmem:[#allocation3_spill] sm:$0xff] }
  0x59   :  { %1157 = vmatprep.subr.mxu0 %v1418_v0  ;;  %1192 = vmatprep.subr.mxu1 %v1423_v1 }
  0x5a   :  { %1351 = vmatmul.mubr.msk.f32.vlgmr.msra.gmra.mxu1 %vm91_vm0, %v984_v63  ;;  %1158 = vmatpush3.msra.mxu0 %v1428_v2  ;;  %v2258_v63 = vld [vmem:[#allocation4_spill] sm:$0xff] }
  0x5b   :  { %1193 = vmatpush3.msra.mxu1 %v1435_v3  ;;  %1159 = vmatprep.subr.mxu0 %v1440_v4 }
  0x5c   :  { %1194 = vmatprep.subr.mxu1 %v1445_v5  ;;  %1160 = vmatpush3.msra.mxu0 %v1452_v6 }
  0x5d   :  { %1195 = vmatpush3.msra.mxu1 %v1457_v7  ;;  %1161 = vmatprep.subr.mxu0 %v1462_v8 }
  0x5e   :  { %1196 = vmatprep.subr.mxu1 %v1469_v9  ;;  %1162 = vmatpush3.msra.mxu0 %v1474_v10 }
  0x5f   :  { %1197 = vmatpush3.msra.mxu1 %v1479_v11  ;;  %1163 = vmatprep.subr.mxu0 %v1486_v12 }
  0x60   :  { %1198 = vmatprep.subr.mxu1 %v1491_v13  ;;  %1164 = vmatpush3.msra.mxu0 %v2256_v57 }
  0x61   :  { %1199 = vmatpush3.msra.mxu1 %v1503_v15  ;;  %1165 = vmatprep.subr.mxu0 %v1510_v16 }
  0x62   :  { %1200 = vmatprep.subr.mxu1 %v1515_v17  ;;  %1166 = vmatpush3.msra.mxu0 %v2257_v59 }
  0x63   :  { %1201 = vmatpush3.msra.mxu1 %v1527_v19  ;;  %1167 = vmatprep.subr.mxu0 %v2258_v63 }
  0x64   :  { %1202 = vmatprep.subr.mxu1 %v1539_v21  ;;  %1168 = vmatpush3.msra.mxu0 %v1546_v22 }
  0x65   :  { %1203 = vmatpush3.msra.mxu1 %v1551_v23  ;;  %1169 = vmatprep.subr.mxu0 %v1558_v24 }
  0x66   :  { %1204 = vmatprep.subr.mxu1 %v1563_v25  ;;  %1170 = vmatpush3.msra.mxu0 %v1570_v26 }
  0x67   :  { %1205 = vmatpush3.msra.mxu1 %v1575_v27  ;;  %1171 = vmatprep.subr.mxu0 %v1582_v28 }
  0x68   :  { %1206 = vmatprep.subr.mxu1 %v1587_v29  ;;  %1172 = vmatpush3.msra.mxu0 %v1594_v30 }
  0x69   :  { %1207 = vmatpush3.msra.mxu1 %v1599_v31  ;;  %1173 = vmatprep.subr.mxu0 %v1606_v32 }
  0x6a   :  { %1208 = vmatprep.subr.mxu1 %v1611_v33  ;;  %1174 = vmatpush3.msra.mxu0 %v1618_v34 }
  0x6b   :  { %1209 = vmatpush3.msra.mxu1 %v1623_v35  ;;  %1175 = vmatprep.subr.mxu0 %v1630_v36 }
  0x6c   :  { %1210 = vmatprep.subr.mxu1 %v1635_v37  ;;  %1176 = vmatpush3.msra.mxu0 %v1642_v38 }
  0x6d   :  { %1211 = vmatpush3.msra.mxu1 %v1647_v39  ;;  %1177 = vmatprep.subr.mxu0 %v1654_v40 }
  0x6e   :  { %1212 = vmatprep.subr.mxu1 %v1659_v41  ;;  %1178 = vmatpush3.msra.mxu0 %v1666_v42 }
  0x6f   :  { %1213 = vmatpush3.msra.mxu1 %v1671_v43  ;;  %1179 = vmatprep.subr.mxu0 %v1678_v44 }
  0x70   :  { %1214 = vmatprep.subr.mxu1 %v1683_v45  ;;  %1180 = vmatpush3.msra.mxu0 %v1690_v46  ;;  %v2261_v45 = vld [vmem:[#allocation16_spill] sm:$0xff] }
  0x71   :  { %1215 = vmatpush3.msra.mxu1 %v1695_v47  ;;  %1181 = vmatprep.subr.mxu0 %v1702_v48  ;;  %v2259_v47 = vld [vmem:[#allocation12_spill] sm:$0xff] }
  0x72   :  { %1216 = vmatprep.subr.mxu1 %v2249_v61  ;;  %1182 = vmatpush3.msra.mxu0 %v1714_v50  ;;  %v987_v61 = vld [vmem:[%s2175_s0 + $0x58] sm:$0xff] }
  0x73   :  { %1217 = vmatpush3.msra.mxu1 %v2250_v20  ;;  %1183 = vmatprep.subr.mxu0 %v1726_v52  ;;  %v2260_v20 = vld [vmem:[#allocation14_spill] sm:$0xff] }
  0x74   :  { %1218 = vmatprep.subr.mxu1 %v2251_v49  ;;  %1184 = vmatpush3.msra.mxu0 %v1738_v54  ;;  %v989_v49 = vld [vmem:[%s2175_s0 + $0x68] sm:$0xff] }
  0x75   :  { %1219 = vmatpush3.msra.mxu1 %v2252_v53  ;;  %1185 = vmatprep.subr.mxu0 %v1750_v56  ;;  %v988_v53 = vld [vmem:[%s2175_s0 + $0x60] sm:$0xff] }
  0x76   :  { %1220 = vmatprep.subr.mxu1 %v2253_v51  ;;  %1186 = vmatpush3.msra.mxu0 %v2259_v47  ;;  %v986_v51 = vld [vmem:[%s2175_s0 + $0x50] sm:$0xff] }
  0x77   :  { %1221 = vmatpush3.msra.mxu1 %v2254_v62  ;;  %1187 = vmatprep.subr.mxu0 %v2260_v20  ;;  %v2263_v62 = vld [vmem:[#allocation18_spill] sm:$0xff] }
  0x78   :  { %1222 = vmatprep.subr.mxu1 %v2255_v60  ;;  %1188 = vmatpush3.msra.mxu0 %v2261_v45  ;;  %v2262_v60 = vld [vmem:[#allocation17_spill] sm:$0xff] }
  0x79   :  { %598 = vmatprep.mubr.f32.mxu0 %v987_v61  ;;  %1223 = vmatpush3.msra.mxu1 %v1796_v55 }
  0x7a   :  { %668 = vmatprep.mubr.f32.mxu1 %v989_v49  ;;  %599 = vmatmul.mubr.f32.vlgmr.msra.gmra.mxu0 %v986_v51  ;;  %v2264_v49 = vld [vmem:[#allocation19_spill] sm:$0xff] }
  0x7b   :  { %669 = vmatmul.mubr.f32.vlgmr.msra.gmra.mxu1 %v988_v53  ;;  %1353 = vmatprep.subr.mxu0 %v2248_v58 }
  0x7c   :  { %1236 = vmatprep.subr.mxu1 %v1418_v0  ;;  %1354 = vmatpush3.msra.mxu0 %v2262_v60  ;;  %v2265_v0 = vld [vmem:[#allocation20_spill] sm:$0xff] }
  0x7d   :  { %1237 = vmatpush3.msra.mxu1 %v1428_v2  ;;  %1355 = vmatprep.subr.mxu0 %v2248_v58  ;;  %v2266_v2 = vld [vmem:[#allocation21_spill] sm:$0xff] }
  0x7e   :  { %1238 = vmatprep.subr.mxu1 %v1440_v4  ;;  %1356 = vmatpush3.msra.mxu0 %v2263_v62  ;;  %v2267_v4 = vld [vmem:[#allocation22_spill] sm:$0xff] }
  0x7f   :  { %1239 = vmatpush3.msra.mxu1 %v1452_v6  ;;  %1357 = vmatprep.subr.mxu0 %v2248_v58  ;;  %v990_v6 = vld [vmem:[%s2175_s0 + $0x70] sm:$0xff] }
  0x80   :  { %1240 = vmatprep.subr.mxu1 %v1462_v8  ;;  %1358 = vmatpush3.msra.mxu0 %v2264_v49  ;;  %v2270_v8 = vld [vmem:[#allocation7_spill] sm:$0xff] }
  0x81   :  { %1241 = vmatpush3.msra.mxu1 %v1474_v10  ;;  %1359 = vmatprep.subr.mxu0 %v2248_v58  ;;  %v2272_v10 = vld [vmem:[#allocation9_spill] sm:$0xff] }
  0x82   :  { %1242 = vmatprep.subr.mxu1 %v1486_v12  ;;  %1360 = vmatpush3.msra.mxu0 %v2265_v0  ;;  %v2274_v12 = vld [vmem:[#allocation11_spill] sm:$0xff] }
  0x83   :  { %1243 = vmatpush3.msra.mxu1 %v2256_v57  ;;  %1361 = vmatprep.subr.mxu0 %v2248_v58  ;;  %v998_v57 = vld [vmem:[%s2176_s2] ss:$0 sm:$0xff] }
  0x84   :  { %1244 = vmatprep.subr.mxu1 %v1510_v16  ;;  %1362 = vmatpush3.msra.mxu0 %v2266_v2  ;;  %v994_v16 = vld [vmem:[%s2175_s0 + $0x88] sm:$0xff] }
  0x85   :  { %1245 = vmatpush3.msra.mxu1 %v2257_v59  ;;  %1363 = vmatprep.subr.mxu0 %v2248_v58 }
  0x86   :  { %1246 = vmatprep.subr.mxu1 %v2258_v63  ;;  %1364 = vmatpush3.msra.mxu0 %v2267_v4 }
  0x87   :  { %1369 = vmatprep.mubr.msk.f32.mxu0 %vm1394_vm1, %v2248_v58  ;;  %1365 = vmatprep.subr.mxu0 %v2248_v58 }
  0x88   :  { %1247 = vmatpush3.msra.mxu1 %v1546_v22  ;;  %1366 = vmatpush3.msra.mxu0 %v1866_v14 }
  0x89   :  { %1248 = vmatprep.subr.mxu1 %v1558_v24  ;;  %1367 = vmatprep.subr.mxu0 %v2248_v58 }
  0x8a   :  { %1249 = vmatpush3.msra.mxu1 %v1570_v26  ;;  %1368 = vmatpush3.msra.mxu0 %v1875_v18 }
  0x8b   :  { %1250 = vmatprep.subr.mxu1 %v1582_v28  ;;  %1370 = vmatmul.mubr.msk.f32.vlgmr.msra.gmra.mxu0 %vm91_vm0, %v990_v6 }
  0x8c   :  { %1271 = vmatprep.subr.mxu0 %v1423_v1  ;;  %1251 = vmatpush3.msra.mxu1 %v1594_v30  ;;  %v993_v1 = vld [vmem:[%s2175_s0 + $0x80] sm:$0xff] }
  0x8d   :  { %1272 = vmatpush3.msra.mxu0 %v1435_v3  ;;  %1252 = vmatprep.subr.mxu1 %v1606_v32  ;;  %v992_v3 = vld [vmem:[%s2175_s0 + $0x78] sm:$0xff] }
  0x8e   :  { %1273 = vmatprep.subr.mxu0 %v1445_v5  ;;  %1253 = vmatpush3.msra.mxu1 %v1618_v34  ;;  %v2268_v5 = vld [vmem:[#allocation5_spill] sm:$0xff] }
  0x8f   :  { %1274 = vmatpush3.msra.mxu0 %v1457_v7  ;;  %1254 = vmatprep.subr.mxu1 %v1630_v36  ;;  %v2269_v7 = vld [vmem:[#allocation6_spill] sm:$0xff] }
  0x90   :  { %1275 = vmatprep.subr.mxu0 %v1469_v9  ;;  %1255 = vmatpush3.msra.mxu1 %v1642_v38  ;;  %v2271_v9 = vld [vmem:[#allocation8_spill] sm:$0xff] }
  0x91   :  { %1276 = vmatpush3.msra.mxu0 %v1479_v11  ;;  %1256 = vmatprep.subr.mxu1 %v1654_v40  ;;  %v2273_v11 = vld [vmem:[#allocation10_spill] sm:$0xff] }
  0x92   :  { %1277 = vmatprep.subr.mxu0 %v1491_v13  ;;  %1257 = vmatpush3.msra.mxu1 %v1666_v42  ;;  %v995_v13 = vld [vmem:[%s2175_s0 + $0x90] sm:$0xff] }
  0x93   :  { %1278 = vmatpush3.msra.mxu0 %v1503_v15  ;;  %1258 = vmatprep.subr.mxu1 %v1678_v44  ;;  %v2275_v15 = vld [vmem:[#allocation13_spill] sm:$0xff] }
  0x94   :  { %1279 = vmatprep.subr.mxu0 %v1515_v17  ;;  %1259 = vmatpush3.msra.mxu1 %v1690_v46  ;;  %v2276_v17 = vld [vmem:[#allocation15_spill] sm:$0xff] }
  0x95   :  { %1280 = vmatpush3.msra.mxu0 %v1527_v19  ;;  %1260 = vmatprep.subr.mxu1 %v1702_v48  ;;  %v996_v19 = vld [vmem:[%s2175_s0 + $0x98] sm:$0xff] }
  0x96   :  { %1281 = vmatprep.subr.mxu0 %v1539_v21  ;;  %1261 = vmatpush3.msra.mxu1 %v1714_v50 }
  0x97   :  { %1282 = vmatpush3.msra.mxu0 %v1551_v23  ;;  %1262 = vmatprep.subr.mxu1 %v1726_v52 }
  0x98   :  { %1283 = vmatprep.subr.mxu0 %v1563_v25  ;;  %1263 = vmatpush3.msra.mxu1 %v1738_v54 }
  0x99   :  { %1284 = vmatpush3.msra.mxu0 %v1575_v27  ;;  %1264 = vmatprep.subr.mxu1 %v1750_v56 }
  0x9a   :  { %1285 = vmatprep.subr.mxu0 %v1587_v29  ;;  %1265 = vmatpush3.msra.mxu1 %v2259_v47 }
  0x9b   :  { %1286 = vmatpush3.msra.mxu0 %v1599_v31  ;;  %1266 = vmatprep.subr.mxu1 %v2260_v20 }
  0x9c   :  { %1287 = vmatprep.subr.mxu0 %v1611_v33  ;;  %1267 = vmatpush3.msra.mxu1 %v2261_v45 }
  0x9d   :  { %1288 = vmatpush3.msra.mxu0 %v1623_v35  ;;  %818 = vmatprep.mubr.f32.mxu1 %v993_v1 }
  0x9e   :  { %1289 = vmatprep.subr.mxu0 %v1635_v37  ;;  %1372 = vmatprep.subr.mxu1 %v2248_v58 }
  0x9f   :  { %1290 = vmatpush3.msra.mxu0 %v1647_v39  ;;  %819 = vmatmul.mubr.f32.vlgmr.msra.gmra.mxu1 %v992_v3 }
  0xa0   :  { %1291 = vmatprep.subr.mxu0 %v1659_v41  ;;  %1373 = vmatpush3.msra.mxu1 %v2262_v60 }
  0xa1   :  { %1292 = vmatpush3.msra.mxu0 %v1671_v43  ;;  %1374 = vmatprep.subr.mxu1 %v2248_v58 }
  0xa2   :  { %1293 = vmatprep.subr.mxu0 %v2268_v5  ;;  %1375 = vmatpush3.msra.mxu1 %v2263_v62 }
  0xa3   :  { %1294 = vmatpush3.msra.mxu0 %v2269_v7  ;;  %1376 = vmatprep.subr.mxu1 %v2248_v58 }
  0xa4   :  { %1295 = vmatprep.subr.mxu0 %v2270_v8  ;;  %1377 = vmatpush3.msra.mxu1 %v2264_v49 }
  0xa5   :  { %1296 = vmatpush3.msra.mxu0 %v2271_v9  ;;  %1378 = vmatprep.subr.mxu1 %v2248_v58 }
  0xa6   :  { %1297 = vmatprep.subr.mxu0 %v2272_v10  ;;  %1379 = vmatpush3.msra.mxu1 %v2265_v0 }
  0xa7   :  { %1298 = vmatpush3.msra.mxu0 %v2273_v11  ;;  %1380 = vmatprep.subr.mxu1 %v2248_v58 }
  0xa8   :  { %1299 = vmatprep.subr.mxu0 %v2274_v12  ;;  %1381 = vmatpush3.msra.mxu1 %v2266_v2 }
  0xa9   :  { %1300 = vmatpush3.msra.mxu0 %v2275_v15  ;;  %1382 = vmatprep.subr.mxu1 %v2248_v58 }
  0xaa   :  { %1301 = vmatprep.subr.mxu0 %v2276_v17  ;;  %888 = vmatprep.mubr.f32.mxu0 %v995_v13 }
  0xab   :  { %1302 = vmatpush3.msra.mxu0 %v1796_v55  ;;  %1383 = vmatpush3.msra.mxu1 %v2267_v4 }
  0xac   :  { %889 = vmatmul.mubr.f32.vlgmr.msra.gmra.mxu0 %v994_v16  ;;  %1384 = vmatprep.subr.mxu1 %v2248_v58 }
  0xad   :  { %1388 = vmatprep.mubr.msk.f32.mxu1 %vm1394_vm1, %v2248_v58  ;;  %1385 = vmatpush3.msra.mxu1 %v1866_v14 }
  0xae   :  { %1386 = vmatprep.subr.mxu1 %v2248_v58 }
  0xaf   :  { %1387 = vmatpush3.msra.mxu1 %v1875_v18 }
  0xb0   :  { %1389 = vmatmul.mubr.msk.f32.vlgmr.msra.gmra.mxu1 %vm91_vm0, %v996_v19 }
  0xe4   :  { %v1031_v21 = vpop.f32.mrf.mxu0 }
  0xe5   :  { %v1066_v22 = vpop.f32.mrf.mxu1 }
  0xe6   :  { %v1032_v23 = vpop.f32.mrf.mxu0 }
  0xe7   :  { %v1067_v24 = vpop.f32.mrf.mxu1  ;;  %v1033_v25 = vadd.f32 %v1032_v23, %v1031_v21 }
  0xe8   :  { %v1068_v26 = vadd.f32 %v1067_v24, %v1066_v22 }
  0xea   :  { %v232_v27 = vadd.f32 %v1068_v26, %v1033_v25 }
  0xf6   :  { %v301_v28 = vpop.f32.mrf.mxu0 }
  0xf7   :  { %v302_v29 = vadd.f32 %v301_v28, %v232_v27 }
  0xf8   :  { %v1333_v14 = vpop.f32.mrf.mxu0 }
 0x108   :  { %v1110_v30 = vpop.f32.mrf.mxu1 }
 0x10a   :  { %v1111_v31 = vpop.f32.mrf.mxu1 }
 0x10b   :  { %v1112_v32 = vadd.f32 %v1111_v31, %v1110_v30 }
 0x118   :  { %v1145_v33 = vpop.f32.mrf.mxu0 }
 0x11a   :  { %v1146_v34 = vpop.f32.mrf.mxu0  ;;  %v520_v35 = vpop.f32.mrf.mxu1 }
 0x11b   :  { %v1147_v36 = vadd.f32 %v1146_v34, %v1145_v33 }
 0x11c   :  { %v1352_v18 = vpop.f32.mrf.mxu1 }
 0x11d   :  { %v451_v37 = vadd.f32 %v1147_v36, %v1112_v32 }
 0x11f   :  { %v521_v38 = vadd.f32 %v520_v35, %v451_v37 }
 0x121   :  { %v524_v39 = vmax.f32 %v302_v29, %v521_v38 }
 0x13a   :  { %v1189_v40 = vpop.f32.mrf.mxu0 }
 0x13b   :  { %v1224_v44 = vpop.f32.mrf.mxu1 }
 0x13c   :  { %v1190_v41 = vpop.f32.mrf.mxu0 }
 0x13d   :  { %v1225_v45 = vpop.f32.mrf.mxu1  ;;  %v1191_v47 = vadd.f32 %v1190_v41, %v1189_v40 }
 0x13e   :  { %v1226_v48 = vadd.f32 %v1225_v45, %v1224_v44 }
 0x140   :  { %v671_v52 = vadd.f32 %v1226_v48, %v1191_v47 }
 0x14b   :  { %v740_v42 = vpop.f32.mrf.mxu0 }
 0x14c   :  { %v741_v55 = vadd.f32 %v740_v42, %v671_v52 }
 0x14d   :  { %v1371_v43 = vpop.f32.mrf.mxu0 }
 0x14e   :  { %v744_v53 = vmax.f32 %v524_v39, %v741_v55 }
 0x15f   :  { %v1268_v46 = vpop.f32.mrf.mxu1 }
 0x161   :  { %v1269_v50 = vpop.f32.mrf.mxu1 }
 0x162   :  { %v1270_v56 = vadd.f32 %v1269_v50, %v1268_v46 }
 0x16c   :  { %v1303_v51 = vpop.f32.mrf.mxu0 }
 0x16e   :  { %v1304_v54 = vpop.f32.mrf.mxu0 }
 0x16f   :  { %v1305_v58 = vadd.f32 %v1304_v54, %v1303_v51 }
 0x170   :  { %v960_v62 = vpop.f32.mrf.mxu1 }
 0x171   :  { %v891_v60 = vadd.f32 %v1305_v58, %v1270_v56 }
 0x172   :  { %v1390_v20 = vpop.f32.mrf.mxu1 }
 0x173   :  { %v961_v61 = vadd.f32 %v960_v62, %v891_v60 }
 0x175   :  { %v964_v59 = vmax.f32 %v744_v53, %v961_v61 }
 0x177   :  { %v972_v63 = vadd.f32 %v998_v57, %v964_v59 }
 0x179   :  { %v973_v49 = vmax.f32 %v972_v63, 0.0 }
 0x17b   :  { %974 = vst.msk [vmem:[%s2177_s3] sm:$0xff] %vm91_vm0, %v973_v49 }

</bundles_post_ra>
